<compile_context>
chip_gen: v7x
topology: tpu7x:2x2x1
jax: 0.10.0
libtpu: 0.0.40
codegen_flags: <defaults>
</compile_context>

<pallas_src>
import functools

import jax
import jax.numpy as jnp
from jax.experimental import pallas as pl
from jax.experimental.pallas import tpu as pltpu


# --------------------------------------------------------------------------
# Phase-decomposition selectors.
#   row phase a=0 -> taps at padded rows {i, i+1}   with weights {W0, W1+W2}
#   row phase a=1 -> taps at padded rows {i+1, i+2} with weights {W0+W1, W2}
# (identical structure for the column phases b=0/1).
# --------------------------------------------------------------------------
_ROW_SEL = jnp.array([[[1., 0., 0.], [0., 1., 1.]],
                      [[1., 1., 0.], [0., 0., 1.]]], jnp.float32)   # (a, r, kh)
_COL_SEL_B0 = jnp.array([[1., 0., 0.], [0., 1., 1.], [0., 0., 0.]],
                        jnp.float32)                                 # (c, kw)
_COL_SEL_B1 = jnp.array([[0., 0., 0.], [1., 1., 0.], [0., 0., 1.]],
                        jnp.float32)                                 # (c, kw)


def _row_combined(weight_oihw):
    """(Cout, Cin, 3, 3) -> (a, r, kw, Cin, Cout) with row taps pre-summed."""
    w = jnp.transpose(weight_oihw, (2, 3, 1, 0)).astype(jnp.float32)  # (kh,kw,Ci,Co)
    return jnp.einsum('ark,klio->arlio', _ROW_SEL, w)                 # (2,2,3,Ci,Co)


def _packed_weights(weight_oihw, dtype):
    """Packed-lane weights (2, 2, 3, Cin, 2*Cout); lane order is (b, cout)."""
    wr = _row_combined(weight_oihw)
    w_b0 = jnp.einsum('cl,arlio->arcio', _COL_SEL_B0, wr)
    w_b1 = jnp.einsum('cl,arlio->arcio', _COL_SEL_B1, wr)
    return jnp.concatenate([w_b0, w_b1], axis=-1).astype(dtype)


def _split_weights(weight_oihw, dtype):
    """Zero-tap-free weights: middle tap (2,2,Cin,2*Cout) + edge tap (same)."""
    wr = _row_combined(weight_oihw)                                  # (2,2,3,Ci,Co)
    w_mid = jnp.concatenate([wr[:, :, 1] + wr[:, :, 2],              # b=0 middle
                             wr[:, :, 0] + wr[:, :, 1]], axis=-1)    # b=1 middle
    w_edge = jnp.concatenate([wr[:, :, 0],                           # b=0: left tap
                              wr[:, :, 2]], axis=-1)                 # b=1: right tap
    return w_mid.astype(dtype), w_edge.astype(dtype)


# --------------------------------------------------------------------------
# Kernels
# --------------------------------------------------------------------------
def _packed_kernel(xt_ref, w_ref, b_ref, o_ref):
    """General kernel: both column phases share every dot (6*C MACs/output).

    xt_ref: (1, 1, TH+2, W+2, C)   padded input row tile (original resolution)
    w_ref : (2, 2, 3, C, PC)       [row phase, row tap, col tap, cin, packed lanes]
    b_ref : (1, PC)                bias chunk (f32), packed (b, cout)-major
    o_ref : (1, 1, TH, 2, W, PC)   output tile chunk
    """
    th = o_ref.shape[2]
    wout = o_ref.shape[4]
    dn = (((2,), (0,)), ((), ()))                       # contract cin only
    bias = b_ref[0].astype(jnp.float32)
    for a in range(2):                                  # output row phase y = 2i+a
        acc = None                                      # register accumulator
        for r in range(2):                              # 2 row taps per phase
            for kc in range(3):                         # 3 col taps (both b phases)
                x = xt_ref[0, 0, a + r:a + r + th, kc:kc + wout, :]
                contrib = jax.lax.dot_general(
                    x, w_ref[a, r, kc], dimension_numbers=dn,
                    preferred_element_type=jnp.float32)
                acc = contrib if acc is None else acc + contrib
        # One lane-dense store per row phase; bias folded into the store.
        o_ref[0, 0, :, a] = (acc + bias).astype(o_ref.dtype)


def _split_kernel(xt_ref, wm_ref, we_ref, b_ref, o_ref, *, n_b0_chunks, co_axis):
    """Zero-tap-free kernel (4*C MACs/output); each chunk is one column phase.

    xt_ref: (1, 1, TH+2, W+2, C)
    wm_ref: (2, 2, C, PC)   middle-column-tap weights for this packed chunk
    we_ref: (2, 2, C, PC)   edge-tap weights (left for b=0 chunks, right for b=1)
    b_ref : (1, PC)
    o_ref : (1, 1, TH, 2, W, PC)
    """
    th = o_ref.shape[2]
    wout = o_ref.shape[4]
    dn = (((2,), (0,)), ((), ()))
    bias = b_ref[0].astype(jnp.float32)
    # Chunks never straddle the column-phase boundary (PC divides Cout), so the
    # chunk's phase — and hence the edge-tap window offset (0 or 2) — is a pure
    # function of the chunk grid index.
    edge_c = 2 * (pl.program_id(co_axis) >= n_b0_chunks).astype(jnp.int32)
    for a in range(2):
        acc = None
        for r in range(2):
            x_mid = xt_ref[0, 0, a + r:a + r + th, 1:1 + wout, :]
            contrib = jax.lax.dot_general(
                x_mid, wm_ref[a, r], dimension_numbers=dn,
                preferred_element_type=jnp.float32)
            x_edge = xt_ref[0, 0, a + r:a + r + th, pl.ds(edge_c, wout), :]
            contrib = contrib + jax.lax.dot_general(
                x_edge, we_ref[a, r], dimension_numbers=dn,
                preferred_element_type=jnp.float32)
            acc = contrib if acc is None else acc + contrib
        o_ref[0, 0, :, a] = (acc + bias).astype(o_ref.dtype)


# --------------------------------------------------------------------------
# Tiling heuristics
# --------------------------------------------------------------------------
def _choose_tile_h(h, w, n, tile_h=None):
    """Row-tile height: divides H, targets TH*W ~ 512, keeps >= 2 grid steps."""
    if tile_h is None:
        tile_h = max(8, pl.cdiv(512, max(w, 1)))
    th = max(1, min(int(tile_h), h))
    while h % th:          # NOTE: prime H collapses towards 1 (correct, slower).
        th -= 1
    if n * (h // th) < 2:  # give v7x's two TensorCores / the pipeline some depth
        for cand in range(th // 2, max(1, th // 8) - 1, -1):
            if h % cand == 0:
                th = cand
                break
    return th


def _choose_chunk(cout, cin, split, itemsize, budget_bytes=8 * 2 ** 20):
    """Packed-lane chunk width (PC).  Keeps per-buffer weight slab <= budget."""
    pck = 2 * cout
    if split:
        # Chunks must not straddle the column-phase boundary: PC | Cout.
        cands = [m for m in range(128, cout + 1, 128) if cout % m == 0]
        per_chunk = lambda m: 8 * cin * m * itemsize          # w_mid + w_edge
    else:
        if pck % 128 == 0:
            cands = [m for m in range(128, pck + 1, 128) if pck % m == 0]
        else:
            cands = [pck]                                     # full-dim block only
        per_chunk = lambda m: 12 * cin * m * itemsize
    fitting = [m for m in cands if per_chunk(m) <= budget_bytes]
    return max(fitting) if fitting else min(cands)


# --------------------------------------------------------------------------
# Forward wrappers
# --------------------------------------------------------------------------
def upsample_forward_nhwc(x_nhwc, weight_oihw, bias, *, tile_h=None,
                          compute_dtype=jnp.bfloat16, out_dtype=None):
    """Nearest-2x upsample + conv3x3(pad=1) + bias.  NHWC in, NHWC out."""
    n, h, w, c = x_nhwc.shape
    cout = weight_oihw.shape[0]
    out_dtype = x_nhwc.dtype if out_dtype is None else out_dtype
    pck = 2 * cout                       # packed output lane width: (b, cout)-major

    isz = jnp.dtype(compute_dtype).itemsize
    osz = jnp.dtype(out_dtype).itemsize

    th = _choose_tile_h(h, w, n, tile_h)
    n_t = h // th

    split = (cout % 128 == 0)            # zero-tap-free path needs 128-aligned Cout
    pc = _choose_chunk(cout, c, split, isz)
    n_co = pck // pc

    # ---- wrapper glue (original resolution only; no 2x intermediate) ----
    xb = x_nhwc.astype(compute_dtype)
    xp = jnp.pad(xb, ((0, 0), (1, 1), (1, 1), (0, 0)))            # (N, H+2, W+2, C)
    # Row tiles with +1-row halos gathered so Pallas blocks never overlap.
    # TODO(synk): replace with a pl.ANY input + manual make_async_copy double
    # buffer to drop this extra activation HBM pass.
    xt = jnp.stack([xp[:, t * th:t * th + th + 2] for t in range(n_t)], axis=1)

    b2 = jnp.concatenate([bias, bias]).reshape(1, pck).astype(jnp.float32)

    # ---- VMEM budget, clamped to the chip's real capacity ----
    in_tile = (th + 2) * (w + 2) * c * isz
    out_tile = th * 2 * w * pc * osz
    wchunk = (8 if split else 12) * c * pc * isz
    est = (2 * in_tile + 2 * out_tile + 2 * wchunk
           + 2 * pck * 4 + th * w * pc * 4)          # bias + accumulator headroom
    try:
        vmem_cap = int(getattr(pltpu.get_tpu_info(), "vmem_capacity_bytes",
                               128 * 2 ** 20))
    except Exception:
        vmem_cap = 128 * 2 ** 20
    vmem_limit = min(int(0.85 * vmem_cap), max(32 * 2 ** 20, 2 * est + (4 << 20)))

    # ---- grid: (packed chunk, batch, row tile) — chunk outermost so the big
    # weight slab stays VMEM-resident across the inner loops (copy elision),
    # while the small input tiles are re-streamed per chunk. ----
    grid = (n_co, n, n_t)
    in_spec_x = pl.BlockSpec((1, 1, th + 2, w + 2, c),
                             lambda co, ni, ti: (ni, ti, 0, 0, 0))
    bias_spec = pl.BlockSpec((1, pc), lambda co, ni, ti: (0, co))
    out_spec = pl.BlockSpec((1, 1, th, 2, w, pc),
                            lambda co, ni, ti: (ni, ti, 0, 0, 0, co))
    out_shape = jax.ShapeDtypeStruct((n, n_t, th, 2, w, pck), out_dtype)
    cparams = pltpu.CompilerParams(
        dimension_semantics=("parallel", "parallel", "parallel"),
        vmem_limit_bytes=int(vmem_limit))

    if split:
        wm, we = _split_weights(weight_oihw, compute_dtype)
        kern = functools.partial(_split_kernel, n_b0_chunks=cout // pc, co_axis=0)
        in_specs = [
            in_spec_x,
            pl.BlockSpec((2, 2, c, pc), lambda co, ni, ti: (0, 0, 0, co)),
            pl.BlockSpec((2, 2, c, pc), lambda co, ni, ti: (0, 0, 0, co)),
            bias_spec,
        ]
        operands = (xt, wm, we, b2)
    else:
        wc = _packed_weights(weight_oihw, compute_dtype)
        kern = _packed_kernel
        in_specs = [
            in_spec_x,
            pl.BlockSpec((2, 2, 3, c, pc), lambda co, ni, ti: (0, 0, 0, 0, co)),
            bias_spec,
        ]
        operands = (xt, wc, b2)

    out6 = pl.pallas_call(
        kern,
        out_shape=out_shape,
        grid_spec=pltpu.PrefetchScalarGridSpec(
            num_scalar_prefetch=0, grid=grid,
            in_specs=in_specs, out_specs=out_spec),
        compiler_params=cparams,
    )(*operands)

    # Free reshape: (N, n_t, TH, 2, W, 2*Cout) is row-major identical to
    # (N, 2H, 2W, Cout).
    return out6.reshape(n, 2 * h, 2 * w, cout)


def upsample_forward(x_nchw, weight_oihw, bias, *, tile_h=None,
                     compute_dtype=jnp.bfloat16, out_dtype=None):
    """Upsample(channels, use_conv=True, dims=2, padding=1).forward — NCHW API."""
    # TODO(synk): keep the surrounding model NHWC end-to-end to drop these two
    # full-HBM layout passes (kept only for PyTorch NCHW interface fidelity).
    x_nhwc = jnp.transpose(x_nchw, (0, 2, 3, 1))
    out = upsample_forward_nhwc(x_nhwc, weight_oihw, bias, tile_h=tile_h,
                                compute_dtype=compute_dtype, out_dtype=out_dtype)
    return jnp.transpose(out, (0, 3, 1, 2))


# --------------------------------------------------------------------------
# Test
# --------------------------------------------------------------------------
def _reference(x_nchw, weight, bias, compute_dtype=jnp.bfloat16):
    """Nearest-2x + 3x3 conv reference at matching (bf16-operand) precision."""
    xb = x_nchw.astype(compute_dtype).astype(jnp.float32)
    wb = weight.astype(compute_dtype).astype(jnp.float32)
    up = jnp.repeat(jnp.repeat(xb, 2, axis=2), 2, axis=3)
    out = jax.lax.conv_general_dilated(
        up, wb, window_strides=(1, 1), padding=((1, 1), (1, 1)),
        dimension_numbers=("NCHW", "OIHW", "NCHW"))
    return out + bias.reshape(1, -1, 1, 1)


if __name__ == "__main__":
    key = jax.random.PRNGKey(0)
    k1, k2, k3, k4, k5, k6 = jax.random.split(key, 6)

    # --- config 1: module defaults at small shapes (packed-lane kernel path) ---
    N, C, H, W = 2, 4, 16, 16
    COUT = 4
    x = jax.random.normal(k1, (N, C, H, W), dtype=jnp.float32)
    wgt = jax.random.normal(k2, (COUT, C, 3, 3), dtype=jnp.float32) * 0.1
    b = jax.random.normal(k3, (COUT,), dtype=jnp.float32) * 0.1

    out = jax.block_until_ready(upsample_forward(x, wgt, b))
    assert out.shape == (N, COUT, 2 * H, 2 * W), out.shape
    ref = _reference(x, wgt, b)
    err = float(jnp.max(jnp.abs(out - ref)))
    assert jnp.allclose(out, ref, rtol=2e-2, atol=2e-2), err

    # --- config 2: 128-channel case exercising the zero-tap-free split kernel ---
    N2, C2, H2, W2 = 1, 128, 8, 8
    x2 = jax.random.normal(k4, (N2, C2, H2, W2), dtype=jnp.float32)
    wgt2 = jax.random.normal(k5, (C2, C2, 3, 3), dtype=jnp.float32) * 0.05
    b2 = jax.random.normal(k6, (C2,), dtype=jnp.float32) * 0.1

    out2 = jax.block_until_ready(upsample_forward(x2, wgt2, b2))
    assert out2.shape == (N2, C2, 2 * H2, 2 * W2), out2.shape
    ref2 = _reference(x2, wgt2, b2)
    err2 = float(jnp.max(jnp.abs(out2 - ref2)))
    assert jnp.allclose(out2, ref2, rtol=5e-2, atol=5e-2), err2

    print("KERNEL_OK")
</pallas_src>

<mosaic_0001>
module attributes {stable_mosaic.version = 11 : i64} {
  func.func @_packed_kernel(%arg0: i32, %arg1: i32, %arg2: i32, %arg3: memref<1x1x18x18x4xbf16, #tpu.memory_space<vmem>>, %arg4: memref<2x2x3x4x8xbf16, #tpu.memory_space<vmem>>, %arg5: memref<1x8xf32, #tpu.memory_space<vmem>>, %arg6: memref<1x1x16x2x16x8xf32, #tpu.memory_space<vmem>>) attributes {dimension_semantics = [#tpu.dimension_semantics<parallel>, #tpu.dimension_semantics<parallel>, #tpu.dimension_semantics<parallel>], iteration_bounds = array<i64: 1, 2, 1>, scalar_prefetch = 0 : i64, scratch_operands = 0 : i64, tpu.core_type = #tpu.core_type<tc>, window_params = [{transform_indices = @transform_0, window_bounds = array<i64: 1, 1, 18, 18, 4>}, {transform_indices = @transform_1, window_bounds = array<i64: 2, 2, 3, 4, 8>}, {transform_indices = @transform_2, window_bounds = array<i64: 1, 8>}, {transform_indices = @transform_3, window_bounds = array<i64: 1, 1, 16, 2, 16, 8>}]} {
    %c0 = arith.constant 0 : index
    %c0_0 = arith.constant 0 : index
    %0 = vector.load %arg5[%c0, %c0_0] : memref<1x8xf32, #tpu.memory_space<vmem>>, vector<1x8xf32>
    %1 = vector.shape_cast %0 : vector<1x8xf32> to vector<8xf32>
    %c0_1 = arith.constant 0 : index
    %c0_2 = arith.constant 0 : index
    %c0_3 = arith.constant 0 : index
    %c0_4 = arith.constant 0 : index
    %c0_5 = arith.constant 0 : index
    %2 = vector.load %arg3[%c0_1, %c0_2, %c0_3, %c0_4, %c0_5] : memref<1x1x18x18x4xbf16, #tpu.memory_space<vmem>>, vector<1x1x16x16x4xbf16>
    %3 = vector.shape_cast %2 : vector<1x1x16x16x4xbf16> to vector<16x16x4xbf16>
    %c0_6 = arith.constant 0 : index
    %c0_7 = arith.constant 0 : index
    %c0_8 = arith.constant 0 : index
    %c0_9 = arith.constant 0 : index
    %c0_10 = arith.constant 0 : index
    %4 = vector.load %arg4[%c0_6, %c0_7, %c0_8, %c0_9, %c0_10] : memref<2x2x3x4x8xbf16, #tpu.memory_space<vmem>>, vector<1x1x1x4x8xbf16>
    %5 = vector.shape_cast %4 : vector<1x1x1x4x8xbf16> to vector<4x8xbf16>
    %cst = arith.constant dense<0.000000e+00> : vector<16x16x8xf32>
    %6 = tpu.matmul %3, %5, %cst {dimension_numbers = #tpu.dot_dimension_numbers<[2], [0], [0, 1], [1], [0, 0, 0, 1, 1, 1], [], []>} : vector<16x16x4xbf16>, vector<4x8xbf16>, vector<16x16x8xf32> -> vector<16x16x8xf32>
    %c0_11 = arith.constant 0 : index
    %c0_12 = arith.constant 0 : index
    %c0_13 = arith.constant 0 : index
    %c1 = arith.constant 1 : index
    %c0_14 = arith.constant 0 : index
    %7 = vector.load %arg3[%c0_11, %c0_12, %c0_13, %c1, %c0_14] : memref<1x1x18x18x4xbf16, #tpu.memory_space<vmem>>, vector<1x1x16x16x4xbf16>
    %8 = vector.shape_cast %7 : vector<1x1x16x16x4xbf16> to vector<16x16x4xbf16>
    %c0_15 = arith.constant 0 : index
    %c0_16 = arith.constant 0 : index
    %c1_17 = arith.constant 1 : index
    %c0_18 = arith.constant 0 : index
    %c0_19 = arith.constant 0 : index
    %9 = vector.load %arg4[%c0_15, %c0_16, %c1_17, %c0_18, %c0_19] : memref<2x2x3x4x8xbf16, #tpu.memory_space<vmem>>, vector<1x1x1x4x8xbf16>
    %10 = vector.shape_cast %9 : vector<1x1x1x4x8xbf16> to vector<4x8xbf16>
    %cst_20 = arith.constant dense<0.000000e+00> : vector<16x16x8xf32>
    %11 = tpu.matmul %8, %10, %cst_20 {dimension_numbers = #tpu.dot_dimension_numbers<[2], [0], [0, 1], [1], [0, 0, 0, 1, 1, 1], [], []>} : vector<16x16x4xbf16>, vector<4x8xbf16>, vector<16x16x8xf32> -> vector<16x16x8xf32>
    %12 = arith.addf %6, %11 : vector<16x16x8xf32>
    %c0_21 = arith.constant 0 : index
    %c0_22 = arith.constant 0 : index
    %c0_23 = arith.constant 0 : index
    %c2 = arith.constant 2 : index
    %c0_24 = arith.constant 0 : index
    %13 = vector.load %arg3[%c0_21, %c0_22, %c0_23, %c2, %c0_24] : memref<1x1x18x18x4xbf16, #tpu.memory_space<vmem>>, vector<1x1x16x16x4xbf16>
    %14 = vector.shape_cast %13 : vector<1x1x16x16x4xbf16> to vector<16x16x4xbf16>
    %c0_25 = arith.constant 0 : index
    %c0_26 = arith.constant 0 : index
    %c2_27 = arith.constant 2 : index
    %c0_28 = arith.constant 0 : index
    %c0_29 = arith.constant 0 : index
    %15 = vector.load %arg4[%c0_25, %c0_26, %c2_27, %c0_28, %c0_29] : memref<2x2x3x4x8xbf16, #tpu.memory_space<vmem>>, vector<1x1x1x4x8xbf16>
    %16 = vector.shape_cast %15 : vector<1x1x1x4x8xbf16> to vector<4x8xbf16>
    %cst_30 = arith.constant dense<0.000000e+00> : vector<16x16x8xf32>
    %17 = tpu.matmul %14, %16, %cst_30 {dimension_numbers = #tpu.dot_dimension_numbers<[2], [0], [0, 1], [1], [0, 0, 0, 1, 1, 1], [], []>} : vector<16x16x4xbf16>, vector<4x8xbf16>, vector<16x16x8xf32> -> vector<16x16x8xf32>
    %18 = arith.addf %12, %17 : vector<16x16x8xf32>
    %c0_31 = arith.constant 0 : index
    %c0_32 = arith.constant 0 : index
    %c1_33 = arith.constant 1 : index
    %c0_34 = arith.constant 0 : index
    %c0_35 = arith.constant 0 : index
    %19 = vector.load %arg3[%c0_31, %c0_32, %c1_33, %c0_34, %c0_35] : memref<1x1x18x18x4xbf16, #tpu.memory_space<vmem>>, vector<1x1x16x16x4xbf16>
    %20 = vector.shape_cast %19 : vector<1x1x16x16x4xbf16> to vector<16x16x4xbf16>
    %c0_36 = arith.constant 0 : index
    %c1_37 = arith.constant 1 : index
    %c0_38 = arith.constant 0 : index
    %c0_39 = arith.constant 0 : index
    %c0_40 = arith.constant 0 : index
    %21 = vector.load %arg4[%c0_36, %c1_37, %c0_38, %c0_39, %c0_40] : memref<2x2x3x4x8xbf16, #tpu.memory_space<vmem>>, vector<1x1x1x4x8xbf16>
    %22 = vector.shape_cast %21 : vector<1x1x1x4x8xbf16> to vector<4x8xbf16>
    %cst_41 = arith.constant dense<0.000000e+00> : vector<16x16x8xf32>
    %23 = tpu.matmul %20, %22, %cst_41 {dimension_numbers = #tpu.dot_dimension_numbers<[2], [0], [0, 1], [1], [0, 0, 0, 1, 1, 1], [], []>} : vector<16x16x4xbf16>, vector<4x8xbf16>, vector<16x16x8xf32> -> vector<16x16x8xf32>
    %24 = arith.addf %18, %23 : vector<16x16x8xf32>
    %c0_42 = arith.constant 0 : index
    %c0_43 = arith.constant 0 : index
    %c1_44 = arith.constant 1 : index
    %c1_45 = arith.constant 1 : index
    %c0_46 = arith.constant 0 : index
    %25 = vector.load %arg3[%c0_42, %c0_43, %c1_44, %c1_45, %c0_46] : memref<1x1x18x18x4xbf16, #tpu.memory_space<vmem>>, vector<1x1x16x16x4xbf16>
    %26 = vector.shape_cast %25 : vector<1x1x16x16x4xbf16> to vector<16x16x4xbf16>
    %c0_47 = arith.constant 0 : index
    %c1_48 = arith.constant 1 : index
    %c1_49 = arith.constant 1 : index
    %c0_50 = arith.constant 0 : index
    %c0_51 = arith.constant 0 : index
    %27 = vector.load %arg4[%c0_47, %c1_48, %c1_49, %c0_50, %c0_51] : memref<2x2x3x4x8xbf16, #tpu.memory_space<vmem>>, vector<1x1x1x4x8xbf16>
    %28 = vector.shape_cast %27 : vector<1x1x1x4x8xbf16> to vector<4x8xbf16>
    %cst_52 = arith.constant dense<0.000000e+00> : vector<16x16x8xf32>
    %29 = tpu.matmul %26, %28, %cst_52 {dimension_numbers = #tpu.dot_dimension_numbers<[2], [0], [0, 1], [1], [0, 0, 0, 1, 1, 1], [], []>} : vector<16x16x4xbf16>, vector<4x8xbf16>, vector<16x16x8xf32> -> vector<16x16x8xf32>
    %30 = arith.addf %24, %29 : vector<16x16x8xf32>
    %c0_53 = arith.constant 0 : index
    %c0_54 = arith.constant 0 : index
    %c1_55 = arith.constant 1 : index
    %c2_56 = arith.constant 2 : index
    %c0_57 = arith.constant 0 : index
    %31 = vector.load %arg3[%c0_53, %c0_54, %c1_55, %c2_56, %c0_57] : memref<1x1x18x18x4xbf16, #tpu.memory_space<vmem>>, vector<1x1x16x16x4xbf16>
    %32 = vector.shape_cast %31 : vector<1x1x16x16x4xbf16> to vector<16x16x4xbf16>
    %c0_58 = arith.constant 0 : index
    %c1_59 = arith.constant 1 : index
    %c2_60 = arith.constant 2 : index
    %c0_61 = arith.constant 0 : index
    %c0_62 = arith.constant 0 : index
    %33 = vector.load %arg4[%c0_58, %c1_59, %c2_60, %c0_61, %c0_62] : memref<2x2x3x4x8xbf16, #tpu.memory_space<vmem>>, vector<1x1x1x4x8xbf16>
    %34 = vector.shape_cast %33 : vector<1x1x1x4x8xbf16> to vector<4x8xbf16>
    %cst_63 = arith.constant dense<0.000000e+00> : vector<16x16x8xf32>
    %35 = tpu.matmul %32, %34, %cst_63 {dimension_numbers = #tpu.dot_dimension_numbers<[2], [0], [0, 1], [1], [0, 0, 0, 1, 1, 1], [], []>} : vector<16x16x4xbf16>, vector<4x8xbf16>, vector<16x16x8xf32> -> vector<16x16x8xf32>
    %36 = arith.addf %30, %35 : vector<16x16x8xf32>
    %37 = vector.shape_cast %1 : vector<8xf32> to vector<1x1x8xf32>
    %38 = vector.broadcast %37 : vector<1x1x8xf32> to vector<16x16x8xf32>
    %39 = arith.addf %36, %38 : vector<16x16x8xf32>
    %c0_64 = arith.constant 0 : index
    %c0_65 = arith.constant 0 : index
    %c0_66 = arith.constant 0 : index
    %c0_67 = arith.constant 0 : index
    %c0_68 = arith.constant 0 : index
    %c0_69 = arith.constant 0 : index
    %40 = vector.load %arg6[%c0_64, %c0_65, %c0_66, %c0_67, %c0_68, %c0_69] : memref<1x1x16x2x16x8xf32, #tpu.memory_space<vmem>>, vector<1x1x16x1x16x8xf32>
    %41 = vector.shape_cast %40 : vector<1x1x16x1x16x8xf32> to vector<16x16x8xf32>
    %42 = vector.shape_cast %39 : vector<16x16x8xf32> to vector<1x1x16x1x16x8xf32>
    tpu.vector_store %arg6[%c0_64, %c0_65, %c0_66, %c0_67, %c0_68, %c0_69], %42 {strides = array<i32>} : memref<1x1x16x2x16x8xf32, #tpu.memory_space<vmem>>, vector<1x1x16x1x16x8xf32>,
    %c0_70 = arith.constant 0 : index
    %c0_71 = arith.constant 0 : index
    %c1_72 = arith.constant 1 : index
    %c0_73 = arith.constant 0 : index
    %c0_74 = arith.constant 0 : index
    %43 = vector.load %arg3[%c0_70, %c0_71, %c1_72, %c0_73, %c0_74] : memref<1x1x18x18x4xbf16, #tpu.memory_space<vmem>>, vector<1x1x16x16x4xbf16>
    %44 = vector.shape_cast %43 : vector<1x1x16x16x4xbf16> to vector<16x16x4xbf16>
    %c1_75 = arith.constant 1 : index
    %c0_76 = arith.constant 0 : index
    %c0_77 = arith.constant 0 : index
    %c0_78 = arith.constant 0 : index
    %c0_79 = arith.constant 0 : index
    %45 = vector.load %arg4[%c1_75, %c0_76, %c0_77, %c0_78, %c0_79] : memref<2x2x3x4x8xbf16, #tpu.memory_space<vmem>>, vector<1x1x1x4x8xbf16>
    %46 = vector.shape_cast %45 : vector<1x1x1x4x8xbf16> to vector<4x8xbf16>
    %cst_80 = arith.constant dense<0.000000e+00> : vector<16x16x8xf32>
    %47 = tpu.matmul %44, %46, %cst_80 {dimension_numbers = #tpu.dot_dimension_numbers<[2], [0], [0, 1], [1], [0, 0, 0, 1, 1, 1], [], []>} : vector<16x16x4xbf16>, vector<4x8xbf16>, vector<16x16x8xf32> -> vector<16x16x8xf32>
    %c0_81 = arith.constant 0 : index
    %c0_82 = arith.constant 0 : index
    %c1_83 = arith.constant 1 : index
    %c1_84 = arith.constant 1 : index
    %c0_85 = arith.constant 0 : index
    %48 = vector.load %arg3[%c0_81, %c0_82, %c1_83, %c1_84, %c0_85] : memref<1x1x18x18x4xbf16, #tpu.memory_space<vmem>>, vector<1x1x16x16x4xbf16>
    %49 = vector.shape_cast %48 : vector<1x1x16x16x4xbf16> to vector<16x16x4xbf16>
    %c1_86 = arith.constant 1 : index
    %c0_87 = arith.constant 0 : index
    %c1_88 = arith.constant 1 : index
    %c0_89 = arith.constant 0 : index
    %c0_90 = arith.constant 0 : index
    %50 = vector.load %arg4[%c1_86, %c0_87, %c1_88, %c0_89, %c0_90] : memref<2x2x3x4x8xbf16, #tpu.memory_space<vmem>>, vector<1x1x1x4x8xbf16>
    %51 = vector.shape_cast %50 : vector<1x1x1x4x8xbf16> to vector<4x8xbf16>
    %cst_91 = arith.constant dense<0.000000e+00> : vector<16x16x8xf32>
    %52 = tpu.matmul %49, %51, %cst_91 {dimension_numbers = #tpu.dot_dimension_numbers<[2], [0], [0, 1], [1], [0, 0, 0, 1, 1, 1], [], []>} : vector<16x16x4xbf16>, vector<4x8xbf16>, vector<16x16x8xf32> -> vector<16x16x8xf32>
    %53 = arith.addf %47, %52 : vector<16x16x8xf32>
    %c0_92 = arith.constant 0 : index
    %c0_93 = arith.constant 0 : index
    %c1_94 = arith.constant 1 : index
    %c2_95 = arith.constant 2 : index
    %c0_96 = arith.constant 0 : index
    %54 = vector.load %arg3[%c0_92, %c0_93, %c1_94, %c2_95, %c0_96] : memref<1x1x18x18x4xbf16, #tpu.memory_space<vmem>>, vector<1x1x16x16x4xbf16>
    %55 = vector.shape_cast %54 : vector<1x1x16x16x4xbf16> to vector<16x16x4xbf16>
    %c1_97 = arith.constant 1 : index
    %c0_98 = arith.constant 0 : index
    %c2_99 = arith.constant 2 : index
    %c0_100 = arith.constant 0 : index
    %c0_101 = arith.constant 0 : index
    %56 = vector.load %arg4[%c1_97, %c0_98, %c2_99, %c0_100, %c0_101] : memref<2x2x3x4x8xbf16, #tpu.memory_space<vmem>>, vector<1x1x1x4x8xbf16>
    %57 = vector.shape_cast %56 : vector<1x1x1x4x8xbf16> to vector<4x8xbf16>
    %cst_102 = arith.constant dense<0.000000e+00> : vector<16x16x8xf32>
    %58 = tpu.matmul %55, %57, %cst_102 {dimension_numbers = #tpu.dot_dimension_numbers<[2], [0], [0, 1], [1], [0, 0, 0, 1, 1, 1], [], []>} : vector<16x16x4xbf16>, vector<4x8xbf16>, vector<16x16x8xf32> -> vector<16x16x8xf32>
    %59 = arith.addf %53, %58 : vector<16x16x8xf32>
    %c0_103 = arith.constant 0 : index
    %c0_104 = arith.constant 0 : index
    %c2_105 = arith.constant 2 : index
    %c0_106 = arith.constant 0 : index
    %c0_107 = arith.constant 0 : index
    %60 = vector.load %arg3[%c0_103, %c0_104, %c2_105, %c0_106, %c0_107] : memref<1x1x18x18x4xbf16, #tpu.memory_space<vmem>>, vector<1x1x16x16x4xbf16>
    %61 = vector.shape_cast %60 : vector<1x1x16x16x4xbf16> to vector<16x16x4xbf16>
    %c1_108 = arith.constant 1 : index
    %c1_109 = arith.constant 1 : index
    %c0_110 = arith.constant 0 : index
    %c0_111 = arith.constant 0 : index
    %c0_112 = arith.constant 0 : index
    %62 = vector.load %arg4[%c1_108, %c1_109, %c0_110, %c0_111, %c0_112] : memref<2x2x3x4x8xbf16, #tpu.memory_space<vmem>>, vector<1x1x1x4x8xbf16>
    %63 = vector.shape_cast %62 : vector<1x1x1x4x8xbf16> to vector<4x8xbf16>
    %cst_113 = arith.constant dense<0.000000e+00> : vector<16x16x8xf32>
    %64 = tpu.matmul %61, %63, %cst_113 {dimension_numbers = #tpu.dot_dimension_numbers<[2], [0], [0, 1], [1], [0, 0, 0, 1, 1, 1], [], []>} : vector<16x16x4xbf16>, vector<4x8xbf16>, vector<16x16x8xf32> -> vector<16x16x8xf32>
    %65 = arith.addf %59, %64 : vector<16x16x8xf32>
    %c0_114 = arith.constant 0 : index
    %c0_115 = arith.constant 0 : index
    %c2_116 = arith.constant 2 : index
    %c1_117 = arith.constant 1 : index
    %c0_118 = arith.constant 0 : index
    %66 = vector.load %arg3[%c0_114, %c0_115, %c2_116, %c1_117, %c0_118] : memref<1x1x18x18x4xbf16, #tpu.memory_space<vmem>>, vector<1x1x16x16x4xbf16>
    %67 = vector.shape_cast %66 : vector<1x1x16x16x4xbf16> to vector<16x16x4xbf16>
    %c1_119 = arith.constant 1 : index
    %c1_120 = arith.constant 1 : index
    %c1_121 = arith.constant 1 : index
    %c0_122 = arith.constant 0 : index
    %c0_123 = arith.constant 0 : index
    %68 = vector.load %arg4[%c1_119, %c1_120, %c1_121, %c0_122, %c0_123] : memref<2x2x3x4x8xbf16, #tpu.memory_space<vmem>>, vector<1x1x1x4x8xbf16>
    %69 = vector.shape_cast %68 : vector<1x1x1x4x8xbf16> to vector<4x8xbf16>
    %cst_124 = arith.constant dense<0.000000e+00> : vector<16x16x8xf32>
    %70 = tpu.matmul %67, %69, %cst_124 {dimension_numbers = #tpu.dot_dimension_numbers<[2], [0], [0, 1], [1], [0, 0, 0, 1, 1, 1], [], []>} : vector<16x16x4xbf16>, vector<4x8xbf16>, vector<16x16x8xf32> -> vector<16x16x8xf32>
    %71 = arith.addf %65, %70 : vector<16x16x8xf32>
    %c0_125 = arith.constant 0 : index
    %c0_126 = arith.constant 0 : index
    %c2_127 = arith.constant 2 : index
    %c2_128 = arith.constant 2 : index
    %c0_129 = arith.constant 0 : index
    %72 = vector.load %arg3[%c0_125, %c0_126, %c2_127, %c2_128, %c0_129] : memref<1x1x18x18x4xbf16, #tpu.memory_space<vmem>>, vector<1x1x16x16x4xbf16>
    %73 = vector.shape_cast %72 : vector<1x1x16x16x4xbf16> to vector<16x16x4xbf16>
    %c1_130 = arith.constant 1 : index
    %c1_131 = arith.constant 1 : index
    %c2_132 = arith.constant 2 : index
    %c0_133 = arith.constant 0 : index
    %c0_134 = arith.constant 0 : index
    %74 = vector.load %arg4[%c1_130, %c1_131, %c2_132, %c0_133, %c0_134] : memref<2x2x3x4x8xbf16, #tpu.memory_space<vmem>>, vector<1x1x1x4x8xbf16>
    %75 = vector.shape_cast %74 : vector<1x1x1x4x8xbf16> to vector<4x8xbf16>
    %cst_135 = arith.constant dense<0.000000e+00> : vector<16x16x8xf32>
    %76 = tpu.matmul %73, %75, %cst_135 {dimension_numbers = #tpu.dot_dimension_numbers<[2], [0], [0, 1], [1], [0, 0, 0, 1, 1, 1], [], []>} : vector<16x16x4xbf16>, vector<4x8xbf16>, vector<16x16x8xf32> -> vector<16x16x8xf32>
    %77 = arith.addf %71, %76 : vector<16x16x8xf32>
    %78 = vector.shape_cast %1 : vector<8xf32> to vector<1x1x8xf32>
    %79 = vector.broadcast %78 : vector<1x1x8xf32> to vector<16x16x8xf32>
    %80 = arith.addf %77, %79 : vector<16x16x8xf32>
    %c0_136 = arith.constant 0 : index
    %c0_137 = arith.constant 0 : index
    %c0_138 = arith.constant 0 : index
    %c1_139 = arith.constant 1 : index
    %c0_140 = arith.constant 0 : index
    %c0_141 = arith.constant 0 : index
    %81 = vector.load %arg6[%c0_136, %c0_137, %c0_138, %c1_139, %c0_140, %c0_141] : memref<1x1x16x2x16x8xf32, #tpu.memory_space<vmem>>, vector<1x1x16x1x16x8xf32>
    %82 = vector.shape_cast %81 : vector<1x1x16x1x16x8xf32> to vector<16x16x8xf32>
    %83 = vector.shape_cast %80 : vector<16x16x8xf32> to vector<1x1x16x1x16x8xf32>
    tpu.vector_store %arg6[%c0_136, %c0_137, %c0_138, %c1_139, %c0_140, %c0_141], %83 {strides = array<i32>} : memref<1x1x16x2x16x8xf32, #tpu.memory_space<vmem>>, vector<1x1x16x1x16x8xf32>,
    return
  }
  func.func @transform_0(%arg0: i32, %arg1: i32, %arg2: i32) -> (i32, i32, i32, i32, i32) {
    %c0_i32 = arith.constant 0 : i32
    %c0_i32_0 = arith.constant 0 : i32
    %c0_i32_1 = arith.constant 0 : i32
    %c0_i32_2 = arith.constant 0 : i32
    return %arg1, %arg2, %c0_i32, %c0_i32_0, %c0_i32_1 : i32, i32, i32, i32, i32
  }
  func.func @transform_1(%arg0: i32, %arg1: i32, %arg2: i32) -> (i32, i32, i32, i32, i32) {
    %c0_i32 = arith.constant 0 : i32
    %c0_i32_0 = arith.constant 0 : i32
    %c0_i32_1 = arith.constant 0 : i32
    %c0_i32_2 = arith.constant 0 : i32
    %c0_i32_3 = arith.constant 0 : i32
    return %c0_i32, %c0_i32_0, %c0_i32_1, %c0_i32_2, %arg0 : i32, i32, i32, i32, i32
  }
  func.func @transform_2(%arg0: i32, %arg1: i32, %arg2: i32) -> (i32, i32) {
    %c0_i32 = arith.constant 0 : i32
    %c0_i32_0 = arith.constant 0 : i32
    return %c0_i32, %arg0 : i32, i32
  }
  func.func @transform_3(%arg0: i32, %arg1: i32, %arg2: i32) -> (i32, i32, i32, i32, i32, i32) {
    %c0_i32 = arith.constant 0 : i32
    %c0_i32_0 = arith.constant 0 : i32
    %c0_i32_1 = arith.constant 0 : i32
    %c0_i32_2 = arith.constant 0 : i32
    return %arg1, %arg2, %c0_i32, %c0_i32_0, %c0_i32_1, %arg0 : i32, i32, i32, i32, i32, i32
  }
}

</mosaic_0001>

<bundles_post_ra>
// kernel: tpu_custom_call.1
= control target key start
LH: loop header
LB: loop body
LE: loop exit
PB: predicated region body
PF: predicated region fallthrough
CT: control target
= control target key end

     0   :  { %s8463_s12 = smov 0   ;;  %s8465_s13 = smov 0   ;;  %s10991_s0 = inlined_call_operand.vmem [shape: bf16[2,1,18,18,4], index: 0, kind: input, shape index: {}]   ;;  %s10992_s1 = inlined_call_operand.vmem [shape: bf16[2,2,3,4,8], index: 1, kind: input, shape index: {}]   ;;  %s10993_s2 = inlined_call_operand.vmem [shape: f32[1,8], index: 2, kind: input, shape index: {}]   ;;  %s10994_s3 = inlined_call_operand.vmem [shape: f32[2,1,16,2,16,8], index: 3, kind: output, shape index: {}]  }
   0x1   :  { %s8467_s14 = smov 0  }
   0x2 LB: > { %s28_s15 = sadd.s32 1, %s8437_s13  ;;  %p6531_p0 = scmp.ge.s32.totalorder %s8441_s14, 1  ;;  %s8441_s14 = sphi %s8467_s14, %s13_s14   ;;  %s8437_s13 = sphi %s8465_s13, %s11036_s13   ;;  %s8433_s12 = sphi %s8463_s12, %s11035_s12  }
   0x3   : > { %p30_p1 = scmp.ge.s32.totalorder %s28_s15, 2  ;;  %p183_p2 = scmp.lt.s32.totalorder %s8441_s14, 3 }
   0x5   : > { %s11038_s15 = smov (%p30_p1, %s28_s15), 0  ;;  %p184_p3 = pnand %p6531_p0, %p183_p2 }
   0x7   : > { %187 = sbr.rel (%p184_p3) target bundleno = 701 (0x2bd), region = 32 }
   0xe   : > { %v6535_v0 = vld [vmem:[%s10992_s1 + $0x2] sm:$0x3]  ;;  %vm790_vm0 = vcmask 1041408   ;;  %v6910_v1 = vld [vmem:[%s10992_s1 + $0xe] sm:$0x3]  ;;  %p225_p4 = scmp.lt.s32.totalorder %s8433_s12, 1 }
   0xf   : > { %8218 = vmatprep.subr.msk.bf16.mxu0 %vm790_vm0, %v6535_v0  ;;  %8224 = vmatprep.subr.msk.bf16.mxu1 %vm790_vm0, %v6910_v1  ;;  %v792_v2 = vsel %vm790_vm0, %v6535_v0, 0  ;;  %v3863_v3 = vsel %vm790_vm0, %v6910_v1, 0  ;;  %v8496_v4 = vld [vmem:[%s10992_s1] sm:$0x3]  ;;  %v8501_v5 = vld [vmem:[%s10992_s1 + $0xc] sm:$0x3] }
  0x10   : > { %7491 = vmatpush3.bf16.msra.mxu0 %v792_v2  ;;  %7695 = vmatpush3.bf16.msra.mxu1 %v3863_v3  ;;  %s11040_s12 = smov (!%p225_p4, %s8433_s12), 1  ;;  %vm306_vm1 = vsmask.f32 3328  ;;  %vm307_vm2 = vsmask.f32 7440  ;;  %vm741_vm4 = vcmask 31744  }
  0x11   : > { %8219 = vmatprep.subr.msk.bf16.mxu0 %vm790_vm0, %v8496_v4  ;;  %8225 = vmatprep.subr.msk.bf16.mxu1 %vm790_vm0, %v8501_v5  ;;  %s8230_s24 = smul.u32 216, %s11040_s12  ;;  %vm8523_vm3 = vmor %vm306_vm1, %vm307_vm2  ;;  %v1084_v60 = vsel %vm790_vm0, %v8496_v4, 0  ;;  %vm1297_vm5 = vcmask 1042432   ;;  %vm1298_vm6 = vcmask 1046532   ;;  %s7285_s21 = sshll.u32 %s11040_s12, 9  ;;  %vm3297_vm8 = vcmask 64512  }
  0x12   : > { %vm9117_vm7 = vmor %vm1297_vm5, %vm1298_vm6  ;;  %s10788_s26 = scalar_lea.vmem %s10994_s3, %s7285_s21 }
  0x13   : > { %s8511_s27 = scalar_lea.vmem %s10991_s0, %s8230_s24 }
  0x14   : > { %v255_v6 = vld [vmem:[%s8511_s27] sm:$0xf]  ;;  %v256_v7 = vld [vmem:[%s8511_s27 + $0x4] sm:$0xf]  ;;  %v288_v8 = vld [vmem:[%s8511_s27 + $0x8] sm:$0x1] }
  0x15   : > { %v310_v9 = vshrl.u32 %v255_v6, 16  ;;  %v313_v10 = vshll.u32 %v255_v6, 16  ;;  %v319_v11 = vshll.u32 %v256_v7, 16  ;;  %v323_v12 = vshrl.u32 %v256_v7, 16  ;;  %v6861_v13 = vld [vmem:[%s8511_s27 + $0xc] sm:$0xf] }
  0x16   : > { %v329_v14 = vshll.u32 %v288_v8, 16  ;;  %v6862_v15 = vld [vmem:[%s8511_s27 + $0x10] sm:$0xf]  ;;  %v6894_v16 = vld [vmem:[%s8511_s27 + $0x14] sm:$0x1]  ;;  %v3383_v22 = vshrl.u32 %v6861_v13, 16 }
  0x17   : > { %v312_v17 = vrot.slane %v310_v9, 4  ;;  %v315_v18 = vrot.slane %v313_v10, 5  ;;  %v321_v19 = vrot.slane %v319_v11, 5  ;;  %v325_v20 = vrot.slane %v323_v12, 4  ;;  %v257_v29 = vld [vmem:[%s8511_s27 + $0xc] sm:$0xf] }
  0x18   : > { %v331_v21 = vrot.slane %v329_v14, 5  ;;  %v3386_v23 = vshll.u32 %v6861_v13, 16  ;;  %v3392_v24 = vshll.u32 %v6862_v15, 16  ;;  %v3396_v27 = vshrl.u32 %v6862_v15, 16  ;;  %v258_v30 = vld [vmem:[%s8511_s27 + $0x10] sm:$0xf] }
  0x19   : > { %v316_v25 = vor.u32 %v315_v18, %v312_v17  ;;  %v326_v26 = vor.u32 %v325_v20, %v321_v19  ;;  %v3402_v28 = vshll.u32 %v6894_v16, 16  ;;  %v3385_v32 = vrot.slane %v3383_v22, 4  ;;  %v289_v40 = vld [vmem:[%s8511_s27 + $0x14] sm:$0x1]  ;;  %v6863_v52 = vld [vmem:[%s8511_s27 + $0x18] sm:$0xf] }
  0x1a   : > { %v3388_v33 = vrot.slane %v3386_v23, 5  ;;  %v3394_v34 = vrot.slane %v3392_v24, 5  ;;  %v3398_v37 = vrot.slane %v3396_v27, 4  ;;  %v334_v41 = vshrl.u32 %v257_v29, 16  ;;  %v6864_v57 = vld [vmem:[%s8511_s27 + $0x1c] sm:$0xf] }
  0x1b   : > { %v317_v35 = vrot.slane %v316_v25, 4  ;;  %v327_v36 = vrot.slane %v326_v26, 4  ;;  %v3404_v38 = vrot.slane %v3402_v28, 5  ;;  %v337_v42 = vshll.u32 %v257_v29, 16  ;;  %v6895_v61 = vld [vmem:[%s8511_s27 + $0x20] sm:$0x1] }
  0x1c   : > { %v3389_v39 = vor.u32 %v3388_v33, %v3385_v32  ;;  %v343_v43 = vshll.u32 %v258_v30, 16  ;;  %v3399_v46 = vor.u32 %v3398_v37, %v3394_v34  ;;  %v347_v47 = vshrl.u32 %v258_v30, 16  ;;  %v259_v12 = vld [vmem:[%s8511_s27 + $0x18] sm:$0xf]  ;;  %v260_v15 = vld [vmem:[%s8511_s27 + $0x1c] sm:$0xf] }
  0x1d   : > { %v322_v44 = vsel %vm8523_vm3, %v317_v35, %v321_v19  ;;  %v332_v45 = vsel %vm8523_vm3, %v327_v36, %v331_v21  ;;  %v336_v50 = vrot.slane %v334_v41, 4  ;;  %v339_v51 = vrot.slane %v337_v42, 5  ;;  %v290_v16 = vld [vmem:[%s8511_s27 + $0x20] sm:$0x1]  ;;  %v6865_v21 = vld [vmem:[%s8511_s27 + $0x24] sm:$0xf] }
  0x1e   : > { %v6536_v48 = vcombine.low %v322_v44, %v332_v45  ;;  %v3390_v49 = vrot.slane %v3389_v39, 4  ;;  %v3400_v53 = vrot.slane %v3399_v46, 4  ;;  %v345_v54 = vrot.slane %v343_v43, 5  ;;  %v6896_v39 = vld [vmem:[%s8511_s27 + $0x2c] sm:$0x1] }
  0x1f   : > { %v349_v55 = vrot.slane %v347_v47, 4  ;;  %v353_v56 = vshll.u32 %v289_v40, 16  ;;  %v340_v59 = vor.u32 %v339_v51, %v336_v50  ;;  %v3407_v1 = vshrl.u32 %v6863_v52, 16  ;;  %v261_v44 = vld [vmem:[%s8511_s27 + $0x24] sm:$0xf] }
  0x20   : > { %7492 = vmatprep.mubr.msk.bf16.mxu0 %vm741_vm4, %v6536_v48  ;;  %v3395_v58 = vsel %vm8523_vm3, %v3390_v49, %v3394_v34  ;;  %v3405_v62 = vsel %vm8523_vm3, %v3400_v53, %v3404_v38  ;;  %v3410_v6 = vshll.u32 %v6863_v52, 16  ;;  %v3416_v7 = vshll.u32 %v6864_v57, 16  ;;  %v6866_v34 = vld [vmem:[%s8511_s27 + $0x28] sm:$0xf] }
  0x21   : > { %v350_v63 = vor.u32 %v349_v55, %v345_v54  ;;  %v355_v0 = vrot.slane %v353_v56, 5  ;;  %v6911_v2 = vcombine.low %v3395_v58, %v3405_v62  ;;  %v341_v3 = vrot.slane %v340_v59, 4  ;;  %v262_v53 = vld [vmem:[%s8511_s27 + $0x28] sm:$0xf] }
  0x22   : > { %v3409_v9 = vrot.slane %v3407_v1, 4  ;;  %v3420_v10 = vshrl.u32 %v6864_v57, 16  ;;  %v3426_v11 = vshll.u32 %v6895_v61, 16  ;;  %v3412_v13 = vrot.slane %v3410_v6, 5  ;;  %v291_v61 = vld [vmem:[%s8511_s27 + $0x2c] sm:$0x1] }
  0x23   : > { %v351_v8 = vrot.slane %v350_v63, 4  ;;  %7696 = vmatprep.mubr.msk.bf16.mxu1 %vm741_vm4, %v6911_v2  ;;  %v346_v4 = vsel %vm8523_vm3, %v341_v3, %v345_v54  ;;  %v3418_v14 = vrot.slane %v3416_v7, 5  ;;  %v4155_v20 = vsel %vm790_vm0, %v8501_v5, 0  ;;  %v6867_v63 = vld [vmem:[%s8511_s27 + $0x30] sm:$0xf] }
  0x24   : > { %v3422_v18 = vrot.slane %v3420_v10, 4  ;;  %v3428_v19 = vrot.slane %v3426_v11, 5  ;;  %v3413_v23 = vor.u32 %v3412_v13, %v3409_v9  ;;  %v358_v24 = vshrl.u32 %v259_v12, 16  ;;  %v6868_v10 = vld [vmem:[%s8511_s27 + $0x34] sm:$0xf] }
  0x25   : > { %v356_v17 = vsel %vm8523_vm3, %v351_v8, %v355_v0  ;;  %v361_v25 = vshll.u32 %v259_v12, 16  ;;  %v367_v27 = vshll.u32 %v260_v15, 16  ;;  %v371_v28 = vshrl.u32 %v260_v15, 16 }
  0x26   : > { %v6537_v22 = vcombine.low %v346_v4, %v356_v17  ;;  %v3423_v26 = vor.u32 %v3422_v18, %v3418_v14  ;;  %v377_v29 = vshll.u32 %v290_v16, 16  ;;  %v3414_v30 = vrot.slane %v3413_v23, 4  ;;  %v6897_v17 = vld [vmem:[%s8511_s27 + $0x38] sm:$0x1] }
  0x27   : > { %v360_v32 = vrot.slane %v358_v24, 4  ;;  %v363_v33 = vrot.slane %v361_v25, 5  ;;  %v3431_v35 = vshrl.u32 %v6865_v21, 16  ;;  %v369_v36 = vrot.slane %v367_v27, 5 }
  0x28   : > { %7493 = vmatmul.mubr.msk.bf16.vlgmr.msra.gmra.mrb[0].mxu0 %vm741_vm4, %v6537_v22  ;;  %v3424_v5 = vrot.slane %v3423_v26, 4  ;;  %v373_v37 = vrot.slane %v371_v28, 4  ;;  %v379_v38 = vrot.slane %v377_v29, 5  ;;  %v3419_v40 = vsel %vm8523_vm3, %v3414_v30, %v3418_v14  ;;  %v264_v28 = vld [vmem:[%s8511_s27 + $0x34] sm:$0xf] }
  0x29   : > { %7525 = vmatpush3.bf16.msra.mxu0 %v1084_v60  ;;  %v364_v41 = vor.u32 %v363_v33, %v360_v32  ;;  %v3433_v42 = vrot.slane %v3431_v35, 4  ;;  %v3434_v43 = vshll.u32 %v6865_v21, 16  ;;  %v3440_v47 = vshll.u32 %v6866_v34, 16 }
  0x2a   : > { %v3429_v45 = vsel %vm8523_vm3, %v3424_v5, %v3428_v19  ;;  %v374_v46 = vor.u32 %v373_v37, %v369_v36  ;;  %v3444_v48 = vshrl.u32 %v6866_v34, 16  ;;  %v3450_v52 = vshll.u32 %v6896_v39, 16  ;;  %v263_v19 = vld [vmem:[%s8511_s27 + $0x30] sm:$0xf] }
  0x2b   : > { %v6912_v49 = vcombine.low %v3419_v40, %v3429_v45  ;;  %v365_v50 = vrot.slane %v364_v41, 4  ;;  %v3436_v51 = vrot.slane %v3434_v43, 5  ;;  %v3442_v55 = vrot.slane %v3440_v47, 5  ;;  %v6870_v47 = vld [vmem:[%s8511_s27 + $0x40] sm:$0xf] }
  0x2c   : > { %v375_v54 = vrot.slane %v374_v46, 4  ;;  %v3446_v56 = vrot.slane %v3444_v48, 4  ;;  %v382_v57 = vshrl.u32 %v261_v44, 16  ;;  %v3452_v60 = vrot.slane %v3450_v52, 5 }
  0x2d   : > { %7697 = vmatmul.mubr.msk.bf16.vlgmr.msra.gmra.mrb[0].mxu1 %vm741_vm4, %v6912_v49  ;;  %v370_v58 = vsel %vm8523_vm3, %v365_v50, %v369_v36  ;;  %v3437_v59 = vor.u32 %v3436_v51, %v3433_v42  ;;  %v385_v62 = vshll.u32 %v261_v44, 16  ;;  %v391_v3 = vshll.u32 %v262_v53, 16  ;;  %v292_v36 = vld [vmem:[%s8511_s27 + $0x38] sm:$0x1]  ;;  %v6869_v42 = vld [vmem:[%s8511_s27 + $0x3c] sm:$0xf] }
  0x2e   : > { %7729 = vmatpush3.bf16.msra.mxu1 %v4155_v20  ;;  %v380_v0 = vsel %vm8523_vm3, %v375_v54, %v379_v38  ;;  %v3447_v1 = vor.u32 %v3446_v56, %v3442_v55  ;;  %v384_v2 = vrot.slane %v382_v57, 4  ;;  %v395_v9 = vshrl.u32 %v262_v53, 16 }
  0x2f   : > { %v6538_v6 = vcombine.low %v370_v58, %v380_v0  ;;  %v3438_v7 = vrot.slane %v3437_v59, 4  ;;  %v387_v8 = vrot.slane %v385_v62, 5  ;;  %v393_v12 = vrot.slane %v391_v3, 5 }
  0x30   : > { %v3448_v11 = vrot.slane %v3447_v1, 4  ;;  %v401_v4 = vshll.u32 %v291_v61, 16  ;;  %v3455_v13 = vshrl.u32 %v6867_v63, 16  ;;  %v397_v16 = vrot.slane %v395_v9, 4  ;;  %v265_v1 = vld [vmem:[%s8511_s27 + $0x3c] sm:$0xf] }
  0x31   : > { %7496 = vmatprep.mubr.msk.bf16.mxu0 %vm741_vm4, %v6538_v6  ;;  %v3443_v14 = vsel %vm8523_vm3, %v3438_v7, %v3442_v55  ;;  %v388_v15 = vor.u32 %v387_v8, %v384_v2  ;;  %v3458_v18 = vshll.u32 %v6867_v63, 16  ;;  %v3464_v23 = vshll.u32 %v6868_v10, 16  ;;  %v6898_v55 = vld [vmem:[%s8511_s27 + $0x44] sm:$0x1]  ;;  %v266_v8 = vld [vmem:[%s8511_s27 + $0x40] sm:$0xf] }
  0x32   : > { %v3453_v20 = vsel %vm8523_vm3, %v3448_v11, %v3452_v60  ;;  %v403_v21 = vrot.slane %v401_v4, 5  ;;  %v3457_v22 = vrot.slane %v3455_v13, 4  ;;  %v398_v26 = vor.u32 %v397_v16, %v393_v12 }
  0x33   : > { %v6913_v24 = vcombine.low %v3443_v14, %v3453_v20  ;;  %v389_v25 = vrot.slane %v388_v15, 4  ;;  %v3460_v27 = vrot.slane %v3458_v18, 5  ;;  %v3466_v29 = vrot.slane %v3464_v23, 5  ;;  %v293_v14 = vld [vmem:[%s8511_s27 + $0x44] sm:$0x1] }
  0x34   : > { %v3468_v30 = vshrl.u32 %v6868_v10, 16  ;;  %v3474_v32 = vshll.u32 %v6897_v17, 16  ;;  %v406_v33 = vshrl.u32 %v263_v19, 16  ;;  %v399_v35 = vrot.slane %v398_v26, 4  ;;  %v6872_v26 = vld [vmem:[%s8511_s27 + $0x4c] sm:$0xf] }
  0x35   : > { %7700 = vmatprep.mubr.msk.bf16.mxu1 %vm741_vm4, %v6913_v24  ;;  %v394_v34 = vsel %vm8523_vm3, %v389_v25, %v393_v12  ;;  %v3461_v5 = vor.u32 %v3460_v27, %v3457_v22  ;;  %v409_v37 = vshll.u32 %v263_v19, 16  ;;  %v415_v41 = vshll.u32 %v264_v28, 16 }
  0x36   : > { %v3470_v38 = vrot.slane %v3468_v30, 4  ;;  %v3476_v39 = vrot.slane %v3474_v32, 5  ;;  %v408_v40 = vrot.slane %v406_v33, 4  ;;  %v404_v43 = vsel %vm8523_vm3, %v399_v35, %v403_v21  ;;  %v6871_v21 = vld [vmem:[%s8511_s27 + $0x48] sm:$0xf] }
  0x37   : > { %v3462_v44 = vrot.slane %v3461_v5, 4  ;;  %v411_v45 = vrot.slane %v409_v37, 5  ;;  %v419_v46 = vshrl.u32 %v264_v28, 16  ;;  %v6539_v48 = vcombine.low %v394_v34, %v404_v43  ;;  %v6899_v34 = vld [vmem:[%s8511_s27 + $0x50] sm:$0x1] }
  0x38   : > { %v3471_v49 = vor.u32 %v3470_v38, %v3466_v29  ;;  %v417_v50 = vrot.slane %v415_v41, 5  ;;  %v425_v51 = vshll.u32 %v292_v36, 16  ;;  %v3479_v56 = vshrl.u32 %v6869_v42, 16 }
  0x39   : > { %v3467_v52 = vsel %vm8523_vm3, %v3462_v44, %v3466_v29  ;;  %v412_v53 = vor.u32 %v411_v45, %v408_v40  ;;  %v421_v54 = vrot.slane %v419_v46, 4  ;;  %7497 = vmatmul.mubr.msk.bf16.gmra.mrb[4].mxu0 %vm741_vm4, %v6539_v48  ;;  %v3482_v59 = vshll.u32 %v6869_v42, 16  ;;  %v267_v40 = vld [vmem:[%s8511_s27 + $0x48] sm:$0xf]  ;;  %v268_v45 = vld [vmem:[%s8511_s27 + $0x4c] sm:$0xf] }
  0x3a   : > { %v3472_v57 = vrot.slane %v3471_v49, 4  ;;  %v427_v58 = vrot.slane %v425_v51, 5  ;;  %v3488_v60 = vshll.u32 %v6870_v47, 16  ;;  %v3481_v63 = vrot.slane %v3479_v56, 4 }
  0x3b   : > { %v413_v61 = vrot.slane %v412_v53, 4  ;;  %v422_v62 = vor.u32 %v421_v54, %v417_v50  ;;  %v3492_v0 = vshrl.u32 %v6870_v47, 16  ;;  %v3484_v3 = vrot.slane %v3482_v59, 5  ;;  %v6873_v59 = vld [vmem:[%s8511_s27 + $0x54] sm:$0xf] }
  0x3c   : > { %v3477_v2 = vsel %vm8523_vm3, %v3472_v57, %v3476_v39  ;;  %v3490_v6 = vrot.slane %v3488_v60, 5  ;;  %v3498_v7 = vshll.u32 %v6898_v55, 16  ;;  %v430_v15 = vshrl.u32 %v265_v1, 16 }
  0x3d   : > { %v6914_v9 = vcombine.low %v3467_v52, %v3477_v2  ;;  %v418_v10 = vsel %vm8523_vm3, %v413_v61, %v417_v50  ;;  %v423_v11 = vrot.slane %v422_v62, 4  ;;  %v3494_v12 = vrot.slane %v3492_v0, 4  ;;  %v294_v52 = vld [vmem:[%s8511_s27 + $0x50] sm:$0x1]  ;;  %v6874_v0 = vld [vmem:[%s8511_s27 + $0x58] sm:$0xf] }
  0x3e   : > { %v3485_v4 = vor.u32 %v3484_v3, %v3481_v63  ;;  %v3500_v13 = vrot.slane %v3498_v7, 5  ;;  %v433_v16 = vshll.u32 %v265_v1, 16  ;;  %v439_v19 = vshll.u32 %v266_v8, 16 }
  0x3f   : > { %7701 = vmatmul.mubr.msk.bf16.gmra.mrb[4].mxu1 %vm741_vm4, %v6914_v9  ;;  %v428_v17 = vsel %vm8523_vm3, %v423_v11, %v427_v58  ;;  %v3495_v18 = vor.u32 %v3494_v12, %v3490_v6  ;;  %v443_v20 = vshrl.u32 %v266_v8, 16  ;;  %v432_v24 = vrot.slane %v430_v15, 4  ;;  %v6900_v9 = vld [vmem:[%s8511_s27 + $0x5c] sm:$0x1] }
  0x40   : > { %v6540_v22 = vcombine.low %v418_v10, %v428_v17  ;;  %v3486_v23 = vrot.slane %v3485_v4, 4  ;;  %v435_v25 = vrot.slane %v433_v16, 5  ;;  %v441_v28 = vrot.slane %v439_v19, 5  ;;  %v8623_v19 = vld [vmem:[%s8511_s27 + $0x54] sm:$0xf] }
  0x41   : > { %v3496_v27 = vrot.slane %v3495_v18, 4  ;;  %v445_v29 = vrot.slane %v443_v20, 4  ;;  %v449_v30 = vshll.u32 %v293_v14, 16  ;;  %v3503_v35 = vshrl.u32 %v6871_v21, 16 }
  0x42   : > { %7500 = vmatprep.mubr.msk.bf16.mxu0 %vm741_vm4, %v6540_v22  ;;  %v3491_v32 = vsel %vm8523_vm3, %v3486_v23, %v3490_v6  ;;  %v436_v33 = vor.u32 %v435_v25, %v432_v24  ;;  %v3506_v5 = vshll.u32 %v6871_v21, 16  ;;  %v3512_v39 = vshll.u32 %v6872_v26, 16  ;;  %v8628_v24 = vld [vmem:[%s8511_s27 + $0x58] sm:$0xf] }
  0x43   : > { %v3501_v36 = vsel %vm8523_vm3, %v3496_v27, %v3500_v13  ;;  %v446_v37 = vor.u32 %v445_v29, %v441_v28  ;;  %v451_v38 = vrot.slane %v449_v30, 5  ;;  %v3505_v43 = vrot.slane %v3503_v35, 4  ;;  %v295_v29 = vld [vmem:[%s8511_s27 + $0x5c] sm:$0x1] }
  0x44   : > { %v6915_v41 = vcombine.low %v3491_v32, %v3501_v36  ;;  %v437_v42 = vrot.slane %v436_v33, 4  ;;  %v3508_v44 = vrot.slane %v3506_v5, 5  ;;  %v3514_v47 = vrot.slane %v3512_v39, 5 }
  0x45   : > { %v447_v46 = vrot.slane %v446_v37, 4  ;;  %v3516_v48 = vshrl.u32 %v6872_v26, 16  ;;  %v3522_v49 = vshll.u32 %v6899_v34, 16  ;;  %v454_v53 = vshrl.u32 %v267_v40, 16 }
  0x46   : > { %7704 = vmatprep.mubr.msk.bf16.mxu1 %vm741_vm4, %v6915_v41  ;;  %v442_v50 = vsel %vm8523_vm3, %v437_v42, %v441_v28  ;;  %v3509_v51 = vor.u32 %v3508_v44, %v3505_v43  ;;  %v457_v54 = vshll.u32 %v267_v40, 16  ;;  %v463_v58 = vshll.u32 %v268_v45, 16  ;;  %v8644_v43 = vld [vmem:[%s8511_s27 + $0x64] sm:$0xf] }
  0x47   : > { %v452_v55 = vsel %vm8523_vm3, %v447_v46, %v451_v38  ;;  %v3518_v56 = vrot.slane %v3516_v48, 4  ;;  %v3524_v57 = vrot.slane %v3522_v49, 5  ;;  %v456_v62 = vrot.slane %v454_v53, 4  ;;  %v8639_v38 = vld [vmem:[%s8511_s27 + $0x60] sm:$0xf] }
  0x48   : > { %v6541_v60 = vcombine.low %v442_v50, %v452_v55  ;;  %v3510_v61 = vrot.slane %v3509_v51, 4  ;;  %v459_v63 = vrot.slane %v457_v54, 5  ;;  %v465_v2 = vrot.slane %v463_v58, 5  ;;  %v6901_v51 = vld [vmem:[%s8511_s27 + $0x68] sm:$0x1] }
  0x49   : > { %v3519_v1 = vor.u32 %v3518_v56, %v3514_v47  ;;  %v467_v3 = vshrl.u32 %v268_v45, 16  ;;  %v473_v6 = vshll.u32 %v294_v52, 16  ;;  %v3527_v10 = vshrl.u32 %v6873_v59, 16 }
  0x4a   : > { %7501 = vmatmul.mubr.msk.bf16.gmra.mrb[8].mxu0 %vm741_vm4, %v6541_v60  ;;  %v3515_v7 = vsel %vm8523_vm3, %v3510_v61, %v3514_v47  ;;  %v460_v8 = vor.u32 %v459_v63, %v456_v62  ;;  %v3530_v11 = vshll.u32 %v6873_v59, 16  ;;  %v3536_v14 = vshll.u32 %v6874_v0, 16  ;;  %v8660_v62 = vld [vmem:[%s8511_s27 + $0x64] sm:$0xf] }
  0x4b   : > { %v3520_v12 = vrot.slane %v3519_v1, 4  ;;  %v469_v4 = vrot.slane %v467_v3, 4  ;;  %v475_v13 = vrot.slane %v473_v6, 5  ;;  %v3529_v16 = vrot.slane %v3527_v10, 4  ;;  %v296_v3 = vld [vmem:[%s8511_s27 + $0x68] sm:$0x1] }
  0x4c   : > { %v461_v15 = vrot.slane %v460_v8, 4  ;;  %v3532_v17 = vrot.slane %v3530_v11, 5  ;;  %v3540_v18 = vshrl.u32 %v6874_v0, 16  ;;  %v3538_v22 = vrot.slane %v3536_v14, 5  ;;  %v8664_v6 = vld [vmem:[%s8511_s27 + $0x6c] sm:$0xf] }
  0x4d   : > { %v3525_v20 = vsel %vm8523_vm3, %v3520_v12, %v3524_v57  ;;  %v470_v21 = vor.u32 %v469_v4, %v465_v2  ;;  %v3546_v23 = vshll.u32 %v6900_v9, 16  ;;  %v478_v33 = vshrl.u32 %v8623_v19, 16  ;;  %v8657_v57 = vld [vmem:[%s8511_s27 + $0x60] sm:$0xf]  ;;  %v8672_v11 = vld [vmem:[%s8511_s27 + $0x70] sm:$0xf] }
  0x4e   : > { %v6916_v25 = vcombine.low %v3515_v7, %v3525_v20  ;;  %v466_v26 = vsel %vm8523_vm3, %v461_v15, %v465_v2  ;;  %v3533_v27 = vor.u32 %v3532_v17, %v3529_v16  ;;  %v3542_v28 = vrot.slane %v3540_v18, 4  ;;  %v8678_v15 = vld [vmem:[%s10992_s1 + $0x4] sm:$0x3]  ;;  %v8683_v16 = vld [vmem:[%s10992_s1 + $0x10] sm:$0x3] }
  0x4f   : > { %v471_v30 = vrot.slane %v470_v21, 4  ;;  %v3548_v32 = vrot.slane %v3546_v23, 5  ;;  %v481_v34 = vshll.u32 %v8623_v19, 16  ;;  %v487_v36 = vshll.u32 %v8628_v24, 16  ;;  %8220 = vmatprep.subr.msk.bf16.mxu0 %vm790_vm0, %v8678_v15  ;;  %8226 = vmatprep.subr.msk.bf16.mxu1 %vm790_vm0, %v8683_v16 }
  0x50   : > { %7705 = vmatmul.mubr.msk.bf16.gmra.mrb[8].mxu1 %vm741_vm4, %v6916_v25  ;;  %v3534_v35 = vrot.slane %v3533_v27, 4  ;;  %v3543_v5 = vor.u32 %v3542_v28, %v3538_v22  ;;  %v491_v37 = vshrl.u32 %v8628_v24, 16  ;;  %v480_v40 = vrot.slane %v478_v33, 4  ;;  %v6902_v27 = vld [vmem:[%s8511_s27 + $0x74] sm:$0x1] }
  0x51   : > { %v476_v39 = vsel %vm8523_vm3, %v471_v30, %v475_v13  ;;  %v483_v41 = vrot.slane %v481_v34, 5  ;;  %v497_v42 = vshll.u32 %v295_v29, 16  ;;  %v489_v47 = vrot.slane %v487_v36, 5  ;;  %v8694_v28 = vld [vmem:[%s8511_s27 + $0x6c] sm:$0xf] }
  0x52   : > { %v6542_v44 = vcombine.low %v466_v26, %v476_v39  ;;  %v3539_v45 = vsel %vm8523_vm3, %v3534_v35, %v3538_v22  ;;  %v3544_v46 = vrot.slane %v3543_v5, 4  ;;  %v493_v49 = vrot.slane %v491_v37, 4  ;;  %v8698_v34 = vld [vmem:[%s8511_s27 + $0x70] sm:$0xf] }
  0x53   : > { %v484_v48 = vor.u32 %v483_v41, %v480_v40  ;;  %v499_v50 = vrot.slane %v497_v42, 5  ;;  %v3551_v52 = vshrl.u32 %v8639_v38, 16  ;;  %v3554_v54 = vshll.u32 %v8639_v38, 16 }
  0x54   : > { %7504 = vmatprep.mubr.msk.bf16.mxu0 %vm741_vm4, %v6542_v44  ;;  %v3549_v53 = vsel %vm8523_vm3, %v3544_v46, %v3548_v32  ;;  %v3560_v55 = vshll.u32 %v8644_v43, 16  ;;  %v3564_v56 = vshrl.u32 %v8644_v43, 16  ;;  %v494_v60 = vor.u32 %v493_v49, %v489_v47  ;;  %v8710_v49 = vld [vmem:[%s8511_s27 + $0x78] sm:$0xf] }
  0x55   : > { %v6917_v58 = vcombine.low %v3539_v45, %v3549_v53  ;;  %v485_v59 = vrot.slane %v484_v48, 4  ;;  %v3553_v61 = vrot.slane %v3551_v52, 4  ;;  %v3556_v63 = vrot.slane %v3554_v54, 5  ;;  %v297_v48 = vld [vmem:[%s8511_s27 + $0x74] sm:$0x1] }
  0x56   : > { %v3562_v0 = vrot.slane %v3560_v55, 5  ;;  %v3566_v1 = vrot.slane %v3564_v56, 4  ;;  %v3570_v2 = vshll.u32 %v6901_v51, 16  ;;  %v495_v8 = vrot.slane %v494_v60, 4 }
  0x57   : > { %7708 = vmatprep.mubr.msk.bf16.mxu1 %vm741_vm4, %v6917_v58  ;;  %v490_v7 = vsel %vm8523_vm3, %v485_v59, %v489_v47  ;;  %v502_v9 = vshrl.u32 %v8657_v57, 16  ;;  %v505_v10 = vshll.u32 %v8657_v57, 16  ;;  %v3557_v12 = vor.u32 %v3556_v63, %v3553_v61  ;;  %v8719_v59 = vld [vmem:[%s8511_s27 + $0x7c] sm:$0xf] }
  0x58   : > { %v3567_v4 = vor.u32 %v3566_v1, %v3562_v0  ;;  %v3572_v13 = vrot.slane %v3570_v2, 5  ;;  %v511_v14 = vshll.u32 %v8660_v62, 16  ;;  %v500_v17 = vsel %vm8523_vm3, %v495_v8, %v499_v50 }
  0x59   : > { %v504_v18 = vrot.slane %v502_v9, 4  ;;  %v507_v20 = vrot.slane %v505_v10, 5  ;;  %v515_v21 = vshrl.u32 %v8660_v62, 16  ;;  %v6543_v22 = vcombine.low %v490_v7, %v500_v17  ;;  %v6903_v17 = vld [vmem:[%s8511_s27 + $0x80] sm:$0x1] }
  0x5a   : > { %v3558_v23 = vrot.slane %v3557_v12, 4  ;;  %v3568_v25 = vrot.slane %v3567_v4, 4  ;;  %v513_v26 = vrot.slane %v511_v14, 5  ;;  %v521_v32 = vshll.u32 %v296_v3, 16 }
  0x5b   : > { %v508_v29 = vor.u32 %v507_v20, %v504_v18  ;;  %v517_v30 = vrot.slane %v515_v21, 4  ;;  %v3575_v33 = vshrl.u32 %v8664_v6, 16  ;;  %7505 = vmatmul.mubr.msk.bf16.gmra.mrb[12].mxu0 %vm741_vm4, %v6543_v22  ;;  %v3578_v36 = vshll.u32 %v8664_v6, 16  ;;  %v8731_v20 = vld [vmem:[%s8511_s27 + $0x78] sm:$0xf] }
  0x5c   : > { %v3563_v35 = vsel %vm8523_vm3, %v3558_v23, %v3562_v0  ;;  %v3573_v5 = vsel %vm8523_vm3, %v3568_v25, %v3572_v13  ;;  %v3584_v37 = vshll.u32 %v8672_v11, 16  ;;  %v523_v42 = vrot.slane %v521_v32, 5 }
  0x5d   : > { %v6918_v39 = vcombine.low %v3563_v35, %v3573_v5  ;;  %v509_v40 = vrot.slane %v508_v29, 4  ;;  %v518_v41 = vor.u32 %v517_v30, %v513_v26  ;;  %v3577_v44 = vrot.slane %v3575_v33, 4  ;;  %v298_v33 = vld [vmem:[%s8511_s27 + $0x80] sm:$0x1] }
  0x5e   : > { %v3580_v45 = vrot.slane %v3578_v36, 5  ;;  %v3586_v46 = vrot.slane %v3584_v37, 5  ;;  %v3588_v47 = vshrl.u32 %v8672_v11, 16  ;;  %v3594_v52 = vshll.u32 %v6902_v27, 16 }
  0x5f   : > { %7709 = vmatmul.mubr.msk.bf16.gmra.mrb[12].mxu1 %vm741_vm4, %v6918_v39  ;;  %v514_v50 = vsel %vm8523_vm3, %v509_v40, %v513_v26  ;;  %v519_v51 = vrot.slane %v518_v41, 4  ;;  %v526_v53 = vshrl.u32 %v8694_v28, 16  ;;  %v529_v56 = vshll.u32 %v8694_v28, 16  ;;  %v8735_v26 = vld [vmem:[%s8511_s27 + $0x7c] sm:$0xf] }
  0x60   : > { %v3581_v54 = vor.u32 %v3580_v45, %v3577_v44  ;;  %v3590_v55 = vrot.slane %v3588_v47, 4  ;;  %v535_v58 = vshll.u32 %v8698_v34, 16  ;;  %v3596_v61 = vrot.slane %v3594_v52, 5  ;;  %v8742_v39 = vld [vmem:[%s8511_s27 + $0x84] sm:$0xf] }
  0x61   : > { %v524_v60 = vsel %vm8523_vm3, %v519_v51, %v523_v42  ;;  %v528_v63 = vrot.slane %v526_v53, 4  ;;  %v539_v0 = vshrl.u32 %v8698_v34, 16  ;;  %v531_v7 = vrot.slane %v529_v56, 5  ;;  %v8748_v45 = vld [vmem:[%s8511_s27 + $0x88] sm:$0xf] }
  0x62   : > { %v6544_v1 = vcombine.low %v514_v50, %v524_v60  ;;  %v3582_v2 = vrot.slane %v3581_v54, 4  ;;  %v3591_v3 = vor.u32 %v3590_v55, %v3586_v46  ;;  %v537_v8 = vrot.slane %v535_v58, 5 }
  0x63   : > { %v541_v9 = vrot.slane %v539_v0, 4  ;;  %v545_v10 = vshll.u32 %v297_v48, 16  ;;  %v3599_v12 = vshrl.u32 %v8710_v49, 16  ;;  %v532_v14 = vor.u32 %v531_v7, %v528_v63  ;;  %v6904_v0 = vld [vmem:[%s8511_s27 + $0x8c] sm:$0x1] }
  0x64   : > { %7508 = vmatprep.mubr.msk.bf16.mxu0 %vm741_vm4, %v6544_v1  ;;  %v3587_v4 = vsel %vm8523_vm3, %v3582_v2, %v3586_v46  ;;  %v3592_v13 = vrot.slane %v3591_v3, 4  ;;  %v3602_v18 = vshll.u32 %v8710_v49, 16  ;;  %v3608_v25 = vshll.u32 %v8719_v59, 16 }
  0x65   : > { %v542_v21 = vor.u32 %v541_v9, %v537_v8  ;;  %v547_v22 = vrot.slane %v545_v10, 5  ;;  %v3601_v23 = vrot.slane %v3599_v12, 4  ;;  %v533_v29 = vrot.slane %v532_v14, 4  ;;  %v8764_v10 = vld [vmem:[%s8511_s27 + $0x84] sm:$0xf] }
  0x66   : > { %v3597_v27 = vsel %vm8523_vm3, %v3592_v13, %v3596_v61  ;;  %v3604_v30 = vrot.slane %v3602_v18, 5  ;;  %v3612_v32 = vshrl.u32 %v8719_v59, 16  ;;  %v3610_v36 = vrot.slane %v3608_v25, 5  ;;  %v299_v25 = vld [vmem:[%s8511_s27 + $0x8c] sm:$0x1] }
  0x67   : > { %v6919_v35 = vcombine.low %v3587_v4, %v3597_v27  ;;  %v543_v5 = vrot.slane %v542_v21, 4  ;;  %v3618_v37 = vshll.u32 %v6903_v17, 16  ;;  %v538_v40 = vsel %vm8523_vm3, %v533_v29, %v537_v8  ;;  %v8770_v17 = vld [vmem:[%s8511_s27 + $0x88] sm:$0xf] }
  0x68   : > { %v3605_v41 = vor.u32 %v3604_v30, %v3601_v23  ;;  %v3614_v42 = vrot.slane %v3612_v32, 4  ;;  %v550_v44 = vshrl.u32 %v8731_v20, 16  ;;  %v553_v48 = vshll.u32 %v8731_v20, 16 }
  0x69   : > { %7712 = vmatprep.mubr.msk.bf16.mxu1 %vm741_vm4, %v6919_v35  ;;  %v548_v46 = vsel %vm8523_vm3, %v543_v5, %v547_v22  ;;  %v3620_v47 = vrot.slane %v3618_v37, 5  ;;  %v559_v50 = vshll.u32 %v8735_v26, 16  ;;  %v563_v58 = vshrl.u32 %v8735_v26, 16 }
  0x6a   : > { %v6545_v51 = vcombine.low %v538_v40, %v548_v46  ;;  %v3606_v52 = vrot.slane %v3605_v41, 4  ;;  %v3615_v53 = vor.u32 %v3614_v42, %v3610_v36  ;;  %v552_v54 = vrot.slane %v550_v44, 4 }
  0x6b   : > { %v555_v55 = vrot.slane %v553_v48, 5  ;;  %v561_v56 = vrot.slane %v559_v50, 5  ;;  %v569_v60 = vshll.u32 %v298_v33, 16  ;;  %v3623_v1 = vshrl.u32 %v8742_v39, 16  ;;  %v8775_v33 = vld [vmem:[%s8511_s27 + $0x90] sm:$0xf] }
  0x6c   : > { %7509 = vmatmul.mubr.msk.bf16.gmra.mrb[16].mxu0 %vm741_vm4, %v6545_v51  ;;  %v3611_v61 = vsel %vm8523_vm3, %v3606_v52, %v3610_v36  ;;  %v3616_v63 = vrot.slane %v3615_v53, 4  ;;  %v3626_v2 = vshll.u32 %v8742_v39, 16  ;;  %v565_v7 = vrot.slane %v563_v58, 4  ;;  %v8786_v51 = vld [vmem:[%s8511_s27 + $0x94] sm:$0xf] }
  0x6d   : > { %v556_v3 = vor.u32 %v555_v55, %v552_v54  ;;  %v571_v8 = vrot.slane %v569_v60, 5  ;;  %v3632_v9 = vshll.u32 %v8748_v45, 16  ;;  %v3625_v4 = vrot.slane %v3623_v1, 4  ;;  %v8792_v58 = vld [vmem:[%s8511_s27 + $0x90] sm:$0xf] }
  0x6e   : > { %v3621_v12 = vsel %vm8523_vm3, %v3616_v63, %v3620_v47  ;;  %v3628_v13 = vrot.slane %v3626_v2, 5  ;;  %v3636_v14 = vshrl.u32 %v8748_v45, 16  ;;  %v566_v22 = vor.u32 %v565_v7, %v561_v56  ;;  %v8797_v1 = vld [vmem:[%s8511_s27 + $0x94] sm:$0xf] }
  0x6f   : > { %v6920_v18 = vcombine.low %v3611_v61, %v3621_v12  ;;  %v557_v21 = vrot.slane %v556_v3, 4  ;;  %v3634_v23 = vrot.slane %v3632_v9, 5  ;;  %v3642_v30 = vshll.u32 %v6904_v0, 16 }
  0x70   : > { %v3629_v27 = vor.u32 %v3628_v13, %v3625_v4  ;;  %v3638_v29 = vrot.slane %v3636_v14, 4  ;;  %v574_v32 = vshrl.u32 %v8764_v10, 16  ;;  %v567_v5 = vrot.slane %v566_v22, 4 }
  0x71   : > { %7713 = vmatmul.mubr.msk.bf16.gmra.mrb[16].mxu1 %vm741_vm4, %v6920_v18  ;;  %v562_v35 = vsel %vm8523_vm3, %v557_v21, %v561_v56  ;;  %v577_v36 = vshll.u32 %v8764_v10, 16  ;;  %v583_v37 = vshll.u32 %v8770_v17, 16  ;;  %v3644_v42 = vrot.slane %v3642_v30, 5  ;;  %v6905_v56 = vld [vmem:[%s8511_s27 + $0x98] sm:$0x1] }
  0x72   : > { %v3630_v40 = vrot.slane %v3629_v27, 4  ;;  %v3639_v41 = vor.u32 %v3638_v29, %v3634_v23  ;;  %v576_v44 = vrot.slane %v574_v32, 4  ;;  %v572_v46 = vsel %vm8523_vm3, %v567_v5, %v571_v8 }
  0x73   : > { %v579_v47 = vrot.slane %v577_v36, 5  ;;  %v585_v48 = vrot.slane %v583_v37, 5  ;;  %v587_v50 = vshrl.u32 %v8770_v17, 16  ;;  %v6546_v52 = vcombine.low %v562_v35, %v572_v46  ;;  %v8820_v46 = vld [vmem:[%s8511_s27 + $0xa0] sm:$0xf] }
  0x74   : > { %v3635_v53 = vsel %vm8523_vm3, %v3630_v40, %v3634_v23  ;;  %v3640_v54 = vrot.slane %v3639_v41, 4  ;;  %v593_v55 = vshll.u32 %v299_v25, 16  ;;  %v3647_v63 = vshrl.u32 %v8775_v33, 16  ;;  %v8805_v23 = vld [vmem:[%s8511_s27 + $0x98] sm:$0x1] }
  0x75   : > { %v580_v60 = vor.u32 %v579_v47, %v576_v44  ;;  %v589_v61 = vrot.slane %v587_v50, 4  ;;  %v3650_v0 = vshll.u32 %v8775_v33, 16  ;;  %7512 = vmatprep.mubr.msk.bf16.mxu0 %vm741_vm4, %v6546_v52  ;;  %v3656_v7 = vshll.u32 %v8786_v51, 16  ;;  %v8808_v25 = vld [vmem:[%s8511_s27 + $0x9c] sm:$0xf] }
  0x76   : > { %v3645_v2 = vsel %vm8523_vm3, %v3640_v54, %v3644_v42  ;;  %v595_v3 = vrot.slane %v593_v55, 5  ;;  %v3660_v8 = vshrl.u32 %v8786_v51, 16  ;;  %v3649_v13 = vrot.slane %v3647_v63, 4 }
  0x77   : > { %v6921_v9 = vcombine.low %v3635_v53, %v3645_v2  ;;  %v581_v12 = vrot.slane %v580_v60, 4  ;;  %v590_v4 = vor.u32 %v589_v61, %v585_v48  ;;  %v3652_v14 = vrot.slane %v3650_v0, 5  ;;  %v8823_v53 = vld [vmem:[%s8511_s27 + $0xa4] sm:$0x1]  ;;  %v8828_v61 = vld [vmem:[%s8511_s27 + $0x9c] sm:$0xf] }
  0x78   : > { %v3658_v18 = vrot.slane %v3656_v7, 5  ;;  %v3662_v21 = vrot.slane %v3660_v8, 4  ;;  %v3666_v22 = vshll.u32 %v6905_v56, 16  ;;  %v598_v30 = vshrl.u32 %v8792_v58, 16  ;;  %v8838_v7 = vld [vmem:[%s8511_s27 + $0xa0] sm:$0xf] }
  0x79   : > { %7716 = vmatprep.mubr.msk.bf16.mxu1 %vm741_vm4, %v6921_v9  ;;  %v586_v27 = vsel %vm8523_vm3, %v581_v12, %v585_v48  ;;  %v591_v29 = vrot.slane %v590_v4, 4  ;;  %v601_v32 = vshll.u32 %v8792_v58, 16  ;;  %v3653_v35 = vor.u32 %v3652_v14, %v3649_v13 }
  0x7a   : > { %v3663_v5 = vor.u32 %v3662_v21, %v3658_v18  ;;  %v3668_v36 = vrot.slane %v3666_v22, 5  ;;  %v607_v37 = vshll.u32 %v8797_v1, 16  ;;  %v600_v41 = vrot.slane %v598_v30, 4 }
  0x7b   : > { %v596_v40 = vsel %vm8523_vm3, %v591_v29, %v595_v3  ;;  %v603_v42 = vrot.slane %v601_v32, 5  ;;  %v611_v44 = vshrl.u32 %v8797_v1, 16  ;;  %v3654_v48 = vrot.slane %v3653_v35, 4 }
  0x7c   : > { %v6547_v47 = vcombine.low %v586_v27, %v596_v40  ;;  %v3664_v50 = vrot.slane %v3663_v5, 4  ;;  %v609_v52 = vrot.slane %v607_v37, 5  ;;  %v617_v56 = vshll.u32 %v8805_v23, 16  ;;  %v8842_v27 = vld [vmem:[%s8511_s27 + $0xa4] sm:$0x1] }
  0x7d   : > { %v604_v54 = vor.u32 %v603_v42, %v600_v41  ;;  %v613_v55 = vrot.slane %v611_v44, 4  ;;  %v3671_v60 = vshrl.u32 %v8808_v25, 16  ;;  %v3659_v63 = vsel %vm8523_vm3, %v3654_v48, %v3658_v18  ;;  %11005 = vst [vmem:[#allocation2_spill] sm:$0xff] %v8842_v27  ;;  %v8845_v18 = vld [vmem:[%s8511_s27 + $0xa8] sm:$0xf] }
  0x7e   : > { %7513 = vmatmul.mubr.msk.bf16.gmra.mrb[20].mxu0 %vm741_vm4, %v6547_v47  ;;  %v3669_v0 = vsel %vm8523_vm3, %v3664_v50, %v3668_v36  ;;  %v3674_v2 = vshll.u32 %v8808_v25, 16  ;;  %v3680_v3 = vshll.u32 %v8820_v46, 16  ;;  %v619_v4 = vrot.slane %v617_v56, 5  ;;  %v8861_v56 = vld [vmem:[%s8511_s27 + $0xb0] sm:$0x1] }
  0x7f   : > { %v6922_v8 = vcombine.low %v3659_v63, %v3669_v0  ;;  %v605_v9 = vrot.slane %v604_v54, 4  ;;  %v614_v12 = vor.u32 %v613_v55, %v609_v52  ;;  %v3673_v13 = vrot.slane %v3671_v60, 4  ;;  %v8858_v55 = vld [vmem:[%s8511_s27 + $0xac] sm:$0xf]  ;;  %11006 = vst [vmem:[#allocation3_spill] sm:$0xff] %v8861_v56 }
  0x80   : > { %v3676_v14 = vrot.slane %v3674_v2, 5  ;;  %v3682_v21 = vrot.slane %v3680_v3, 5  ;;  %v3684_v22 = vshrl.u32 %v8820_v46, 16  ;;  %v3690_v32 = vshll.u32 %v8823_v53, 16  ;;  %v8866_v3 = vld [vmem:[%s8511_s27 + $0xa8] sm:$0xf] }
  0x81   : > { %7717 = vmatmul.mubr.msk.bf16.gmra.mrb[20].mxu1 %vm741_vm4, %v6922_v8  ;;  %v610_v29 = vsel %vm8523_vm3, %v605_v9, %v609_v52  ;;  %v615_v30 = vrot.slane %v614_v12, 4  ;;  %v622_v35 = vshrl.u32 %v8828_v61, 16  ;;  %v625_v37 = vshll.u32 %v8828_v61, 16 }
  0x82   : > { %v3677_v5 = vor.u32 %v3676_v14, %v3673_v13  ;;  %v3686_v36 = vrot.slane %v3684_v22, 4  ;;  %v631_v40 = vshll.u32 %v8838_v7, 16  ;;  %v3692_v42 = vrot.slane %v3690_v32, 5  ;;  %v8873_v13 = vld [vmem:[%s8511_s27 + $0xac] sm:$0xf] }
  0x83   : > { %v620_v41 = vsel %vm8523_vm3, %v615_v30, %v619_v4  ;;  %v624_v44 = vrot.slane %v622_v35, 4  ;;  %v635_v47 = vshrl.u32 %v8838_v7, 16  ;;  %v627_v54 = vrot.slane %v625_v37, 5 }
  0x84   : > { %v6548_v48 = vcombine.low %v610_v29, %v620_v41  ;;  %v3678_v50 = vrot.slane %v3677_v5, 4  ;;  %v3687_v52 = vor.u32 %v3686_v36, %v3682_v21  ;;  %v633_v60 = vrot.slane %v631_v40, 5 }
  0x85   : > { %v637_v63 = vrot.slane %v635_v47, 4  ;;  %v641_v0 = vshll.u32 %v8842_v27, 16  ;;  %v3695_v2 = vshrl.u32 %v8845_v18, 16  ;;  %v628_v12 = vor.u32 %v627_v54, %v624_v44 }
  0x86   : > { %7516 = vmatprep.mubr.msk.bf16.mxu0 %vm741_vm4, %v6548_v48  ;;  %v3683_v8 = vsel %vm8523_vm3, %v3678_v50, %v3682_v21  ;;  %v3688_v9 = vrot.slane %v3687_v52, 4  ;;  %v3698_v4 = vshll.u32 %v8845_v18, 16  ;;  %v3704_v30 = vshll.u32 %v8858_v55, 16  ;;  %v8880_v21 = vld [vmem:[%s8511_s27 + $0xb0] sm:$0x1] }
  0x87   : > { %v638_v14 = vor.u32 %v637_v63, %v633_v60  ;;  %v643_v22 = vrot.slane %v641_v0, 5  ;;  %v3697_v29 = vrot.slane %v3695_v2, 4  ;;  %v629_v35 = vrot.slane %v628_v12, 4  ;;  %11007 = vst [vmem:[#allocation4_spill] sm:$0xff] %v8880_v21  ;;  %v8892_v2 = vld [vmem:[%s8511_s27 + $0xb4] sm:$0xf] }
  0x88   : > { %v3693_v32 = vsel %vm8523_vm3, %v3688_v9, %v3692_v42  ;;  %v3700_v5 = vrot.slane %v3698_v4, 5  ;;  %v3708_v36 = vshrl.u32 %v8858_v55, 16  ;;  %v3706_v41 = vrot.slane %v3704_v30, 5  ;;  %v8895_v4 = vld [vmem:[%s8511_s27 + $0xb8] sm:$0xf] }
  0x89   : > { %v6923_v37 = vcombine.low %v3683_v8, %v3693_v32  ;;  %v639_v40 = vrot.slane %v638_v14, 4  ;;  %v3714_v44 = vshll.u32 %v8861_v56, 16  ;;  %v634_v47 = vsel %vm8523_vm3, %v629_v35, %v633_v60  ;;  %v8900_v32 = vld [vmem:[%s8511_s27 + $0xbc] sm:$0x1]  ;;  %v8903_v35 = vld [vmem:[%s8511_s27 + $0xb4] sm:$0xf] }
  0x8a   : > { %v3701_v48 = vor.u32 %v3700_v5, %v3697_v29  ;;  %v3710_v50 = vrot.slane %v3708_v36, 4  ;;  %v646_v42 = vshrl.u32 %v8866_v3, 16  ;;  %v649_v63 = vshll.u32 %v8866_v3, 16  ;;  %11008 = vst [vmem:[#allocation5_spill] sm:$0xff] %v8900_v32 }
  0x8b   : > { %7720 = vmatprep.mubr.msk.bf16.mxu1 %vm741_vm4, %v6923_v37  ;;  %v644_v52 = vsel %vm8523_vm3, %v639_v40, %v643_v22  ;;  %v3716_v54 = vrot.slane %v3714_v44, 5  ;;  %v655_v0 = vshll.u32 %v8873_v13, 16  ;;  %v659_v30 = vshrl.u32 %v8873_v13, 16  ;;  %v8911_v44 = vld [vmem:[%s8511_s27 + $0xb8] sm:$0xf] }
  0x8c   : > { %v6549_v8 = vcombine.low %v634_v47, %v644_v52  ;;  %v3702_v60 = vrot.slane %v3701_v48, 4  ;;  %v3711_v9 = vor.u32 %v3710_v50, %v3706_v41  ;;  %v648_v12 = vrot.slane %v646_v42, 4 }
  0x8d   : > { %v651_v14 = vrot.slane %v649_v63, 5  ;;  %v657_v29 = vrot.slane %v655_v0, 5  ;;  %v665_v22 = vshll.u32 %v8880_v21, 16  ;;  %v3719_v37 = vshrl.u32 %v8892_v2, 16 }
  0x8e   : > { %7517 = vmatmul.mubr.msk.bf16.gmra.mrb[24].mxu0 %vm741_vm4, %v6549_v8  ;;  %v3707_v5 = vsel %vm8523_vm3, %v3702_v60, %v3706_v41  ;;  %v3712_v36 = vrot.slane %v3711_v9, 4  ;;  %v3722_v40 = vshll.u32 %v8892_v2, 16  ;;  %v661_v48 = vrot.slane %v659_v30, 4 }
  0x8f   : > { %v652_v47 = vor.u32 %v651_v14, %v648_v12  ;;  %v667_v50 = vrot.slane %v665_v22, 5  ;;  %v3728_v42 = vshll.u32 %v8895_v4, 16  ;;  %v3721_v63 = vrot.slane %v3719_v37, 4  ;;  %v8923_v22 = vld [vmem:[%s8511_s27 + $0xbc] sm:$0x1] }
  0x90   : > { %v3717_v52 = vsel %vm8523_vm3, %v3712_v36, %v3716_v54  ;;  %v3724_v0 = vrot.slane %v3722_v40, 5  ;;  %v3732_v41 = vshrl.u32 %v8895_v4, 16  ;;  %v662_v9 = vor.u32 %v661_v48, %v657_v29  ;;  %11009 = vst [vmem:[#allocation6_spill] sm:$0xff] %v8923_v22 }
  0x91   : > { %v6924_v8 = vcombine.low %v3707_v5, %v3717_v52  ;;  %v653_v60 = vrot.slane %v652_v47, 4  ;;  %v3730_v21 = vrot.slane %v3728_v42, 5  ;;  %v3738_v12 = vshll.u32 %v8900_v32, 16  ;;  %v8928_v42 = vld [vmem:[%s8511_s27 + $0xc0] sm:$0xf] }
  0x92   : > { %v3725_v56 = vor.u32 %v3724_v0, %v3721_v63  ;;  %v3734_v27 = vrot.slane %v3732_v41, 4  ;;  %v670_v14 = vshrl.u32 %v8903_v35, 16  ;;  %v663_v30 = vrot.slane %v662_v9, 4  ;;  %v8934_v41 = vld [vmem:[%s8511_s27 + $0xc4] sm:$0xf] }
  0x93   : > { %7721 = vmatmul.mubr.msk.bf16.gmra.mrb[24].mxu1 %vm741_vm4, %v6924_v8  ;;  %v658_v54 = vsel %vm8523_vm3, %v653_v60, %v657_v29  ;;  %v673_v5 = vshll.u32 %v8903_v35, 16  ;;  %v679_v36 = vshll.u32 %v8911_v44, 16  ;;  %v3740_v47 = vrot.slane %v3738_v12, 5 }
  0x94   : > { %v3726_v37 = vrot.slane %v3725_v56, 4  ;;  %v3735_v40 = vor.u32 %v3734_v27, %v3730_v21  ;;  %v672_v48 = vrot.slane %v670_v14, 4  ;;  %v668_v52 = vsel %vm8523_vm3, %v663_v30, %v667_v50  ;;  %v8940_v56 = vld [vmem:[%s8511_s27 + $0xc8] sm:$0x1] }
  0x95   : > { %v675_v63 = vrot.slane %v673_v5, 5  ;;  %v681_v0 = vrot.slane %v679_v36, 5  ;;  %v683_v29 = vshrl.u32 %v8911_v44, 16  ;;  %v6550_v8 = vcombine.low %v658_v54, %v668_v52 }
  0x96   : > { %v3731_v60 = vsel %vm8523_vm3, %v3726_v37, %v3730_v21  ;;  %v3736_v9 = vrot.slane %v3735_v40, 4  ;;  %v689_v27 = vshll.u32 %v8923_v22, 16  ;;  %v3743_v32 = vshrl.u32 %v8928_v42, 16 }
  0x97   : > { %v676_v12 = vor.u32 %v675_v63, %v672_v48  ;;  %v685_v14 = vrot.slane %v683_v29, 4  ;;  %v3746_v50 = vshll.u32 %v8928_v42, 16  ;;  %7520 = vmatprep.mubr.msk.bf16.mxu0 %vm741_vm4, %v6550_v8  ;;  %v3752_v5 = vshll.u32 %v8934_v41, 16 }
  0x98   : > { %v3741_v30 = vsel %vm8523_vm3, %v3736_v9, %v3740_v47  ;;  %v691_v54 = vrot.slane %v689_v27, 5  ;;  %v3756_v21 = vshrl.u32 %v8934_v41, 16  ;;  %v3745_v48 = vrot.slane %v3743_v32, 4  ;;  %v8319_v32 = vld [vmem:[%s8511_s27] sm:$0xf] }
  0x99   : > { %v6925_v36 = vcombine.low %v3731_v60, %v3741_v30  ;;  %v677_v37 = vrot.slane %v676_v12, 4  ;;  %v686_v40 = vor.u32 %v685_v14, %v681_v0  ;;  %v3748_v52 = vrot.slane %v3746_v50, 5  ;;  %v8957_v14 = vld [vmem:[%s8511_s27 + $0x4] sm:$0xf] }
  0x9a   : > { %v3754_v63 = vrot.slane %v3752_v5, 5  ;;  %v3758_v29 = vrot.slane %v3756_v21, 4  ;;  %v3762_v22 = vshll.u32 %v8940_v56, 16  ;;  %v6568_v50 = vcombine.low %v8319_v32, %v8957_v14  ;;  %v8321_v21 = vld [vmem:[%s8511_s27 + $0xc] sm:$0xf] }
  0x9b   : > { %7724 = vmatprep.mubr.msk.bf16.mxu1 %vm741_vm4, %v6925_v36  ;;  %v682_v47 = vsel %vm8523_vm3, %v677_v37, %v681_v0  ;;  %v687_v8 = vrot.slane %v686_v40, 4  ;;  %v3749_v9 = vor.u32 %v3748_v52, %v3745_v48  ;;  %v8967_v36 = vld [vmem:[%s8511_s27 + $0x10] sm:$0xf]  ;;  %v8323_v48 = vld [vmem:[%s8511_s27 + $0xc] sm:$0xf] }
  0x9c   : > { %v3759_v27 = vor.u32 %v3758_v29, %v3754_v63  ;;  %v3764_v60 = vrot.slane %v3762_v22, 5  ;;  %v6943_v37 = vcombine.low %v8321_v21, %v8967_v36  ;;  %v8975_v52 = vld [vmem:[%s8511_s27 + $0x10] sm:$0xf]  ;;  %v8325_v29 = vld [vmem:[%s8511_s27 + $0x18] sm:$0xf] }
  0x9d   : > { %v692_v12 = vsel %vm8523_vm3, %v687_v8, %v691_v54  ;;  %v3750_v5 = vrot.slane %v3749_v9, 4  ;;  %v1509_v9 = vsel %vm790_vm0, %v8678_v15, 0  ;;  %v8993_v32 = vld [vmem:[%s10992_s1 + $0x6] sm:$0x3]  ;;  %v8333_v21 = vld [vmem:[%s8511_s27 + $0x30] sm:$0xf] }
  0x9e   : > { %v6551_v30 = vcombine.low %v682_v47, %v692_v12  ;;  %v3760_v0 = vrot.slane %v3759_v27, 4  ;;  %v8980_v47 = vld [vmem:[%s8511_s27 + $0x1c] sm:$0xf]  ;;  %v8327_v27 = vld [vmem:[%s8511_s27 + $0x18] sm:$0xf] }
  0x9f   : > { %v3755_v22 = vsel %vm8523_vm3, %v3750_v5, %v3754_v63  ;;  %v6569_v63 = vcombine.low %v8323_v48, %v8975_v52  ;;  %v6570_v8 = vcombine.low %v8325_v29, %v8980_v47  ;;  %v4577_v5 = vsel %vm790_vm0, %v8683_v16, 0  ;;  %v8335_v48 = vld [vmem:[%s8511_s27 + $0x30] sm:$0xf] }
  0xa0   : > { %7521 = vmatmul.mubr.msk.bf16.gmra.mrb[28].mxu0 %vm741_vm4, %v6551_v30  ;;  %v3765_v54 = vsel %vm8523_vm3, %v3760_v0, %v3764_v60  ;;  %v8987_v60 = vld [vmem:[%s8511_s27 + $0x1c] sm:$0xf]  ;;  %v8998_v30 = vld [vmem:[%s8511_s27 + $0x28] sm:$0xf]  ;;  %v9009_v0 = vld [vmem:[%s10992_s1 + $0x12] sm:$0x3] }
  0xa1   : > { %v6926_v40 = vcombine.low %v3755_v22, %v3765_v54  ;;  %7526 = vmatprep.mubr.msk.bf16.mxu0 %vm741_vm4, %v6568_v50  ;;  %v6944_v12 = vcombine.low %v8327_v27, %v8987_v60  ;;  %v8329_v50 = vld [vmem:[%s8511_s27 + $0x24] sm:$0xf]  ;;  %v9015_v54 = vld [vmem:[%s8511_s27 + $0x28] sm:$0xf] }
  0xa2   : > { %v6945_v15 = vcombine.low %v8329_v50, %v8998_v30  ;;  %v8331_v22 = vld [vmem:[%s8511_s27 + $0x24] sm:$0xf]  ;;  %v9041_v50 = vld [vmem:[%s8511_s27 + $0x40] sm:$0xf] }
  0xa3   : > { %7725 = vmatmul.mubr.msk.bf16.gmra.mrb[28].mxu1 %vm741_vm4, %v6926_v40  ;;  %v6571_v16 = vcombine.low %v8331_v22, %v9015_v54  ;;  %v9046_v22 = vld [vmem:[%s8511_s27 + $0x4c] sm:$0xf] }
  0xa4   : > { %7730 = vmatprep.mubr.msk.bf16.mxu1 %vm741_vm4, %v6943_v37  ;;  %v9020_v37 = vld [vmem:[%s8511_s27 + $0x34] sm:$0xf] }
  0xa5   : > { %v6572_v40 = vcombine.low %v8333_v21, %v9020_v37  ;;  %v8343_v21 = vld [vmem:[%s8511_s27 + $0x48] sm:$0xf] }
  0xa8   : > { %7527 = vmatmul.mubr.msk.bf16.vlgmr.msra.gmra.mrb[0].mxu0 %vm741_vm4, %v6569_v63  ;;  %v9027_v63 = vld [vmem:[%s8511_s27 + $0x34] sm:$0xf] }
  0xa9   : > { %7559 = vmatpush3.bf16.msra.mxu0 %v1509_v9  ;;  %7530 = vmatprep.mubr.msk.bf16.mxu0 %vm741_vm4, %v6570_v8  ;;  %v6946_v29 = vcombine.low %v8335_v48, %v9027_v63  ;;  %v8337_v8 = vld [vmem:[%s8511_s27 + $0x3c] sm:$0xf]  ;;  %v9033_v9 = vld [vmem:[%s8511_s27 + $0x40] sm:$0xf]  ;;  %v9051_v48 = vld [vmem:[%s8511_s27 + $0x4c] sm:$0xf] }
  0xaa   : > { %8221 = vmatprep.subr.msk.bf16.mxu0 %vm790_vm0, %v8993_v32  ;;  %v6947_v27 = vcombine.low %v8337_v8, %v9033_v9  ;;  %v6948_v8 = vcombine.low %v8343_v21, %v9051_v48  ;;  %v6951_v21 = vcombine.low %v8664_v6, %v8672_v11  ;;  %v1309_v6 = vrot.slane %v8975_v52, 5 }
  0xab   : > { %7731 = vmatmul.mubr.msk.bf16.vlgmr.msra.gmra.mrb[0].mxu1 %vm741_vm4, %v6944_v12  ;;  %v8339_v12 = vld [vmem:[%s8511_s27 + $0x3c] sm:$0xf]  ;;  %v6954_v11 = vcombine.low %v8775_v33, %v8786_v51  ;;  %v4377_v33 = vrot.slane %v8987_v60, 5  ;;  %v11010_v60 = vmov 0 }
  0xac   : > { %7763 = vmatpush3.bf16.msra.mxu1 %v4577_v5  ;;  %7734 = vmatprep.mubr.msk.bf16.mxu1 %vm741_vm4, %v6945_v15  ;;  %v6573_v15 = vcombine.low %v8339_v12, %v9041_v50  ;;  %v8341_v5 = vld [vmem:[%s8511_s27 + $0x48] sm:$0xf]  ;;  %v6575_v12 = vcombine.low %v8623_v19, %v8628_v24  ;;  %v6577_v19 = vcombine.low %v8694_v28, %v8698_v34  ;;  %v1247_v34 = vld [vmem:[%s8511_s27] sm:$0xe]  ;;  %v11011_v60 = vsel %vm9117_vm7, 4294967295, %v11010_v60 }
  0xad   : > { %8227 = vmatprep.subr.msk.bf16.mxu1 %vm790_vm0, %v9009_v0  ;;  %v6578_v24 = vcombine.low %v8731_v20, %v8735_v26  ;;  %v6955_v28 = vcombine.low %v8808_v25, %v8820_v46  ;;  %v6975_v20 = vld [vmem:[%s8511_s27 + $0xc] sm:$0xe]  ;;  %v4370_v26 = vrot.slane %v8967_v36, 5  ;;  %v8349_v25 = vld [vmem:[%s8511_s27 + $0x14] sm:$0x1]  ;;  %v6956_v36 = vcombine.low %v8845_v18, %v8858_v55  ;;  %11012 = vst [vmem:[#allocation7_spill] sm:$0xff] %v11011_v60 }
  0xae   : > { %v1312_v52 = vrot.slane %v8349_v25, 5  ;;  %v6583_v18 = vcombine.low %v8903_v35, %v8911_v44  ;;  %v1316_v35 = vrot.slane %v8980_v47, 5 }
  0xb0   : > { %7531 = vmatmul.mubr.msk.bf16.gmra.mrb[4].mxu0 %vm741_vm4, %v6571_v16  ;;  %v6574_v16 = vcombine.low %v8341_v5, %v9046_v22  ;;  %v6576_v5 = vcombine.low %v8657_v57, %v8660_v62  ;;  %v6579_v57 = vcombine.low %v8764_v10, %v8770_v17  ;;  %v6580_v62 = vcombine.low %v8792_v58, %v8797_v1  ;;  %v8348_v10 = vld [vmem:[%s8511_s27 + $0x14] sm:$0x1]  ;;  %v6976_v58 = vld [vmem:[%s8511_s27 + $0x18] sm:$0xe] }
  0xb1   : > { %7534 = vmatprep.mubr.msk.bf16.mxu0 %vm741_vm4, %v6572_v40  ;;  %v8345_v40 = vld [vmem:[%s8511_s27 + $0x54] sm:$0xf]  ;;  %v4373_v17 = vrot.slane %v8348_v10, 5  ;;  %v1330_v10 = vrot.slane %v9020_v37, 5 }
  0xb3   : > { %7735 = vmatmul.mubr.msk.bf16.gmra.mrb[4].mxu1 %vm741_vm4, %v6946_v29  ;;  %v9057_v29 = vld [vmem:[%s8511_s27 + $0x58] sm:$0xf] }
  0xb4   : > { %7738 = vmatprep.mubr.msk.bf16.mxu1 %vm741_vm4, %v6947_v27  ;;  %v6949_v27 = vcombine.low %v8345_v40, %v9057_v29 }
  0xb8   : > { %7535 = vmatmul.mubr.msk.bf16.gmra.mrb[8].mxu0 %vm741_vm4, %v6573_v15  ;;  %v6950_v15 = vcombine.low %v8639_v38, %v8644_v43  ;;  %v6952_v38 = vcombine.low %v8710_v49, %v8719_v59  ;;  %v6953_v43 = vcombine.low %v8742_v39, %v8748_v45  ;;  %v1248_v49 = vld [vmem:[%s8511_s27 + $0xc] sm:$0xe]  ;;  %v1302_v59 = vrot.slane %v8957_v14, 5  ;;  %v8347_v39 = vld [vmem:[%s8511_s27 + $0x8] sm:$0x1] }
  0xb9   : > { %7538 = vmatprep.mubr.msk.bf16.mxu0 %vm741_vm4, %v6574_v16  ;;  %v1305_v45 = vrot.slane %v8347_v39, 5  ;;  %v8350_v16 = vld [vmem:[%s8511_s27 + $0x20] sm:$0x1]  ;;  %v6602_v40 = vrot.slane %v1248_v49, 9  ;;  %v6581_v14 = vcombine.low %v8828_v61, %v8838_v7  ;;  %v6957_v61 = vcombine.low %v8892_v2, %v8895_v4  ;;  %v1249_v2 = vld [vmem:[%s8511_s27 + $0x18] sm:$0xe] }
  0xba   : > { %v6603_v39 = vrot.slane %v1249_v2, 9  ;;  %v8355_v2 = vld [vmem:[%s8511_s27 + $0x38] sm:$0x1] }
  0xbb   : > { %7739 = vmatmul.mubr.msk.bf16.gmra.mrb[8].mxu1 %vm741_vm4, %v6948_v8  ;;  %v4380_v8 = vrot.slane %v8350_v16, 5  ;;  %v1251_v16 = vld [vmem:[%s8511_s27 + $0x30] sm:$0xe] }
  0xbc   : > { %7742 = vmatprep.mubr.msk.bf16.mxu1 %vm741_vm4, %v6949_v27  ;;  %v1311_v27 = vrot.slane %v1309_v6, 4 }
  0xc0   : > { %7539 = vmatmul.mubr.msk.bf16.gmra.mrb[12].mxu0 %vm741_vm4, %v6575_v12  ;;  %v6601_v12 = vrot.slane %v1247_v34, 9  ;;  %v4384_v34 = vrot.slane %v8998_v30, 5 }
  0xc1   : > { %7542 = vmatprep.mubr.msk.bf16.mxu0 %vm741_vm4, %v6576_v5  ;;  %v6992_v5 = vrot.slane %v6975_v20, 9  ;;  %v1250_v20 = vld [vmem:[%s8511_s27 + $0x24] sm:$0xe] }
  0xc3   : > { %7743 = vmatmul.mubr.msk.bf16.gmra.mrb[12].mxu1 %vm741_vm4, %v6950_v15  ;;  %v6582_v15 = vcombine.low %v8866_v3, %v8873_v13  ;;  %v9135_v3 = vsel %vm9117_vm7, %v1311_v27, %v1312_v52 }
  0xc4   : > { %7746 = vmatprep.mubr.msk.bf16.mxu1 %vm741_vm4, %v6951_v21  ;;  %v1304_v21 = vrot.slane %v1302_v59, 4 }
  0xc6   : > { %v1306_v47 = vsel %vm9117_vm7, %v1304_v21, %v1305_v45  ;;  %v6978_v45 = vld [vmem:[%s8511_s27 + $0x30] sm:$0xe] }
  0xc7   : > { %v6995_v37 = vrot.slane %v6978_v45, 9 }
  0xc8   : > { %7543 = vmatmul.mubr.msk.bf16.gmra.mrb[16].mxu0 %vm741_vm4, %v6577_v19  ;;  %v4372_v19 = vrot.slane %v4370_v26, 4 }
  0xc9   : > { %7546 = vmatprep.mubr.msk.bf16.mxu0 %vm741_vm4, %v6578_v24  ;;  %v6993_v24 = vrot.slane %v6976_v58, 9 }
  0xca   : > { %v4374_v49 = vsel %vm9117_vm7, %v4372_v19, %v4373_v17  ;;  %v1318_v17 = vrot.slane %v1316_v35, 4  ;;  %v9181_v19 = vsel %vm790_vm0, %v9009_v0, 0 }
  0xcb   : > { %7747 = vmatmul.mubr.msk.bf16.gmra.mrb[16].mxu1 %vm741_vm4, %v6952_v38  ;;  %v6958_v38 = vcombine.low %v8928_v42, %v8934_v41 }
  0xcc   : > { %7750 = vmatprep.mubr.msk.bf16.mxu1 %vm741_vm4, %v6953_v43  ;;  %v4379_v43 = vrot.slane %v4377_v33, 4 }
  0xd0   : > { %7547 = vmatmul.mubr.msk.bf16.gmra.mrb[20].mxu0 %vm741_vm4, %v6579_v57  ;;  %v9131_v57 = vsel %vm9117_vm7, %v6602_v40, %v1309_v6  ;;  %v9148_v6 = vsel %vm9117_vm7, %v6992_v5, %v4370_v26  ;;  %v4391_v26 = vrot.slane %v9027_v63, 5  ;;  %v8352_v63 = vld [vmem:[%s8511_s27 + $0x2c] sm:$0x1]  ;;  %v6604_v40 = vrot.slane %v1250_v20, 9 }
  0xd1   : > { %7550 = vmatprep.mubr.msk.bf16.mxu0 %vm741_vm4, %v6580_v62  ;;  %v9139_v62 = vsel %vm790_vm0, %v8993_v32, 0  ;;  %v1323_v32 = vrot.slane %v9015_v54, 5  ;;  %v6618_v30 = vcombine.low %v9131_v57, %v9135_v3  ;;  %v9168_v54 = vsel %vm9117_vm7, %v4379_v43, %v4380_v8  ;;  %v6982_v3 = vld [vmem:[%s8511_s27 + $0x60] sm:$0xe] }
  0xd2   : > { %v4387_v52 = vrot.slane %v8352_v63, 5  ;;  %v4386_v8 = vrot.slane %v4384_v34, 4  ;;  %v1332_v43 = vrot.slane %v1330_v10, 4  ;;  %v6980_v63 = vld [vmem:[%s8511_s27 + $0x48] sm:$0xe] }
  0xd3   : > { %7751 = vmatmul.mubr.msk.bf16.gmra.mrb[20].mxu1 %vm741_vm4, %v6954_v11  ;;  %v1303_v11 = vsel %vm9117_vm7, %v6601_v12, %v1302_v59  ;;  %v9160_v59 = vsel %vm9117_vm7, %v6993_v24, %v4377_v33  ;;  %v8351_v33 = vld [vmem:[%s8511_s27 + $0x20] sm:$0x1]  ;;  %v1325_v27 = vrot.slane %v1323_v32, 4  ;;  %v6605_v24 = vrot.slane %v1251_v16, 9 }
  0xd4   : > { %7754 = vmatprep.mubr.msk.bf16.mxu1 %vm741_vm4, %v6955_v28  ;;  %v6977_v28 = vld [vmem:[%s8511_s27 + $0x24] sm:$0xe]  ;;  %v1319_v58 = vrot.slane %v8351_v33, 5  ;;  %v6617_v5 = vcombine.low %v1303_v11, %v1306_v47  ;;  %v7009_v20 = vcombine.low %v9160_v59, %v9168_v54  ;;  %v1317_v11 = vsel %vm9117_vm7, %v6603_v39, %v1316_v35  ;;  %v1252_v39 = vld [vmem:[%s8511_s27 + $0x3c] sm:$0xe] }
  0xd5   : > { %v6994_v25 = vrot.slane %v6977_v28, 9  ;;  %v7008_v28 = vcombine.low %v9148_v6, %v4374_v49  ;;  %v9198_v45 = vsel %vm9117_vm7, %v4386_v8, %v4387_v52  ;;  %v9202_v6 = vsel %vm9117_vm7, %v6604_v40, %v1323_v32  ;;  %v6979_v49 = vld [vmem:[%s8511_s27 + $0x3c] sm:$0xe]  ;;  %v1253_v52 = vld [vmem:[%s8511_s27 + $0x48] sm:$0xe] }
  0xd6   : > { %v1320_v47 = vsel %vm9117_vm7, %v1318_v17, %v1319_v58  ;;  %v4398_v32 = vrot.slane %v9033_v9, 5  ;;  %v1337_v17 = vrot.slane %v9041_v50, 5  ;;  %v9223_v58 = vsel %vm9117_vm7, %v6605_v24, %v1330_v10 }
  0xd7   : > { %v9194_v0 = vsel %vm9117_vm7, %v6994_v25, %v4384_v34  ;;  %v6619_v33 = vcombine.low %v1317_v11, %v1320_v47  ;;  %v6996_v10 = vrot.slane %v6979_v49, 9  ;;  %v1344_v16 = vrot.slane %v9046_v22, 5  ;;  %v8360_v47 = vld [vmem:[%s8511_s27 + $0x58] sm:$0xf] }
  0xd8   : > { %7551 = vmatmul.mubr.msk.bf16.gmra.mrb[24].mxu0 %vm741_vm4, %v6581_v14  ;;  %v8353_v14 = vld [vmem:[%s8511_s27 + $0x2c] sm:$0x1]  ;;  %v7010_v9 = vcombine.low %v9194_v0, %v9198_v45  ;;  %v6606_v8 = vrot.slane %v1252_v39, 9  ;;  %v4412_v40 = vrot.slane %v9057_v29, 5  ;;  %v1351_v0 = vrot.slane %v8360_v47, 5 }
  0xd9   : > { %7554 = vmatprep.mubr.msk.bf16.mxu0 %vm741_vm4, %v6582_v15  ;;  %v1326_v12 = vrot.slane %v8353_v14, 5  ;;  %v4393_v15 = vrot.slane %v4391_v26, 4  ;;  %v4400_v14 = vrot.slane %v4398_v32, 4  ;;  %v1346_v29 = vrot.slane %v1344_v16, 4  ;;  %v9261_v45 = vld [vmem:[%s10992_s1 + $0x8] sm:$0x3] }
  0xda   : > { %v9269_v49 = vsel %vm9117_vm7, %v6606_v8, %v1337_v17  ;;  %v4414_v39 = vrot.slane %v4412_v40, 4 }
  0xdb   : > { %7755 = vmatmul.mubr.msk.bf16.gmra.mrb[24].mxu1 %vm741_vm4, %v6956_v36  ;;  %v8354_v36 = vld [vmem:[%s8511_s27 + $0x38] sm:$0x1]  ;;  %v9206_v35 = vsel %vm9117_vm7, %v1325_v27, %v1326_v12  ;;  %v1339_v12 = vrot.slane %v1337_v17, 4 }
  0xdc   : > { %7758 = vmatprep.mubr.msk.bf16.mxu1 %vm741_vm4, %v6957_v61  ;;  %v4394_v21 = vrot.slane %v8354_v36, 5  ;;  %v1333_v61 = vrot.slane %v8355_v2, 5  ;;  %v6620_v50 = vcombine.low %v9202_v6, %v9206_v35  ;;  %v1254_v2 = vld [vmem:[%s8511_s27 + $0x54] sm:$0xe] }
  0xde   : > { %v9216_v34 = vsel %vm9117_vm7, %v4393_v15, %v4394_v21  ;;  %v9227_v25 = vsel %vm9117_vm7, %v1332_v43, %v1333_v61  ;;  %v6997_v15 = vrot.slane %v6980_v63, 9  ;;  %v8358_v21 = vld [vmem:[%s8511_s27 + $0x50] sm:$0x1]  ;;  %v6607_v43 = vrot.slane %v1253_v52, 9 }
  0xdf   : > { %v6621_v27 = vcombine.low %v9223_v58, %v9227_v25  ;;  %v4408_v24 = vrot.slane %v8358_v21, 5  ;;  %v9254_v61 = vsel %vm9117_vm7, %v6996_v10, %v4398_v32  ;;  %v8361_v10 = vld [vmem:[%s8511_s27 + $0x5c] sm:$0x1]  ;;  %v8366_v21 = vld [vmem:[%s8511_s27 + $0x68] sm:$0x1] }
  0xe0   : > { %7555 = vmatmul.mubr.msk.bf16.gmra.mrb[28].mxu0 %vm741_vm4, %v6583_v18  ;;  %v9212_v18 = vsel %vm9117_vm7, %v6995_v37, %v4391_v26  ;;  %v4405_v26 = vrot.slane %v9051_v48, 5  ;;  %v8356_v48 = vld [vmem:[%s8511_s27 + $0x44] sm:$0x1]  ;;  %v6981_v37 = vld [vmem:[%s8511_s27 + $0x54] sm:$0xe]  ;;  %v4415_v63 = vrot.slane %v8361_v10, 5 }
  0xe1   : > { %7560 = vmatprep.mubr.msk.bf16.mxu0 %vm741_vm4, %v6617_v5  ;;  %v7011_v42 = vcombine.low %v9212_v18, %v9216_v34  ;;  %v8357_v5 = vld [vmem:[%s8511_s27 + $0x44] sm:$0x1]  ;;  %v6998_v32 = vrot.slane %v6981_v37, 9  ;;  %v8370_v25 = vld [vmem:[%s8511_s27 + $0x74] sm:$0x1] }
  0xe2   : > { %v1340_v22 = vrot.slane %v8357_v5, 5  ;;  %v4407_v36 = vrot.slane %v4405_v26, 4  ;;  %v1353_v5 = vrot.slane %v1351_v0, 4  ;;  %v9323_v54 = vsel %vm9117_vm7, %v4414_v39, %v4415_v63  ;;  %v8368_v39 = vld [vmem:[%s8511_s27 + $0x70] sm:$0xf] }
  0xe3   : > { %7759 = vmatmul.mubr.msk.bf16.gmra.mrb[28].mxu1 %vm741_vm4, %v6958_v38  ;;  %v4401_v38 = vrot.slane %v8356_v48, 5  ;;  %v8363_v48 = vld [vmem:[%s8511_s27 + $0x64] sm:$0xf]  ;;  %v9319_v59 = vsel %vm9117_vm7, %v6998_v32, %v4412_v40  ;;  %v1256_v32 = vld [vmem:[%s8511_s27 + $0x6c] sm:$0xe]  ;;  %v1365_v10 = vrot.slane %v8368_v39, 5 }
  0xe4   : > { %7764 = vmatprep.mubr.msk.bf16.mxu1 %vm741_vm4, %v7008_v28  ;;  %v8359_v28 = vld [vmem:[%s8511_s27 + $0x50] sm:$0x1]  ;;  %v9280_v57 = vsel %vm9117_vm7, %v1339_v12, %v1340_v22  ;;  %v1358_v8 = vrot.slane %v8363_v48, 5  ;;  %v1255_v12 = vld [vmem:[%s8511_s27 + $0x60] sm:$0xe] }
  0xe5   : > { %v1347_v11 = vrot.slane %v8359_v28, 5  ;;  %v9276_v52 = vsel %vm9117_vm7, %v4400_v14, %v4401_v38  ;;  %v9295_v38 = vsel %vm9117_vm7, %v6607_v43, %v1344_v16  ;;  %v6608_v14 = vrot.slane %v1254_v2, 9  ;;  %v8364_v22 = vld [vmem:[%s8511_s27 + $0x5c] sm:$0x1]  ;;  %v6983_v43 = vld [vmem:[%s8511_s27 + $0x6c] sm:$0xe] }
  0xe6   : > { %v1354_v37 = vrot.slane %v8364_v22, 5  ;;  %v8367_v28 = vld [vmem:[%s8511_s27 + $0x68] sm:$0x1]  ;;  %v7012_v40 = vcombine.low %v9254_v61, %v9276_v52  ;;  %v8369_v48 = vld [vmem:[%s8511_s27 + $0x74] sm:$0x1]  ;;  %v7014_v52 = vcombine.low %v9319_v59, %v9323_v54  ;;  %v1367_v58 = vrot.slane %v1365_v10, 4 }
  0xe7   : > { %v9311_v16 = vsel %vm9117_vm7, %v1346_v29, %v1347_v11  ;;  %v6609_v29 = vrot.slane %v1255_v12, 9  ;;  %v6622_v11 = vcombine.low %v9269_v49, %v9280_v57  ;;  %v9336_v47 = vsel %vm9117_vm7, %v6608_v14, %v1351_v0  ;;  %v6984_v14 = vld [vmem:[%s8511_s27 + $0x78] sm:$0xe]  ;;  %v8371_v12 = vld [vmem:[%s8511_s27 + $0x7c] sm:$0xf] }
  0xe8   : > { %7561 = vmatmul.mubr.msk.bf16.vlgmr.msra.gmra.mrb[0].mxu0 %vm741_vm4, %v6618_v30  ;;  %v8362_v30 = vld [vmem:[%s8511_s27 + $0x64] sm:$0xf]  ;;  %v9342_v63 = vsel %vm9117_vm7, %v1353_v5, %v1354_v37  ;;  %v4429_v61 = vrot.slane %v8369_v48, 5  ;;  %v6623_v49 = vcombine.low %v9295_v38, %v9311_v16  ;;  %v4433_v16 = vrot.slane %v8371_v12, 5  ;;  %v1257_v5 = vld [vmem:[%s8511_s27 + $0x78] sm:$0xe] }
  0xe9   : > { %7593 = vmatpush3.bf16.msra.mxu0 %v9139_v62  ;;  %7564 = vmatprep.mubr.msk.bf16.mxu0 %vm741_vm4, %v6619_v33  ;;  %v4419_v17 = vrot.slane %v8362_v30, 5  ;;  %v9287_v62 = vsel %vm9117_vm7, %v6997_v15, %v4405_v26  ;;  %v9291_v33 = vsel %vm9117_vm7, %v4407_v36, %v4408_v24  ;;  %v9303_v26 = vld [vmem:[%s10992_s1 + $0x14] sm:$0x3]  ;;  %v8365_v15 = vld [vmem:[%s8511_s27 + $0x70] sm:$0xf]  ;;  %v4422_v24 = vrot.slane %v8366_v21, 5 }
  0xea   : > { %8222 = vmatprep.subr.msk.bf16.mxu0 %vm790_vm0, %v9261_v45  ;;  %v4426_v36 = vrot.slane %v8365_v15, 5  ;;  %v7013_v0 = vcombine.low %v9287_v62, %v9291_v33  ;;  %v9370_v35 = vsel %vm9117_vm7, %v6609_v29, %v1358_v8  ;;  %v6624_v38 = vcombine.low %v9336_v47, %v9342_v63  ;;  %v8372_v15 = vld [vmem:[%s8511_s27 + $0x7c] sm:$0xf]  ;;  %v8373_v21 = vld [vmem:[%s8511_s27 + $0x88] sm:$0xf] }
  0xeb   : > { %7765 = vmatmul.mubr.msk.bf16.vlgmr.msra.gmra.mrb[0].mxu1 %vm741_vm4, %v7009_v20  ;;  %v6999_v20 = vrot.slane %v6982_v3, 9  ;;  %v4421_v2 = vrot.slane %v4419_v17, 4  ;;  %v7000_v3 = vrot.slane %v6983_v43, 9  ;;  %v7001_v37 = vrot.slane %v6984_v14, 9  ;;  %v8374_v43 = vld [vmem:[%s8511_s27 + $0x88] sm:$0xf] }
  0xec   : > { %7797 = vmatpush3.bf16.msra.mxu1 %v9181_v19  ;;  %7768 = vmatprep.mubr.msk.bf16.mxu1 %vm741_vm4, %v7010_v9  ;;  %v1360_v19 = vrot.slane %v1358_v8, 4  ;;  %v1361_v9 = vrot.slane %v8367_v28, 5  ;;  %v4428_v30 = vrot.slane %v4426_v36, 4  ;;  %v4447_v48 = vrot.slane %v8786_v51, 5 }
  0xed   : > { %8228 = vmatprep.subr.msk.bf16.mxu1 %vm790_vm0, %v9303_v26  ;;  %v9357_v57 = vsel %vm9117_vm7, %v6999_v20, %v4419_v17  ;;  %v9366_v6 = vsel %vm9117_vm7, %v4421_v2, %v4422_v24  ;;  %v6610_v17 = vrot.slane %v1256_v32, 9  ;;  %v9387_v8 = vsel %vm9117_vm7, %v7000_v3, %v4426_v36  ;;  %v1258_v24 = vld [vmem:[%s8511_s27 + $0x84] sm:$0xe] }
  0xee   : > { %v9391_v22 = vsel %vm9117_vm7, %v4428_v30, %v4429_v61  ;;  %v1372_v20 = vrot.slane %v8372_v15, 5  ;;  %v7015_v18 = vcombine.low %v9357_v57, %v9366_v6  ;;  %v4440_v36 = vrot.slane %v8373_v21, 5  ;;  %v8378_v15 = vld [vmem:[%s8511_s27 + $0x8c] sm:$0x1]  ;;  %v1262_v6 = vld [vmem:[%s8511_s27 + $0xb4] sm:$0xe] }
  0xef   : > { %v1379_v2 = vrot.slane %v8374_v43, 5  ;;  %v9405_v29 = vsel %vm9117_vm7, %v6610_v17, %v1365_v10  ;;  %v7016_v39 = vcombine.low %v9387_v8, %v9391_v22  ;;  %v4435_v30 = vrot.slane %v4433_v16, 4 }
  0xf0   : > { %7565 = vmatmul.mubr.msk.bf16.gmra.mrb[4].mxu0 %vm741_vm4, %v6620_v50  ;;  %v9374_v50 = vsel %vm9117_vm7, %v1360_v19, %v1361_v9  ;;  %v8375_v19 = vld [vmem:[%s8511_s27 + $0x80] sm:$0x1]  ;;  %v6611_v9 = vrot.slane %v1257_v5, 9  ;;  %v9418_v10 = vsel %vm9117_vm7, %v7001_v37, %v4433_v16  ;;  %v1374_v61 = vrot.slane %v1372_v20, 4  ;;  %v8377_v5 = vld [vmem:[%s8511_s27 + $0x8c] sm:$0x1] }
  0xf1   : > { %7568 = vmatprep.mubr.msk.bf16.mxu0 %vm741_vm4, %v6621_v27  ;;  %v1368_v27 = vrot.slane %v8370_v25, 5  ;;  %v6625_v34 = vcombine.low %v9370_v35, %v9374_v50  ;;  %v4436_v28 = vrot.slane %v8375_v19, 5  ;;  %v6612_v17 = vrot.slane %v1258_v24, 9  ;;  %v6986_v25 = vld [vmem:[%s8511_s27 + $0x90] sm:$0xe] }
  0xf2   : > { %v4442_v12 = vrot.slane %v4440_v36, 4  ;;  %v1382_v21 = vrot.slane %v8378_v15, 5  ;;  %v9429_v16 = vsel %vm9117_vm7, %v6611_v9, %v1372_v20  ;;  %v1259_v37 = vld [vmem:[%s8511_s27 + $0x90] sm:$0xe]  ;;  %v7003_v43 = vrot.slane %v6986_v25, 9 }
  0xf3   : > { %7769 = vmatmul.mubr.msk.bf16.gmra.mrb[4].mxu1 %vm741_vm4, %v7011_v42  ;;  %v6985_v42 = vld [vmem:[%s8511_s27 + $0x84] sm:$0xe]  ;;  %v9413_v3 = vsel %vm9117_vm7, %v1367_v58, %v1368_v27  ;;  %v4443_v58 = vrot.slane %v8377_v5, 5  ;;  %v1381_v27 = vrot.slane %v1379_v2, 4  ;;  %v9436_v24 = vsel %vm9117_vm7, %v4435_v30, %v4436_v28  ;;  %v6987_v5 = vld [vmem:[%s8511_s27 + $0x9c] sm:$0xe] }
  0xf4   : > { %7772 = vmatprep.mubr.msk.bf16.mxu1 %vm741_vm4, %v7012_v40  ;;  %v8376_v40 = vld [vmem:[%s8511_s27 + $0x80] sm:$0x1]  ;;  %v7002_v14 = vrot.slane %v6985_v42, 9  ;;  %v6626_v51 = vcombine.low %v9405_v29, %v9413_v3  ;;  %v4454_v42 = vrot.slane %v8820_v46, 5  ;;  %v4449_v19 = vrot.slane %v4447_v48, 4  ;;  %v11016_v3 = vld [vmem:[#allocation5_spill] sm:$0xff] }
  0xf5   : > { %v1375_v32 = vrot.slane %v8376_v40, 5  ;;  %v9454_v46 = vsel %vm9117_vm7, %v6612_v17, %v1379_v2  ;;  %v1260_v28 = vld [vmem:[%s8511_s27 + $0x9c] sm:$0xe]  ;;  %v1393_v9 = vrot.slane %v8838_v7, 5  ;;  %v9464_v62 = vsel %vm9117_vm7, %v4442_v12, %v4443_v58  ;;  %v11013_v17 = vld [vmem:[#allocation2_spill] sm:$0xff] }
  0xf6   : > { %v9468_v33 = vsel %vm9117_vm7, %v1381_v27, %v1382_v21  ;;  %v4456_v7 = vrot.slane %v4454_v42, 4  ;;  %v4457_v30 = vrot.slane %v8823_v53, 5  ;;  %v7017_v59 = vcombine.low %v9418_v10, %v9436_v24  ;;  %v1261_v53 = vld [vmem:[%s8511_s27 + $0xa8] sm:$0xe]  ;;  %v6714_v21 = vld [vmem:[%s8511_s27 + $0xc] sm:$0xf] }
  0xf7   : > { %v9446_v20 = vsel %vm9117_vm7, %v1374_v61, %v1375_v32  ;;  %v7004_v32 = vrot.slane %v6987_v5, 9  ;;  %v9476_v54 = vsel %vm9117_vm7, %v7003_v43, %v4447_v48  ;;  %v6614_v61 = vrot.slane %v1260_v28, 9 }
  0xf8   : > { %7569 = vmatmul.mubr.msk.bf16.gmra.mrb[8].mxu0 %vm741_vm4, %v6622_v11  ;;  %v1386_v11 = vrot.slane %v8797_v1, 5  ;;  %v9450_v1 = vsel %vm9117_vm7, %v7002_v14, %v4440_v36  ;;  %v1389_v36 = vrot.slane %v8805_v23, 5  ;;  %v6988_v14 = vld [vmem:[%s8511_s27 + $0xa8] sm:$0xe]  ;;  %v1395_v23 = vrot.slane %v1393_v9, 4 }
  0xf9   : > { %7572 = vmatprep.mubr.msk.bf16.mxu0 %vm741_vm4, %v6623_v49  ;;  %v8379_v49 = vld [vmem:[%s8511_s27 + $0x98] sm:$0x1]  ;;  %v1396_v25 = vrot.slane %v11013_v17, 5  ;;  %v4461_v12 = vrot.slane %v8858_v55, 5  ;;  %v1400_v58 = vrot.slane %v8873_v13, 5  ;;  %v6627_v48 = vcombine.low %v9429_v16, %v9446_v20 }
  0xfa   : > { %v4450_v40 = vrot.slane %v8379_v49, 5  ;;  %v1388_v2 = vrot.slane %v1386_v11, 4  ;;  %v7018_v27 = vcombine.low %v9450_v1, %v9464_v62  ;;  %v6628_v15 = vcombine.low %v9454_v46, %v9468_v33  ;;  %v6989_v20 = vld [vmem:[%s8511_s27 + $0xb4] sm:$0xe] }
  0xfb   : > { %7773 = vmatmul.mubr.msk.bf16.gmra.mrb[8].mxu1 %vm741_vm4, %v7013_v0  ;;  %v6613_v0 = vrot.slane %v1259_v37, 9  ;;  %v9511_v47 = vsel %vm9117_vm7, %v7004_v32, %v4454_v42  ;;  %v9515_v63 = vsel %vm9117_vm7, %v4456_v7, %v4457_v30  ;;  %v9522_v50 = vsel %vm9117_vm7, %v6614_v61, %v1393_v9  ;;  %v7105_v42 = vld [vmem:[%s8511_s27 + $0x18] sm:$0xf] }
  0xfc   : > { %7776 = vmatprep.mubr.msk.bf16.mxu1 %vm741_vm4, %v7014_v52  ;;  %v9480_v52 = vsel %vm9117_vm7, %v4449_v19, %v4450_v40  ;;  %v9507_v13 = vsel %vm9117_vm7, %v1388_v2, %v1389_v36  ;;  %v6615_v37 = vrot.slane %v1261_v53, 9  ;;  %v9533_v43 = vsel %vm9117_vm7, %v1395_v23, %v1396_v25  ;;  %v11015_v40 = vld [vmem:[#allocation4_spill] sm:$0xff]  ;;  %v7106_v2 = vld [vmem:[%s8511_s27 + $0x1c] sm:$0xf]  ;;  %v9571_v25 = vld [vmem:[%s8511_s27 + $0xc0] sm:$0xe] }
  0xfd   : > { %v9499_v55 = vsel %vm9117_vm7, %v6613_v0, %v1386_v11  ;;  %v7019_v35 = vcombine.low %v9476_v54, %v9480_v52  ;;  %v6715_v11 = vld [vmem:[%s8511_s27 + $0x10] sm:$0xf]  ;;  %v4463_v19 = vrot.slane %v4461_v12, 4  ;;  %v1402_v49 = vrot.slane %v1400_v58, 4 }
  0xfe   : > { %v1403_v5 = vrot.slane %v11015_v40, 5  ;;  %v6629_v28 = vcombine.low %v9499_v55, %v9507_v13  ;;  %v7020_v57 = vcombine.low %v9511_v47, %v9515_v63  ;;  %v2117_v9 = vshll.u32 %v6714_v21, 16 }
  0xff   : > { %v2123_v0 = vshll.u32 %v6715_v11, 16  ;;  %v2127_v36 = vshrl.u32 %v6715_v11, 16  ;;  %v5182_v32 = vshrl.u32 %v7105_v42, 16  ;;  %v5185_v7 = vshll.u32 %v7105_v42, 16  ;;  %v11017_v11 = vld [vmem:[#allocation6_spill] sm:$0xff] }
 0x100   : > { %7573 = vmatmul.mubr.msk.bf16.gmra.mrb[12].mxu0 %vm741_vm4, %v6624_v38  ;;  %v7005_v38 = vrot.slane %v6988_v14, 9  ;;  %v6630_v8 = vcombine.low %v9522_v50, %v9533_v43  ;;  %v7006_v30 = vrot.slane %v6989_v20, 9  ;;  %v9563_v14 = vsel %vm9117_vm7, %v1402_v49, %v1403_v5  ;;  %v6718_v20 = vld [vmem:[%s8511_s27 + $0x1c] sm:$0xf] }
 0x101   : > { %7576 = vmatprep.mubr.msk.bf16.mxu0 %vm741_vm4, %v6625_v34  ;;  %v11014_v34 = vld [vmem:[#allocation3_spill] sm:$0xff]  ;;  %v4468_v23 = vrot.slane %v8895_v4, 5  ;;  %v6616_v17 = vrot.slane %v1262_v6, 9  ;;  %v2119_v53 = vrot.slane %v2117_v9, 5  ;;  %v2129_v4 = vrot.slane %v2127_v36, 4 }
 0x102   : > { %v4464_v16 = vrot.slane %v11014_v34, 5  ;;  %v9551_v22 = vsel %vm9117_vm7, %v7005_v38, %v4461_v12  ;;  %v5195_v38 = vshrl.u32 %v7106_v2, 16  ;;  %v5184_v34 = vrot.slane %v5182_v32, 4  ;;  %v7107_v36 = vld [vmem:[%s8511_s27 + $0x20] sm:$0x1] }
 0x103   : > { %7777 = vmatmul.mubr.msk.bf16.gmra.mrb[12].mxu1 %vm741_vm4, %v7015_v18  ;;  %v2114_v18 = vshrl.u32 %v6714_v21, 16  ;;  %v9574_v21 = vrot.slane %v2123_v0, 5  ;;  %v1410_v42 = vrot.slane %v11017_v11, 5  ;;  %v9590_v49 = vsel %vm9117_vm7, %v7006_v30, %v4468_v23 }
 0x104   : > { %7780 = vmatprep.mubr.msk.bf16.mxu1 %vm741_vm4, %v7016_v39  ;;  %v9555_v39 = vsel %vm9117_vm7, %v6615_v37, %v1400_v58  ;;  %v9559_v61 = vsel %vm9117_vm7, %v4463_v19, %v4464_v16  ;;  %v5191_v58 = vshll.u32 %v7106_v2, 16  ;;  %v5187_v16 = vrot.slane %v5185_v7, 5  ;;  %v6716_v19 = vld [vmem:[%s8511_s27 + $0x14] sm:$0x1] }
 0x105   : > { %v2116_v12 = vrot.slane %v2114_v18, 4  ;;  %v7021_v29 = vcombine.low %v9551_v22, %v9559_v61  ;;  %v1407_v37 = vrot.slane %v8911_v44, 5  ;;  %v4470_v40 = vrot.slane %v4468_v23, 4  ;;  %v6717_v44 = vld [vmem:[%s8511_s27 + $0x18] sm:$0xf] }
 0x106   : > { %v7007_v5 = vrot.slane %v9571_v25, 9  ;;  %v4475_v24 = vrot.slane %v8934_v41, 5  ;;  %v5197_v6 = vrot.slane %v5195_v38, 4  ;;  %v2130_v9 = vor.u32 %v2129_v4, %v9574_v21  ;;  %v6722_v22 = vld [vmem:[%s8511_s27 + $0x2c] sm:$0x1] }
 0x107   : > { %v9601_v10 = vsel %vm9117_vm7, %v6616_v17, %v1407_v37  ;;  %v2120_v18 = vor.u32 %v2119_v53, %v2116_v12  ;;  %v2133_v0 = vshll.u32 %v6716_v19, 16  ;;  %v5188_v2 = vor.u32 %v5187_v16, %v5184_v34  ;;  %v7109_v53 = vld [vmem:[%s8511_s27 + $0x28] sm:$0xf]  ;;  %v6719_v16 = vld [vmem:[%s8511_s27 + $0x20] sm:$0x1] }
 0x108   : > { %7577 = vmatmul.mubr.msk.bf16.gmra.mrb[16].mxu0 %vm741_vm4, %v6626_v51  ;;  %v4471_v51 = vrot.slane %v11016_v3, 5  ;;  %v2138_v1 = vshrl.u32 %v6717_v44, 16  ;;  %v2141_v62 = vshll.u32 %v6717_v44, 16  ;;  %v2151_v32 = vshrl.u32 %v6718_v20, 16  ;;  %v9671_v44 = vld [vmem:[%s10992_s1 + $0xa] sm:$0x3] }
 0x109   : > { %7580 = vmatprep.mubr.msk.bf16.mxu0 %vm741_vm4, %v6627_v48  ;;  %v6631_v48 = vcombine.low %v9555_v39, %v9563_v14  ;;  %v1409_v7 = vrot.slane %v1407_v37, 4  ;;  %v4478_v30 = vrot.slane %v8940_v56, 5  ;;  %v9611_v41 = vsel %vm790_vm0, %v9261_v45, 0  ;;  %v7108_v45 = vld [vmem:[%s8511_s27 + $0x24] sm:$0xf] }
 0x10a   : > { %v9615_v23 = vsel %vm790_vm0, %v9303_v26, 0  ;;  %v9623_v17 = vsel %vm9117_vm7, %v4470_v40, %v4471_v51  ;;  %v4477_v25 = vrot.slane %v4475_v24, 4  ;;  %v5201_v12 = vshll.u32 %v7107_v36, 16  ;;  %v7112_v14 = vld [vmem:[%s8511_s27 + $0x34] sm:$0xf] }
 0x10b   : > { %7781 = vmatmul.mubr.msk.bf16.gmra.mrb[16].mxu1 %vm741_vm4, %v7017_v59  ;;  %v9604_v59 = vrot.slane %v5191_v58, 5  ;;  %v2121_v26 = vrot.slane %v2120_v18, 4  ;;  %v2131_v46 = vrot.slane %v2130_v9, 4  ;;  %v2135_v33 = vrot.slane %v2133_v0, 5  ;;  %v7110_v18 = vld [vmem:[%s8511_s27 + $0x2c] sm:$0x1] }
 0x10c   : > { %7784 = vmatprep.mubr.msk.bf16.mxu1 %vm741_vm4, %v7018_v27  ;;  %v2147_v27 = vshll.u32 %v6718_v20, 16  ;;  %v2140_v58 = vrot.slane %v2138_v1, 4  ;;  %v2143_v38 = vrot.slane %v2141_v62, 5  ;;  %v2153_v34 = vrot.slane %v2151_v32, 4  ;;  %v7111_v1 = vld [vmem:[%s8511_s27 + $0x30] sm:$0xf] }
 0x10d   : > { %v5198_v56 = vor.u32 %v5197_v6, %v9604_v59  ;;  %v5206_v55 = vshrl.u32 %v7108_v45, 16  ;;  %v5209_v13 = vshll.u32 %v7108_v45, 16  ;;  %v5219_v3 = vshrl.u32 %v7109_v53, 16 }
 0x10e   : > { %v9632_v4 = vrot.slane %v2147_v27, 5  ;;  %v7022_v51 = vcombine.low %v9590_v49, %v9623_v17  ;;  %v9647_v54 = vsel %vm9117_vm7, %v1409_v7, %v1410_v42  ;;  %v9651_v37 = vsel %vm9117_vm7, %v7007_v5, %v4475_v24  ;;  %v6721_v42 = vld [vmem:[%s8511_s27 + $0x28] sm:$0xf] }
 0x10f   : > { %v5199_v52 = vrot.slane %v5198_v56, 4  ;;  %v9655_v11 = vsel %vm9117_vm7, %v4477_v25, %v4478_v30  ;;  %v2126_v47 = vsel %vm8523_vm3, %v2121_v26, %v9574_v21  ;;  %v2136_v63 = vsel %vm8523_vm3, %v2131_v46, %v2135_v33  ;;  %v6723_v25 = vld [vmem:[%s8511_s27 + $0x30] sm:$0xf]  ;;  %v6724_v26 = vld [vmem:[%s8511_s27 + $0x34] sm:$0xf] }
 0x110   : > { %7581 = vmatmul.mubr.msk.bf16.gmra.mrb[20].mxu0 %vm741_vm4, %v6628_v15  ;;  %v5189_v15 = vrot.slane %v5188_v2, 4  ;;  %v2144_v49 = vor.u32 %v2143_v38, %v2140_v58  ;;  %v2154_v40 = vor.u32 %v2153_v34, %v9632_v4  ;;  %v2157_v5 = vshll.u32 %v6719_v16, 16 }
 0x111   : > { %7584 = vmatprep.mubr.msk.bf16.mxu0 %vm741_vm4, %v6629_v28  ;;  %v5215_v28 = vshll.u32 %v7109_v53, 16  ;;  %v5208_v21 = vrot.slane %v5206_v55, 4  ;;  %v5211_v20 = vrot.slane %v5209_v13, 5  ;;  %v5221_v6 = vrot.slane %v5219_v3, 4 }
 0x112   : > { %v5194_v19 = vsel %vm8523_vm3, %v5189_v15, %v9604_v59  ;;  %v2171_v36 = vshll.u32 %v6721_v42, 16  ;;  %v6632_v2 = vcombine.low %v9601_v10, %v9647_v54  ;;  %v7023_v50 = vcombine.low %v9651_v37, %v9655_v11  ;;  %v9715_v15 = vld [vmem:[%s10992_s1 + $0x16] sm:$0x3]  ;;  %v8288_v54 = vld [vmem:[%s8511_s27 + $0x18] sm:$0xff]  }
 0x113   : > { %7785 = vmatmul.mubr.msk.bf16.gmra.mrb[20].mxu1 %vm741_vm4, %v7019_v35  ;;  %v5203_v35 = vrot.slane %v5201_v12, 5  ;;  %v9673_v24 = vrot.slane %v5215_v28, 5  ;;  %v9690_v43 = vcombine.low %v2126_v47, %v2136_v63  ;;  %v2145_v62 = vrot.slane %v2144_v49, 4  ;;  %v7113_v28 = vld [vmem:[%s8511_s27 + $0x38] sm:$0x1] }
 0x114   : > { %7788 = vmatprep.mubr.msk.bf16.mxu1 %vm741_vm4, %v7020_v57  ;;  %v6720_v57 = vld [vmem:[%s8511_s27 + $0x24] sm:$0xf]  ;;  %v2155_v27 = vrot.slane %v2154_v40, 4  ;;  %v2159_v32 = vrot.slane %v2157_v5, 5  ;;  %v9695_v39 = vsel %vm790_vm0, %v9671_v44, 0  ;;  %v5212_v7 = vor.u32 %v5211_v20, %v5208_v21 }
 0x115   : > { %v5204_v59 = vsel %vm8523_vm3, %v5199_v52, %v5203_v35  ;;  %v2162_v9 = vshrl.u32 %v6720_v57, 16  ;;  %v2165_v0 = vshll.u32 %v6720_v57, 16  ;;  %v5222_v30 = vor.u32 %v5221_v6, %v9673_v24  ;;  %v7114_v11 = vld [vmem:[%s8511_s27 + $0x3c] sm:$0xf]  ;;  %v6725_v40 = vld [vmem:[%s8511_s27 + $0x38] sm:$0x1] }
 0x116   : > { %v9703_v10 = vcombine.low %v5194_v19, %v5204_v59  ;;  %v5225_v17 = vshll.u32 %v7110_v18, 16  ;;  %v9708_v45 = vrot.slane %v2171_v36, 5  ;;  %v5230_v53 = vshrl.u32 %v7111_v1, 16  ;;  %v7115_v59 = vld [vmem:[%s8511_s27 + $0x40] sm:$0xf]  ;;  %v8291_v36 = vld [vmem:[%s8511_s27 + $0x24] sm:$0xff]  }
 0x117   : > { %v2164_v56 = vrot.slane %v2162_v9, 4  ;;  %v2167_v12 = vrot.slane %v2165_v0, 5  ;;  %v5239_v46 = vshll.u32 %v7112_v14, 16  ;;  %v5243_v33 = vshrl.u32 %v7112_v14, 16  ;;  %v8289_v0 = vld [vmem:[%s8511_s27 + $0x18] sm:$0xff]  }
 0x118   : > { %7585 = vmatmul.mubr.msk.bf16.gmra.mrb[24].mxu0 %vm741_vm4, %v6630_v8  ;;  %v2175_v8 = vshrl.u32 %v6721_v42, 16  ;;  %v2150_v58 = vsel %vm8523_vm3, %v2145_v62, %v9632_v4  ;;  %v2160_v38 = vsel %vm8523_vm3, %v2155_v27, %v2159_v32  ;;  %v2186_v34 = vshrl.u32 %v6723_v25, 16 }
 0x119   : > { %7588 = vmatprep.mubr.msk.bf16.mxu0 %vm741_vm4, %v6631_v48  ;;  %v8287_v48 = vld [vmem:[%s8511_s27 + $0xc] sm:$0xff]   ;;  %v2189_v16 = vshll.u32 %v6723_v25, 16  ;;  %v9722_v55 = vrot.slane %v5212_v7, 4  ;;  %v9724_v13 = vrot.slane %v5225_v17, 5  ;;  %v2195_v3 = vshll.u32 %v6724_v26, 16 }
 0x11a   : > { %v2177_v61 = vrot.slane %v2175_v8, 4  ;;  %v9729_v52 = vrot.slane %v5222_v30, 4  ;;  %v2168_v35 = vor.u32 %v2167_v12, %v2164_v56  ;;  %v2181_v4 = vshll.u32 %v6722_v22, 16  ;;  %v6727_v7 = vld [vmem:[%s8511_s27 + $0x40] sm:$0xf] }
 0x11b   : > { %7789 = vmatmul.mubr.msk.bf16.gmra.mrb[24].mxu1 %vm741_vm4, %v7021_v29  ;;  %v5233_v29 = vshll.u32 %v7111_v1, 16  ;;  %v5232_v37 = vrot.slane %v5230_v53, 4  ;;  %v9734_v57 = vrot.slane %v5239_v46, 5  ;;  %v5245_v42 = vrot.slane %v5243_v33, 4  ;;  %v7117_v12 = vld [vmem:[%s8511_s27 + $0x48] sm:$0xf] }
 0x11c   : > { %7792 = vmatprep.mubr.msk.bf16.mxu1 %vm741_vm4, %v7022_v51  ;;  %v2199_v51 = vshrl.u32 %v6724_v26, 16  ;;  %v2178_v47 = vor.u32 %v2177_v61, %v9708_v45  ;;  %v9738_v19 = vsel %vm790_vm0, %v9715_v15, 0  ;;  %v5249_v49 = vshll.u32 %v7113_v28, 16  ;;  %v8290_v53 = vld [vmem:[%s8511_s27 + $0x24] sm:$0xff]   ;;  %v7118_v46 = vld [vmem:[%s8511_s27 + $0x4c] sm:$0xf] }
 0x11d   : > { %v5235_v63 = vrot.slane %v5233_v29, 5  ;;  %v2188_v5 = vrot.slane %v2186_v34, 4  ;;  %v2191_v21 = vrot.slane %v2189_v16, 5  ;;  %v9742_v20 = vrot.slane %v2195_v3, 5  ;;  %v8292_v33 = vld [vmem:[%s8511_s27 + $0x30] sm:$0xff]  }
 0x11e   : > { %v2201_v6 = vrot.slane %v2199_v51, 4  ;;  %v5254_v18 = vshrl.u32 %v7114_v11, 16  ;;  %v5257_v9 = vshll.u32 %v7114_v11, 16  ;;  %v5228_v8 = vsel %vm8523_vm3, %v9729_v52, %v9724_v13 }
 0x11f   : > { %v9758_v1 = vrot.slane %v2181_v4, 5  ;;  %v9760_v62 = vrot.slane %v2168_v35, 4  ;;  %v9762_v27 = vrot.slane %v2178_v47, 4  ;;  %v5236_v32 = vor.u32 %v5235_v63, %v5232_v37 }
 0x120   : > { %7589 = vmatmul.mubr.msk.bf16.gmra.mrb[28].mxu0 %vm741_vm4, %v6632_v2  ;;  %v9748_v2 = vcombine.low %v2150_v58, %v2160_v38  ;;  %v5246_v14 = vor.u32 %v5245_v42, %v9734_v57  ;;  %v9767_v30 = vrot.slane %v5249_v49, 5  ;;  %v2205_v17 = vshll.u32 %v6725_v40, 16  ;;  %v7116_v42 = vld [vmem:[%s8511_s27 + $0x44] sm:$0x1]  ;;  %v8293_v40 = vld [vmem:[%s8511_s27 + $0x30] sm:$0xff]  }
 0x121   : > { %7594 = vmatprep.mubr.msk.bf16.mxu0 %vm741_vm4, %v8287_v48  ;;  %v6726_v48 = vld [vmem:[%s8511_s27 + $0x3c] sm:$0xf]  ;;  %v5263_v25 = vshll.u32 %v7115_v59, 16  ;;  %v5267_v56 = vshrl.u32 %v7115_v59, 16  ;;  %v2192_v26 = vor.u32 %v2191_v21, %v2188_v5  ;;  %v2202_v22 = vor.u32 %v2201_v6, %v9742_v20 }
 0x122   : > { %v5256_v61 = vrot.slane %v5254_v18, 4  ;;  %v5259_v29 = vrot.slane %v5257_v9, 5  ;;  %v2210_v58 = vshrl.u32 %v6726_v48, 16  ;;  %v2213_v38 = vshll.u32 %v6726_v48, 16  ;;  %v8295_v59 = vld [vmem:[%s8511_s27 + $0x3c] sm:$0xff]  }
 0x123   : > { %7793 = vmatmul.mubr.msk.bf16.gmra.mrb[28].mxu1 %vm741_vm4, %v7023_v50  ;;  %v5218_v50 = vsel %vm8523_vm3, %v9722_v55, %v9673_v24  ;;  %v2219_v34 = vshll.u32 %v6727_v7, 16  ;;  %v2223_v16 = vshrl.u32 %v6727_v7, 16  ;;  %v5237_v28 = vrot.slane %v5236_v32, 4  ;;  %v6728_v9 = vld [vmem:[%s8511_s27 + $0x44] sm:$0x1]  ;;  %v8299_v24 = vld [vmem:[%s8511_s27 + $0x54] sm:$0xff]  }
 0x124   : > { %7798 = vmatprep.mubr.msk.bf16.mxu1 %vm741_vm4, %v8288_v54  ;;  %v5247_v3 = vrot.slane %v5246_v14, 4  ;;  %v5278_v51 = vshrl.u32 %v7117_v12, 16  ;;  %v5281_v54 = vshll.u32 %v7117_v12, 16  ;;  %v9779_v35 = vrot.slane %v5263_v25, 5  ;;  %v6729_v7 = vld [vmem:[%s8511_s27 + $0x48] sm:$0xf] }
 0x125   : > { %v5269_v4 = vrot.slane %v5267_v56, 4  ;;  %v5287_v37 = vshll.u32 %v7118_v46, 16  ;;  %v5291_v11 = vshrl.u32 %v7118_v46, 16  ;;  %v2193_v47 = vrot.slane %v2192_v26, 4  ;;  %v7119_v25 = vld [vmem:[%s8511_s27 + $0x50] sm:$0x1] }
 0x126   : > { %v2207_v63 = vrot.slane %v2205_v17, 5  ;;  %v5260_v49 = vor.u32 %v5259_v29, %v5256_v61  ;;  %v2215_v5 = vrot.slane %v2213_v38, 5  ;;  %v9786_v21 = vrot.slane %v2219_v34, 5  ;;  %v8294_v17 = vld [vmem:[%s8511_s27 + $0x3c] sm:$0xff]   ;;  %v8296_v56 = vld [vmem:[%s8511_s27 + $0x48] sm:$0xff]  }
 0x127   : > { %v2225_v6 = vrot.slane %v2223_v16, 4  ;;  %v2184_v18 = vsel %vm8523_vm3, %v9762_v27, %v9758_v1  ;;  %v5270_v32 = vor.u32 %v5269_v4, %v9779_v35  ;;  %v5273_v14 = vshll.u32 %v7116_v42, 16  ;;  %v8297_v46 = vld [vmem:[%s8511_s27 + $0x48] sm:$0xff]   ;;  %v6731_v34 = vld [vmem:[%s8511_s27 + $0x50] sm:$0x1]  ;;  %v8298_v42 = vld [vmem:[%s8511_s27 + $0x54] sm:$0xff]  }
 0x128   : > { %7595 = vmatmul.mubr.msk.bf16.vlgmr.msra.gmra.mrb[0].mxu0 %vm741_vm4, %v8289_v0  ;;  %v5280_v0 = vrot.slane %v5278_v51, 4  ;;  %v9801_v48 = vrot.slane %v5287_v37, 5  ;;  %v5252_v1 = vsel %vm8523_vm3, %v5247_v3, %v9767_v30  ;;  %v9814_v27 = vrot.slane %v5260_v49, 4  ;;  %v7120_v16 = vld [vmem:[%s8511_s27 + $0x54] sm:$0xf] }
 0x129   : > { %7627 = vmatpush3.bf16.msra.mxu0 %v9611_v41  ;;  %7598 = vmatprep.mubr.msk.bf16.mxu0 %vm741_vm4, %v8291_v36  ;;  %v2203_v41 = vrot.slane %v2202_v22, 4  ;;  %v5283_v36 = vrot.slane %v5281_v54, 5  ;;  %v2229_v26 = vshll.u32 %v6728_v9, 16  ;;  %v6730_v22 = vld [vmem:[%s8511_s27 + $0x4c] sm:$0xf]  ;;  %v2234_v61 = vshrl.u32 %v6729_v7, 16 }
 0x12a   : > { %8223 = vmatprep.subr.msk.bf16.mxu0 %vm790_vm0, %v9671_v44  ;;  %v2212_v44 = vrot.slane %v2210_v58, 4  ;;  %v2237_v29 = vshll.u32 %v6729_v7, 16  ;;  %v9839_v58 = vrot.slane %v5273_v14, 5  ;;  %v5297_v52 = vshll.u32 %v7119_v25, 16  ;;  %v7121_v4 = vld [vmem:[%s8511_s27 + $0x58] sm:$0xf] }
 0x12b   : > { %7799 = vmatmul.mubr.msk.bf16.vlgmr.msra.gmra.mrb[0].mxu1 %vm741_vm4, %v8290_v53  ;;  %v2208_v12 = vsel %vm8523_vm3, %v2203_v41, %v2207_v63  ;;  %v2226_v53 = vor.u32 %v2225_v6, %v9786_v21  ;;  %v5284_v30 = vor.u32 %v5283_v36, %v5280_v0  ;;  %v9861_v51 = vrot.slane %v2229_v26, 5  ;;  %v6732_v63 = vld [vmem:[%s8511_s27 + $0x54] sm:$0xf]  ;;  %v6733_v9 = vld [vmem:[%s8511_s27 + $0x58] sm:$0xf]  ;;  %v8300_v0 = vld [vmem:[%s8511_s27 + $0x60] sm:$0xff]  }
 0x12c   : > { %7831 = vmatpush3.bf16.msra.mxu1 %v9615_v23  ;;  %7802 = vmatprep.mubr.msk.bf16.mxu1 %vm741_vm4, %v8292_v33  ;;  %v2174_v23 = vsel %vm8523_vm3, %v9760_v62, %v9708_v45  ;;  %v5242_v45 = vsel %vm8523_vm3, %v5237_v28, %v9734_v57  ;;  %v2198_v62 = vsel %vm8523_vm3, %v2193_v47, %v9742_v20  ;;  %v9837_v33 = vrot.slane %v5270_v32, 4  ;;  %v7124_v25 = vld [vmem:[%s8511_s27 + $0x64] sm:$0xf] }
 0x12d   : > { %8229 = vmatprep.subr.msk.bf16.mxu1 %vm790_vm0, %v9715_v15  ;;  %v5293_v15 = vrot.slane %v5291_v11, 4  ;;  %v2216_v57 = vor.u32 %v2215_v5, %v2212_v44  ;;  %v9833_v20 = vcombine.low %v5218_v50, %v5228_v8  ;;  %v9844_v55 = vcombine.low %v2174_v23, %v2184_v18 }
 0x12e   : > { %v9846_v50 = vcombine.low %v5242_v45, %v5252_v1  ;;  %v9848_v8 = vcombine.low %v2198_v62, %v2208_v12  ;;  %v9859_v3 = vrot.slane %v2226_v53, 4  ;;  %v2243_v54 = vshll.u32 %v6730_v22, 16  ;;  %v7123_v62 = vld [vmem:[%s8511_s27 + $0x60] sm:$0xf] }
 0x12f   : > { %v5294_v13 = vor.u32 %v5293_v15, %v9801_v48  ;;  %v9857_v28 = vrot.slane %v2216_v57, 4  ;;  %v9864_v37 = vrot.slane %v5284_v30, 4  ;;  %v2236_v11 = vrot.slane %v2234_v61, 4  ;;  %v6735_v30 = vld [vmem:[%s8511_s27 + $0x60] sm:$0xf] }
 0x130   : > { %7599 = vmatmul.mubr.msk.bf16.gmra.mrb[4].mxu0 %vm741_vm4, %v8293_v40  ;;  %v2239_v47 = vrot.slane %v2237_v29, 5  ;;  %v2247_v41 = vshrl.u32 %v6730_v22, 16  ;;  %v9874_v44 = vrot.slane %v5297_v52, 5  ;;  %v2253_v5 = vshll.u32 %v6731_v34, 16  ;;  %v7122_v52 = vld [vmem:[%s8511_s27 + $0x5c] sm:$0x1] }
 0x131   : > { %7602 = vmatprep.mubr.msk.bf16.mxu0 %vm741_vm4, %v8295_v59  ;;  %v9872_v40 = vrot.slane %v5294_v13, 4  ;;  %v5302_v6 = vshrl.u32 %v7120_v16, 16  ;;  %v5305_v59 = vshll.u32 %v7120_v16, 16  ;;  %v5311_v23 = vshll.u32 %v7121_v4, 16  ;;  %v6736_v13 = vld [vmem:[%s8511_s27 + $0x64] sm:$0xf] }
 0x132   : > { %v5315_v18 = vshrl.u32 %v7121_v4, 16  ;;  %v2258_v14 = vshrl.u32 %v6732_v63, 16  ;;  %v2261_v15 = vshll.u32 %v6732_v63, 16  ;;  %v9892_v45 = vrot.slane %v2243_v54, 5  ;;  %v8303_v4 = vld [vmem:[%s8511_s27 + $0x6c] sm:$0xff]  }
 0x133   : > { %7803 = vmatmul.mubr.msk.bf16.gmra.mrb[4].mxu1 %vm741_vm4, %v8294_v17  ;;  %v2240_v17 = vor.u32 %v2239_v47, %v2236_v11  ;;  %v2249_v1 = vrot.slane %v2247_v41, 4  ;;  %v9901_v57 = vrot.slane %v2253_v5, 5  ;;  %v2267_v53 = vshll.u32 %v6733_v9, 16 }
 0x134   : > { %7806 = vmatprep.mubr.msk.bf16.mxu1 %vm741_vm4, %v8296_v56  ;;  %v8301_v56 = vld [vmem:[%s8511_s27 + $0x60] sm:$0xff]   ;;  %v2271_v26 = vshrl.u32 %v6733_v9, 16  ;;  %v5304_v22 = vrot.slane %v5302_v6, 4  ;;  %v5307_v61 = vrot.slane %v5305_v59, 5  ;;  %v9905_v29 = vrot.slane %v5311_v23, 5  ;;  %v8302_v23 = vld [vmem:[%s8511_s27 + $0x6c] sm:$0xff]  }
 0x135   : > { %v2263_v34 = vrot.slane %v2261_v15, 5  ;;  %v5326_v16 = vshrl.u32 %v7123_v62, 16  ;;  %v5329_v54 = vshll.u32 %v7123_v62, 16  ;;  %v5335_v11 = vshll.u32 %v7124_v25, 16  ;;  %v6734_v15 = vld [vmem:[%s8511_s27 + $0x5c] sm:$0x1] }
 0x136   : > { %v5339_v47 = vshrl.u32 %v7124_v25, 16  ;;  %v2282_v41 = vshrl.u32 %v6735_v30, 16  ;;  %v2285_v63 = vshll.u32 %v6735_v30, 16  ;;  %v2273_v5 = vrot.slane %v2271_v26, 4  ;;  %v8304_v62 = vld [vmem:[%s8511_s27 + $0x78] sm:$0xff]  }
 0x137   : > { %v2291_v6 = vshll.u32 %v6736_v13, 16  ;;  %v2295_v59 = vshrl.u32 %v6736_v13, 16  ;;  %v2250_v9 = vor.u32 %v2249_v1, %v9892_v45  ;;  %v5328_v30 = vrot.slane %v5326_v16, 4  ;;  %v7126_v13 = vld [vmem:[%s8511_s27 + $0x6c] sm:$0xf] }
 0x138   : > { %7603 = vmatmul.mubr.msk.bf16.gmra.mrb[8].mxu0 %vm741_vm4, %v8297_v46  ;;  %v5317_v46 = vrot.slane %v5315_v18, 4  ;;  %v9914_v18 = vrot.slane %v2240_v17, 4  ;;  %v5331_v26 = vrot.slane %v5329_v54, 5  ;;  %v9923_v17 = vrot.slane %v5335_v11, 5 }
 0x139   : > { %7606 = vmatprep.mubr.msk.bf16.mxu0 %vm741_vm4, %v8299_v24  ;;  %v2260_v24 = vrot.slane %v2258_v14, 4  ;;  %v5321_v14 = vshll.u32 %v7122_v52, 16  ;;  %v5341_v1 = vrot.slane %v5339_v47, 4  ;;  %v2277_v7 = vshll.u32 %v6734_v15, 16 }
 0x13a   : > { %v5318_v25 = vor.u32 %v5317_v46, %v9905_v29  ;;  %v9927_v46 = vrot.slane %v2291_v6, 5  ;;  %v2246_v16 = vsel %vm8523_vm3, %v9914_v18, %v9892_v45  ;;  %v2251_v54 = vrot.slane %v2250_v9, 4  ;;  %v8306_v18 = vld [vmem:[%s8511_s27 + $0x84] sm:$0xff]  }
 0x13b   : > { %7807 = vmatmul.mubr.msk.bf16.gmra.mrb[8].mxu1 %vm741_vm4, %v8298_v42  ;;  %v9911_v42 = vrot.slane %v2267_v53, 5  ;;  %v2264_v53 = vor.u32 %v2263_v34, %v2260_v24  ;;  %v2297_v24 = vrot.slane %v2295_v59, 4  ;;  %v8305_v34 = vld [vmem:[%s8511_s27 + $0x78] sm:$0xff]   ;;  %v5350_v11 = vshrl.u32 %v7126_v13, 16  ;;  %v7127_v59 = vld [vmem:[%s8511_s27 + $0x70] sm:$0xf] }
 0x13c   : > { %7810 = vmatprep.mubr.msk.bf16.mxu1 %vm741_vm4, %v8300_v0  ;;  %v5308_v0 = vor.u32 %v5307_v61, %v5304_v22  ;;  %v2284_v22 = vrot.slane %v2282_v41, 4  ;;  %v2287_v61 = vrot.slane %v2285_v63, 5  ;;  %v5353_v47 = vshll.u32 %v7126_v13, 16 }
 0x13d   : > { %v2274_v52 = vor.u32 %v2273_v5, %v9911_v42  ;;  %v5319_v63 = vrot.slane %v5318_v25, 4  ;;  %v5323_v5 = vrot.slane %v5321_v14, 5  ;;  %v2265_v6 = vrot.slane %v2264_v53, 4  ;;  %v8308_v53 = vld [vmem:[%s8511_s27 + $0x90] sm:$0xff]  }
 0x13e   : > { %v5309_v41 = vrot.slane %v5308_v0, 4  ;;  %v5332_v15 = vor.u32 %v5331_v26, %v5328_v30  ;;  %v5342_v12 = vor.u32 %v5341_v1, %v9923_v17  ;;  %v2288_v45 = vor.u32 %v2287_v61, %v2284_v22 }
 0x13f   : > { %v2275_v9 = vrot.slane %v2274_v52, 4  ;;  %v2279_v32 = vrot.slane %v2277_v7, 5  ;;  %v2298_v13 = vor.u32 %v2297_v24, %v9927_v46  ;;  %v5352_v49 = vrot.slane %v5350_v11, 4  ;;  %v6738_v11 = vld [vmem:[%s8511_s27 + $0x6c] sm:$0xf] }
 0x140   : > { %7607 = vmatmul.mubr.msk.bf16.gmra.mrb[12].mxu0 %vm741_vm4, %v8301_v56  ;;  %v7125_v56 = vld [vmem:[%s8511_s27 + $0x68] sm:$0x1]  ;;  %v5355_v0 = vrot.slane %v5353_v47, 5  ;;  %v5359_v25 = vshll.u32 %v7127_v59, 16  ;;  %v5363_v14 = vshrl.u32 %v7127_v59, 16  ;;  %v2256_v30 = vsel %vm8523_vm3, %v2251_v54, %v9901_v57  ;;  %v8311_v47 = vld [vmem:[%s8511_s27 + $0x9c] sm:$0xff]  }
 0x141   : > { %7610 = vmatprep.mubr.msk.bf16.mxu0 %vm741_vm4, %v8303_v4  ;;  %v6737_v4 = vld [vmem:[%s8511_s27 + $0x68] sm:$0x1]  ;;  %v5345_v36 = vshll.u32 %v7125_v56, 16  ;;  %v5314_v7 = vsel %vm8523_vm3, %v5309_v41, %v9905_v29  ;;  %v5324_v26 = vsel %vm8523_vm3, %v5319_v63, %v5323_v5  ;;  %v2270_v1 = vsel %vm8523_vm3, %v2265_v6, %v9911_v42  ;;  %v6742_v5 = vld [vmem:[%s8511_s27 + $0x7c] sm:$0xf] }
 0x142   : > { %v2301_v38 = vshll.u32 %v6737_v4, 16  ;;  %v9957_v22 = vrot.slane %v5332_v15, 4  ;;  %v9959_v61 = vrot.slane %v5342_v12, 4  ;;  %v9963_v52 = vrot.slane %v2288_v45, 4  ;;  %v7132_v45 = vld [vmem:[%s8511_s27 + $0x84] sm:$0xf] }
 0x143   : > { %7811 = vmatmul.mubr.msk.bf16.gmra.mrb[12].mxu1 %vm741_vm4, %v8302_v23  ;;  %v8307_v23 = vld [vmem:[%s8511_s27 + $0x84] sm:$0xff]   ;;  %v9961_v57 = vrot.slane %v5345_v36, 5  ;;  %v2280_v29 = vsel %vm8523_vm3, %v2275_v9, %v2279_v32  ;;  %v9967_v56 = vrot.slane %v2298_v13, 4  ;;  %v11018_v36 = vsel %vm8523_vm3, %v9837_v33, %v9839_v58  ;;  %v6743_v6 = vld [vmem:[%s8511_s27 + $0x80] sm:$0x1] }
 0x144   : > { %7814 = vmatprep.mubr.msk.bf16.mxu1 %vm741_vm4, %v8304_v62  ;;  %v7128_v62 = vld [vmem:[%s8511_s27 + $0x74] sm:$0x1]  ;;  %v9969_v24 = vrot.slane %v2301_v38, 5  ;;  %v11019_v32 = vsel %vm8523_vm3, %v9814_v27, %v9779_v35  ;;  %v5356_v54 = vor.u32 %v5355_v0, %v5352_v49  ;;  %v9985_v38 = vrot.slane %v5359_v25, 5  ;;  %v7133_v25 = vld [vmem:[%s8511_s27 + $0x88] sm:$0xf] }
 0x145   : > { %v5369_v42 = vshll.u32 %v7128_v62, 16  ;;  %v9983_v12 = vcombine.low %v11019_v32, %v11018_v36  ;;  %v9987_v4 = vrot.slane %v5363_v14, 4  ;;  %v11020_v33 = vsel %vm8523_vm3, %v9859_v3, %v9861_v51  ;;  %v8312_v14 = vld [vmem:[%s8511_s27 + $0xa8] sm:$0xff]  }
 0x146   : > { %v11021_v35 = vsel %vm8523_vm3, %v9857_v28, %v9786_v21  ;;  %v11022_v58 = vsel %vm8523_vm3, %v9872_v40, %v9874_v44  ;;  %v11023_v49 = vsel %vm8523_vm3, %v9864_v37, %v9801_v48  ;;  %v10016_v3 = vcombine.low %v2246_v16, %v2256_v30  ;;  %v6739_v21 = vld [vmem:[%s8511_s27 + $0x70] sm:$0xf]  ;;  %v7129_v28 = vld [vmem:[%s8511_s27 + $0x78] sm:$0xf]  ;;  %v7130_v44 = vld [vmem:[%s8511_s27 + $0x7c] sm:$0xf] }
 0x147   : > { %v10002_v27 = vcombine.low %v11021_v35, %v11020_v33  ;;  %v10014_v41 = vcombine.low %v11023_v49, %v11022_v58  ;;  %v10018_v51 = vcombine.low %v5314_v7, %v5324_v26  ;;  %v10022_v63 = vcombine.low %v2270_v1, %v2280_v29  ;;  %v6741_v16 = vld [vmem:[%s8511_s27 + $0x78] sm:$0xf]  ;;  %v8313_v32 = vld [vmem:[%s8511_s27 + $0xa8] sm:$0xff]   ;;  %v6744_v37 = vld [vmem:[%s8511_s27 + $0x84] sm:$0xf] }
 0x148   : > { %7611 = vmatmul.mubr.msk.bf16.gmra.mrb[16].mxu0 %vm741_vm4, %v8305_v34  ;;  %v8309_v34 = vld [vmem:[%s8511_s27 + $0x90] sm:$0xff]   ;;  %v10043_v59 = vrot.slane %v5369_v42, 5  ;;  %v2309_v15 = vshll.u32 %v6738_v11, 16  ;;  %v10047_v9 = vrot.slane %v5356_v54, 4  ;;  %v5366_v13 = vor.u32 %v9987_v4, %v9985_v38  ;;  %v7134_v40 = vld [vmem:[%s8511_s27 + $0x8c] sm:$0x1] }
 0x149   : > { %7614 = vmatprep.mubr.msk.bf16.mxu0 %vm741_vm4, %v8307_v23  ;;  %11024 = vst [vmem:[#allocation2_spill] sm:$0xff] %v10018_v51  ;;  %11025 = vst [vmem:[#allocation3_spill] sm:$0xff] %v10022_v63  ;;  %v2306_v23 = vshrl.u32 %v6738_v11, 16  ;;  %v2315_v62 = vshll.u32 %v6739_v21, 16  ;;  %v2319_v0 = vshrl.u32 %v6739_v21, 16  ;;  %v5377_v30 = vshll.u32 %v7129_v28, 16 }
 0x14a   : > { %v5383_v7 = vshll.u32 %v7130_v44, 16  ;;  %v5387_v26 = vshrl.u32 %v7130_v44, 16  ;;  %v2330_v1 = vshrl.u32 %v6741_v16, 16  ;;  %v2333_v29 = vshll.u32 %v6741_v16, 16  ;;  %v10057_v54 = vld [vmem:[%s8511_s27 + $0x74] sm:$0x1] }
 0x14b   : > { %7815 = vmatmul.mubr.msk.bf16.gmra.mrb[16].mxu1 %vm741_vm4, %v8306_v18  ;;  %v8310_v18 = vld [vmem:[%s8511_s27 + $0x9c] sm:$0xff]   ;;  %v2339_v42 = vshll.u32 %v6742_v5, 16  ;;  %v2343_v36 = vshrl.u32 %v6742_v5, 16  ;;  %11026 = vst [vmem:[#allocation4_spill] sm:$0xff] %v10057_v54  ;;  %v5398_v4 = vshrl.u32 %v7132_v45, 16  ;;  %v5401_v11 = vshll.u32 %v7132_v45, 16 }
 0x14c   : > { %7818 = vmatprep.mubr.msk.bf16.mxu1 %vm741_vm4, %v8308_v53  ;;  %v5374_v53 = vshrl.u32 %v7129_v28, 16  ;;  %v5411_v33 = vshrl.u32 %v7133_v25, 16  ;;  %v8315_v35 = vld [vmem:[%s8511_s27 + $0xb4] sm:$0xff]   ;;  %v2308_v58 = vrot.slane %v2306_v23, 4  ;;  %v10061_v49 = vrot.slane %v2315_v62, 5 }
 0x14d   : > { %v2321_v21 = vrot.slane %v2319_v0, 4  ;;  %v7131_v28 = vld [vmem:[%s8511_s27 + $0x80] sm:$0x1]  ;;  %v5379_v16 = vrot.slane %v5377_v30, 5  ;;  %v10065_v5 = vrot.slane %v5383_v7, 5  ;;  %v5389_v45 = vrot.slane %v5387_v26, 4 }
 0x14e   : > { %v5376_v44 = vrot.slane %v5374_v53, 4  ;;  %v2335_v23 = vrot.slane %v2333_v29, 5  ;;  %v2345_v62 = vrot.slane %v2343_v36, 4  ;;  %v5400_v0 = vrot.slane %v5398_v4, 4  ;;  %v10079_v7 = vld [vmem:[%s8511_s27 + $0x88] sm:$0xf] }
 0x14f   : > { %v5403_v48 = vrot.slane %v5401_v11, 5  ;;  %v10075_v53 = vrot.slane %v5366_v13, 4  ;;  %v2325_v30 = vshll.u32 %v10057_v54, 16  ;;  %v2354_v26 = vshrl.u32 %v6744_v37, 16 }
 0x150   : > { %7615 = vmatmul.mubr.msk.bf16.gmra.mrb[20].mxu0 %vm741_vm4, %v8309_v34  ;;  %v5407_v34 = vshll.u32 %v7133_v25, 16  ;;  %v8314_v25 = vld [vmem:[%s8511_s27 + $0xb4] sm:$0xff]   ;;  %v2357_v51 = vshll.u32 %v6744_v37, 16  ;;  %v5380_v36 = vor.u32 %v5379_v16, %v5376_v44  ;;  %v5393_v4 = vshll.u32 %v7131_v28, 16 }
 0x151   : > { %7618 = vmatprep.mubr.msk.bf16.mxu0 %vm741_vm4, %v8311_v47  ;;  %v2311_v47 = vrot.slane %v2309_v15, 5  ;;  %v10070_v15 = vrot.slane %v2339_v42, 5  ;;  %v2322_v42 = vor.u32 %v2321_v21, %v10061_v49  ;;  %v5390_v13 = vor.u32 %v5389_v45, %v10065_v5 }
 0x152   : > { %v10073_v60 = vrot.slane %v5407_v34, 5  ;;  %v5404_v54 = vor.u32 %v5403_v48, %v5400_v0  ;;  %v2363_v63 = vshll.u32 %v10079_v7, 16  ;;  %v2356_v21 = vrot.slane %v2354_v26, 4  ;;  %v8318_v26 = vld [vmem:[%s8511_s27 + $0xcc] sm:$0xff]  }
 0x153   : > { %7819 = vmatmul.mubr.msk.bf16.gmra.mrb[20].mxu1 %vm741_vm4, %v8310_v18  ;;  %v2332_v18 = vrot.slane %v2330_v1, 4  ;;  %v8316_v1 = vld [vmem:[%s8511_s27 + $0xc0] sm:$0xff]   ;;  %v2312_v29 = vor.u32 %v2311_v47, %v2308_v58  ;;  %v2346_v34 = vor.u32 %v2345_v62, %v10070_v15  ;;  %v2327_v47 = vrot.slane %v2325_v30, 5  ;;  %v10095_v30 = vld [vmem:[%s8511_s27 + $0x8c] sm:$0x1] }
 0x154   : > { %7822 = vmatprep.mubr.msk.bf16.mxu1 %vm741_vm4, %v8312_v14  ;;  %v5413_v14 = vrot.slane %v5411_v33, 4  ;;  %v2349_v33 = vshll.u32 %v6743_v6, 16  ;;  %v8317_v58 = vld [vmem:[%s8511_s27 + $0xc0] sm:$0xff]   ;;  %v2367_v28 = vshrl.u32 %v10079_v7, 16  ;;  %v2323_v44 = vrot.slane %v2322_v42, 4 }
 0x155   : > { %v2336_v11 = vor.u32 %v2335_v23, %v2332_v18  ;;  %v2313_v6 = vrot.slane %v2312_v29, 4  ;;  %v5381_v48 = vrot.slane %v5380_v36, 4  ;;  %v5395_v16 = vrot.slane %v5393_v4, 5  ;;  %v10101_v42 = vld [vmem:[%s8511_s27 + $0x94] sm:$0xf] }
 0x156   : > { %v5414_v37 = vor.u32 %v5413_v14, %v10073_v60  ;;  %v5391_v45 = vrot.slane %v5390_v13, 4  ;;  %v2347_v23 = vrot.slane %v2346_v34, 4  ;;  %v5405_v62 = vrot.slane %v5404_v54, 4 }
 0x157   : > { %v2337_v18 = vrot.slane %v2336_v11, 4  ;;  %v2369_v29 = vrot.slane %v2367_v28, 4  ;;  %v5362_v54 = vsel %vm8523_vm3, %v10047_v9, %v9985_v38  ;;  %v2318_v13 = vsel %vm8523_vm3, %v2313_v6, %v10061_v49 }
 0x158   : > { %7619 = vmatmul.mubr.msk.bf16.gmra.mrb[24].mxu0 %vm741_vm4, %v8313_v32  ;;  %v5417_v32 = vshll.u32 %v7134_v40, 16  ;;  %v7135_v40 = vld [vmem:[%s8511_s27 + $0x90] sm:$0xf]  ;;  %v5415_v0 = vrot.slane %v5414_v37, 4  ;;  %v2328_v11 = vsel %vm8523_vm3, %v2323_v44, %v2327_v47  ;;  %v5386_v38 = vsel %vm8523_vm3, %v5381_v48, %v10065_v5  ;;  %v7138_v48 = vld [vmem:[%s8511_s27 + $0x9c] sm:$0xf] }
 0x159   : > { %7622 = vmatprep.mubr.msk.bf16.mxu0 %vm741_vm4, %v8315_v35  ;;  %v2359_v35 = vrot.slane %v2357_v51, 5  ;;  %v10097_v51 = vrot.slane %v2363_v63, 5  ;;  %v5422_v36 = vshrl.u32 %v7135_v40, 16  ;;  %v5425_v4 = vshll.u32 %v7135_v40, 16 }
 0x15a   : > { %v5419_v14 = vrot.slane %v5417_v32, 5  ;;  %v5372_v63 = vsel %vm8523_vm3, %v10075_v53, %v10043_v59  ;;  %v5396_v9 = vsel %vm8523_vm3, %v5391_v45, %v5395_v16  ;;  %v2342_v59 = vsel %vm8523_vm3, %v2337_v18, %v10070_v15  ;;  %v10130_v53 = vld [vmem:[%s8511_s27 + $0x98] sm:$0x1]  ;;  %v10193_v45 = vld [vmem:[%s8511_s27 + $0xa0] sm:$0xf] }
 0x15b   : > { %7823 = vmatmul.mubr.msk.bf16.gmra.mrb[24].mxu1 %vm741_vm4, %v8314_v25  ;;  %v2351_v25 = vrot.slane %v2349_v33, 5  ;;  %v2373_v5 = vshll.u32 %v10095_v30, 16  ;;  %v5431_v33 = vshll.u32 %v10101_v42, 16  ;;  %v2370_v37 = vor.u32 %v2369_v29, %v10097_v51 }
 0x15c   : > { %7826 = vmatprep.mubr.msk.bf16.mxu1 %vm741_vm4, %v8316_v1  ;;  %v2360_v1 = vor.u32 %v2359_v35, %v2356_v21  ;;  %v5420_v34 = vsel %vm8523_vm3, %v5415_v0, %v5419_v14  ;;  %v10143_v32 = vrot.slane %v5422_v36, 4  ;;  %v11027_v47 = vsel %vm8523_vm3, %v9959_v61, %v9961_v57  ;;  %v6750_v0 = vld [vmem:[%s8511_s27 + $0x9c] sm:$0xf]  ;;  %v10207_v14 = vld [vmem:[%s8511_s27 + $0xa0] sm:$0xf] }
 0x15d   : > { %v2352_v49 = vsel %vm8523_vm3, %v2347_v23, %v2351_v25  ;;  %v11028_v21 = vsel %vm8523_vm3, %v9957_v22, %v9923_v17  ;;  %v11029_v28 = vsel %vm8523_vm3, %v9967_v56, %v9969_v24  ;;  %v5435_v61 = vshrl.u32 %v10101_v42, 16  ;;  %v10185_v24 = vld [vmem:[%s8511_s27 + $0x94] sm:$0xf] }
 0x15e   : > { %v10140_v15 = vrot.slane %v2360_v1, 4  ;;  %v10160_v35 = vcombine.low %v11028_v21, %v11027_v47  ;;  %v5441_v57 = vshll.u32 %v10130_v53, 16  ;;  %v10176_v17 = vcombine.low %v5362_v54, %v5372_v63 }
 0x15f   : > { %v10178_v22 = vcombine.low %v2318_v13, %v2328_v11  ;;  %v10180_v44 = vcombine.low %v5386_v38, %v5396_v9  ;;  %v10182_v56 = vcombine.low %v2342_v59, %v2352_v49  ;;  %v10199_v23 = vrot.slane %v2370_v37, 4 }
 0x160   : > { %7623 = vmatmul.mubr.msk.bf16.gmra.mrb[28].mxu0 %vm741_vm4, %v8317_v58  ;;  %v10145_v58 = vrot.slane %v5425_v4, 5  ;;  %v2366_v18 = vsel %vm8523_vm3, %v10140_v15, %v10097_v51  ;;  %v10211_v1 = vrot.slane %v5441_v57, 5  ;;  %v2387_v29 = vshll.u32 %v10185_v24, 16  ;;  %v7141_v4 = vld [vmem:[%s8511_s27 + $0xa8] sm:$0xf] }
 0x161   : > { %7628 = vmatprep.mubr.msk.bf16.mxu0 %vm741_vm4, %v9690_v43  ;;  %v5410_v43 = vsel %vm8523_vm3, %v5405_v62, %v10073_v60  ;;  %v6747_v60 = vld [vmem:[%s8511_s27 + $0x90] sm:$0xf]  ;;  %v10203_v62 = vrot.slane %v5431_v33, 5  ;;  %v2391_v36 = vshrl.u32 %v10185_v24, 16  ;;  %v5446_v54 = vshrl.u32 %v7138_v48, 16 }
 0x162   : > { %v2378_v16 = vshrl.u32 %v6747_v60, 16  ;;  %v2381_v40 = vshll.u32 %v6747_v60, 16  ;;  %v5428_v25 = vor.u32 %v10145_v58, %v10143_v32  ;;  %v5449_v63 = vshll.u32 %v7138_v48, 16  ;;  %v10236_v32 = vld [vmem:[%s8511_s27 + $0x98] sm:$0x1] }
 0x163   : > { %7827 = vmatmul.mubr.msk.bf16.gmra.mrb[28].mxu1 %vm741_vm4, %v8318_v26  ;;  %v5437_v26 = vrot.slane %v5435_v61, 4  ;;  %v5455_v13 = vshll.u32 %v10193_v45, 16  ;;  %v5459_v11 = vshrl.u32 %v10193_v45, 16  ;;  %v2402_v59 = vshrl.u32 %v6750_v0, 16 }
 0x164   : > { %7832 = vmatprep.mubr.msk.bf16.mxu1 %vm741_vm4, %v9703_v10  ;;  %v11030_v10 = vsel %vm8523_vm3, %v9963_v52, %v9927_v46  ;;  %v10188_v46 = vcombine.low %v5410_v43, %v5420_v34  ;;  %v10190_v52 = vrot.slane %v2373_v5, 5  ;;  %v2380_v38 = vrot.slane %v2378_v16, 4 }
 0x165   : > { %v10172_v6 = vcombine.low %v11030_v10, %v11029_v28  ;;  %v2383_v9 = vrot.slane %v2381_v40, 5  ;;  %v2405_v49 = vshll.u32 %v6750_v0, 16  ;;  %v5470_v43 = vshrl.u32 %v7141_v4, 16  ;;  %v10246_v28 = vld [vmem:[%s8511_s27 + $0xa4] sm:$0x1] }
 0x166   : > { %v5473_v34 = vshll.u32 %v7141_v4, 16  ;;  %v10231_v5 = vrot.slane %v2387_v29, 5  ;;  %v2393_v33 = vrot.slane %v2391_v36, 4  ;;  %v5448_v58 = vrot.slane %v5446_v54, 4  ;;  %v6753_v0 = vld [vmem:[%s8511_s27 + $0xa8] sm:$0xf] }
 0x167   : > { %v5451_v60 = vrot.slane %v5449_v63, 5  ;;  %v10238_v47 = vrot.slane %v5455_v13, 5  ;;  %v5461_v21 = vrot.slane %v5459_v11, 4  ;;  %v2404_v10 = vrot.slane %v2402_v59, 4 }
 0x168   : > { %7629 = vmatmul.mubr.msk.bf16.vlgmr.msra.gmra.mrb[0].mxu0 %vm741_vm4, %v9748_v2  ;;  %v10222_v2 = vld [vmem:[%s8511_s27 + $0xac] sm:$0xf]  ;;  %v2407_v61 = vrot.slane %v2405_v49, 5  ;;  %v5472_v16 = vrot.slane %v5470_v43, 4  ;;  %v5475_v40 = vrot.slane %v5473_v34, 5  ;;  %v2384_v29 = vor.u32 %v2383_v9, %v2380_v38 }
 0x169   : > { %7661 = vmatpush3.bf16.msra.mxu0 %v9695_v39  ;;  %7632 = vmatprep.mubr.msk.bf16.mxu0 %vm741_vm4, %v9844_v55  ;;  %v2411_v39 = vshll.u32 %v10207_v14, 16  ;;  %v2415_v55 = vshrl.u32 %v10207_v14, 16  ;;  %v5479_v37 = vshll.u32 %v10222_v2, 16  ;;  %v2397_v36 = vshll.u32 %v10236_v32, 16  ;;  %v10272_v43 = vld [vmem:[%s8511_s27 + $0xac] sm:$0xf] }
 0x16a   : > { %v2394_v4 = vor.u32 %v2393_v33, %v10231_v5  ;;  %v5452_v54 = vor.u32 %v5451_v60, %v5448_v58  ;;  %v5462_v63 = vor.u32 %v5461_v21, %v10238_v47  ;;  %v5465_v13 = vshll.u32 %v10246_v28, 16 }
 0x16b   : > { %7833 = vmatmul.mubr.msk.bf16.vlgmr.msra.gmra.mrb[0].mxu1 %vm741_vm4, %v9833_v20  ;;  %v5483_v20 = vshrl.u32 %v10222_v2, 16  ;;  %v10248_v57 = vrot.slane %v2411_v39, 5  ;;  %v2417_v48 = vrot.slane %v2415_v55, 4  ;;  %v5429_v11 = vrot.slane %v5428_v25, 4 }
 0x16c   : > { %7865 = vmatpush3.bf16.msra.mxu1 %v9738_v19  ;;  %7836 = vmatprep.mubr.msk.bf16.mxu1 %vm741_vm4, %v9846_v50  ;;  %v2376_v19 = vsel %vm8523_vm3, %v10199_v23, %v10190_v52  ;;  %v5438_v50 = vor.u32 %v5437_v26, %v10203_v62  ;;  %v10255_v52 = vld [vmem:[%s8511_s27 + $0xa4] sm:$0x1]  ;;  %v10257_v23 = vrot.slane %v5479_v37, 5  ;;  %v2426_v9 = vshrl.u32 %v6753_v0, 16 }
 0x16d   : > { %v5485_v26 = vrot.slane %v5483_v20, 4  ;;  %v2429_v59 = vshll.u32 %v6753_v0, 16  ;;  %v2408_v49 = vor.u32 %v2407_v61, %v2404_v10  ;;  %v2418_v39 = vor.u32 %v2417_v48, %v10248_v57 }
 0x16e   : > { %v5439_v38 = vrot.slane %v5438_v50, 4  ;;  %v5476_v55 = vor.u32 %v5475_v40, %v5472_v16  ;;  %v2385_v34 = vrot.slane %v2384_v29, 4  ;;  %v2399_v33 = vrot.slane %v2397_v36, 5 }
 0x16f   : > { %v5486_v25 = vor.u32 %v5485_v26, %v10257_v23  ;;  %v2395_v20 = vrot.slane %v2394_v4, 4  ;;  %v5453_v58 = vrot.slane %v5452_v54, 4  ;;  %v5467_v60 = vrot.slane %v5465_v13, 5  ;;  %v10293_v4 = vld [vmem:[%s8511_s27 + $0xb0] sm:$0x1]  ;;  %v11031_v54 = vld [vmem:[#allocation3_spill] sm:$0xff] }
 0x170   : > { %7633 = vmatmul.mubr.msk.bf16.gmra.mrb[4].mxu0 %vm741_vm4, %v9848_v8  ;;  %v10265_v8 = vld [vmem:[%s8511_s27 + $0xb0] sm:$0x1]  ;;  %v2428_v21 = vrot.slane %v2426_v9, 4  ;;  %v2431_v50 = vrot.slane %v2429_v59, 5  ;;  %v2435_v10 = vshll.u32 %v10272_v43, 16  ;;  %v2439_v61 = vshrl.u32 %v10272_v43, 16 }
 0x171   : > { %7636 = vmatprep.mubr.msk.bf16.mxu0 %vm741_vm4, %v10002_v27  ;;  %v2421_v27 = vshll.u32 %v10255_v52, 16  ;;  %v5489_v37 = vshll.u32 %v10265_v8, 16  ;;  %v2409_v48 = vrot.slane %v2408_v49, 4  ;;  %v5477_v40 = vrot.slane %v5476_v55, 4  ;;  %v10318_v9 = vld [vmem:[%s8511_s27 + $0xb8] sm:$0xf] }
 0x172   : > { %v10287_v0 = vcombine.low %v2366_v18, %v2376_v19  ;;  %v5434_v29 = vsel %vm8523_vm3, %v5429_v11, %v10203_v62  ;;  %v5487_v36 = vrot.slane %v5486_v25, 4  ;;  %v2390_v51 = vsel %vm8523_vm3, %v2385_v34, %v10231_v5  ;;  %v7144_v62 = vld [vmem:[%s8511_s27 + $0xb4] sm:$0xf]  ;;  %v10310_v19 = vld [vmem:[%s8511_s27 + $0xb8] sm:$0xf]  ;;  %v11032_v5 = vld [vmem:[#allocation2_spill] sm:$0xff] }
 0x173   : > { %7837 = vmatmul.mubr.msk.bf16.gmra.mrb[4].mxu1 %vm741_vm4, %v9983_v12  ;;  %v5463_v12 = vrot.slane %v5462_v63, 4  ;;  %v2423_v16 = vrot.slane %v2421_v27, 5  ;;  %v5491_v26 = vrot.slane %v5489_v37, 5  ;;  %v2400_v15 = vsel %vm8523_vm3, %v2395_v20, %v2399_v33 }
 0x174   : > { %7840 = vmatprep.mubr.msk.bf16.mxu1 %vm741_vm4, %v10014_v41  ;;  %v2419_v41 = vrot.slane %v2418_v39, 4  ;;  %v5458_v18 = vsel %vm8523_vm3, %v5453_v58, %v10238_v47  ;;  %v2432_v13 = vor.u32 %v2431_v50, %v2428_v21  ;;  %v10314_v11 = vrot.slane %v2435_v10, 5 }
 0x175   : > { %v5468_v63 = vsel %vm8523_vm3, %v5463_v12, %v5467_v60  ;;  %v2414_v47 = vsel %vm8523_vm3, %v2409_v48, %v10248_v57  ;;  %v5482_v49 = vsel %vm8523_vm3, %v5477_v40, %v10257_v23  ;;  %v2445_v39 = vshll.u32 %v10293_v4, 16  ;;  %v10344_v12 = vld [vmem:[%s8511_s27 + $0xbc] sm:$0x1]  ;;  %v7147_v48 = vld [vmem:[%s8511_s27 + $0xc0] sm:$0xf] }
 0x176   : > { %v2424_v59 = vsel %vm8523_vm3, %v2419_v41, %v2423_v16  ;;  %v5492_v27 = vsel %vm8523_vm3, %v5487_v36, %v5491_v26  ;;  %v5494_v55 = vshrl.u32 %v7144_v62, 16  ;;  %v5497_v34 = vshll.u32 %v7144_v62, 16  ;;  %v10357_v41 = vld [vmem:[%s8511_s27 + $0xc4] sm:$0xf]  ;;  %v10370_v26 = vld [vmem:[%s8511_s27 + $0xbc] sm:$0x1] }
 0x177   : > { %v5503_v57 = vshll.u32 %v10310_v19, 16  ;;  %v2459_v37 = vshll.u32 %v10318_v9, 16  ;;  %v2463_v23 = vshrl.u32 %v10318_v9, 16  ;;  %v10340_v58 = vrot.slane %v2432_v13, 4 }
 0x178   : > { %7637 = vmatmul.mubr.msk.bf16.gmra.mrb[8].mxu0 %vm741_vm4, %v10016_v3  ;;  %v5444_v3 = vsel %vm8523_vm3, %v5439_v38, %v10211_v1  ;;  %v2441_v1 = vrot.slane %v2439_v61, 4  ;;  %v6756_v38 = vld [vmem:[%s8511_s27 + $0xb4] sm:$0xf]  ;;  %v5507_v60 = vshrl.u32 %v10310_v19, 16  ;;  %v10347_v21 = vcombine.low %v2390_v51, %v2400_v15 }
 0x179   : > { %7640 = vmatprep.mubr.msk.bf16.mxu0 %vm741_vm4, %v11031_v54  ;;  %v2450_v33 = vshrl.u32 %v6756_v38, 16  ;;  %v2453_v25 = vshll.u32 %v6756_v38, 16  ;;  %v10338_v20 = vcombine.low %v5434_v29, %v5444_v3  ;;  %v10349_v50 = vcombine.low %v5458_v18, %v5468_v63  ;;  %v6759_v54 = vld [vmem:[%s8511_s27 + $0xc0] sm:$0xf]  ;;  %v10378_v18 = vld [vmem:[%s8511_s27 + $0xc4] sm:$0xf] }
 0x17a   : > { %v10351_v10 = vcombine.low %v2414_v47, %v2424_v59  ;;  %v10353_v61 = vrot.slane %v2445_v39, 5  ;;  %v10361_v16 = vcombine.low %v5482_v49, %v5492_v27  ;;  %v10363_v40 = vrot.slane %v5494_v55, 4  ;;  %v7150_v38 = vld [vmem:[%s8511_s27 + $0xcc] sm:$0xf]  ;;  %v10391_v49 = vld [vmem:[%s8511_s27 + $0xd0] sm:$0xf] }
 0x17b   : > { %7841 = vmatmul.mubr.msk.bf16.gmra.mrb[8].mxu1 %vm741_vm4, %v11032_v5  ;;  %v10365_v29 = vrot.slane %v5497_v34, 5  ;;  %v10367_v36 = vrot.slane %v5503_v57, 5  ;;  %v2452_v3 = vrot.slane %v2450_v33, 4  ;;  %v2455_v51 = vrot.slane %v2453_v25, 5 }
 0x17c   : > { %7844 = vmatprep.mubr.msk.bf16.mxu1 %vm741_vm4, %v10160_v35  ;;  %v2442_v35 = vor.u32 %v2441_v1, %v10314_v11  ;;  %v10375_v15 = vrot.slane %v2459_v37, 5  ;;  %v2438_v62 = vsel %vm8523_vm3, %v10340_v58, %v10314_v11  ;;  %v5509_v13 = vrot.slane %v5507_v60, 4 }
 0x17d   : > { %v5513_v1 = vshll.u32 %v10344_v12, 16  ;;  %v5521_v5 = vshll.u32 %v7147_v48, 16  ;;  %v5527_v47 = vshll.u32 %v10357_v41, 16  ;;  %v5531_v59 = vshrl.u32 %v10357_v41, 16 }
 0x17e   : > { %v2443_v63 = vrot.slane %v2442_v35, 4  ;;  %v2474_v11 = vshrl.u32 %v6759_v54, 16  ;;  %v2477_v39 = vshll.u32 %v6759_v54, 16  ;;  %v2483_v27 = vshll.u32 %v10378_v18, 16 }
 0x17f   : > { %v2487_v55 = vshrl.u32 %v10378_v18, 16  ;;  %v2456_v34 = vor.u32 %v2455_v51, %v2452_v3  ;;  %v2469_v33 = vshll.u32 %v10370_v26, 16  ;;  %v5542_v25 = vshrl.u32 %v7150_v38, 16 }
 0x180   : > { %7641 = vmatmul.mubr.msk.bf16.gmra.mrb[12].mxu0 %vm741_vm4, %v10172_v6  ;;  %v2465_v6 = vrot.slane %v2463_v23, 4  ;;  %v5545_v37 = vshll.u32 %v7150_v38, 16  ;;  %v5551_v23 = vshll.u32 %v10391_v49, 16  ;;  %v5523_v35 = vrot.slane %v5521_v5, 5  ;;  %v10421_v5 = vld [vmem:[%s8511_s27 + $0xc8] sm:$0x1] }
 0x181   : > { %7644 = vmatprep.mubr.msk.bf16.mxu0 %vm741_vm4, %v10178_v22  ;;  %v5518_v22 = vshrl.u32 %v7147_v48, 16  ;;  %v10403_v60 = vrot.slane %v5527_v47, 5  ;;  %v5533_v48 = vrot.slane %v5531_v59, 4  ;;  %v2479_v54 = vrot.slane %v2477_v39, 5 }
 0x182   : > { %v2466_v57 = vor.u32 %v2465_v6, %v10375_v15  ;;  %v10410_v3 = vrot.slane %v2483_v27, 5  ;;  %v2489_v51 = vrot.slane %v2487_v55, 4  ;;  %v2448_v6 = vsel %vm8523_vm3, %v2443_v63, %v10353_v61  ;;  %v10429_v63 = vld [vmem:[%s8511_s27 + $0xd4] sm:$0x1] }
 0x183   : > { %7845 = vmatmul.mubr.msk.bf16.gmra.mrb[12].mxu1 %vm741_vm4, %v10176_v17  ;;  %v5500_v17 = vor.u32 %v10365_v29, %v10363_v40  ;;  %v5520_v58 = vrot.slane %v5518_v22, 4  ;;  %v10408_v40 = vld [vmem:[%s8511_s27 + $0xc8] sm:$0x1]  ;;  %v2476_v29 = vrot.slane %v2474_v11, 4  ;;  %v5510_v38 = vor.u32 %v5509_v13, %v10367_v36 }
 0x184   : > { %7848 = vmatprep.mubr.msk.bf16.mxu1 %vm741_vm4, %v10180_v44  ;;  %v5555_v44 = vshrl.u32 %v10391_v49, 16  ;;  %v10418_v22 = vrot.slane %v5513_v1, 5  ;;  %v5544_v47 = vrot.slane %v5542_v25, 4  ;;  %v5547_v59 = vrot.slane %v5545_v37, 5  ;;  %v8380_v37 = vld [vmem:[%s8511_s27 + $0x10] sm:$0xf] }
 0x185   : > { %v10423_v11 = vrot.slane %v5551_v23, 5  ;;  %v2471_v27 = vrot.slane %v2469_v33, 5  ;;  %v5524_v55 = vor.u32 %v5523_v35, %v5520_v58  ;;  %v5537_v61 = vshll.u32 %v10408_v40, 16 }
 0x186   : > { %v5557_v39 = vrot.slane %v5555_v44, 4  ;;  %v5534_v13 = vor.u32 %v5533_v48, %v10403_v60  ;;  %v2480_v1 = vor.u32 %v2479_v54, %v2476_v29  ;;  %v2493_v25 = vshll.u32 %v10421_v5, 16  ;;  %v6795_v48 = vld [vmem:[%s8511_s27 + $0xc] sm:$0xe]  ;;  %v8381_v54 = vld [vmem:[%s8511_s27 + $0x1c] sm:$0xf] }
 0x187   : > { %v5511_v33 = vrot.slane %v5510_v38, 4  ;;  %v2857_v23 = vrot.slane %v8380_v37, 5  ;;  %v5548_v58 = vor.u32 %v5547_v59, %v5544_v47  ;;  %v5561_v35 = vshll.u32 %v10429_v63, 16  ;;  %v7186_v47 = vld [vmem:[%s8511_s27 + $0x18] sm:$0xe] }
 0x188   : > { %7645 = vmatmul.mubr.msk.bf16.gmra.mrb[16].mxu0 %vm741_vm4, %v10182_v56  ;;  %v2457_v56 = vrot.slane %v2456_v34, 4  ;;  %v2490_v34 = vor.u32 %v2489_v51, %v10410_v3  ;;  %v5925_v51 = vrot.slane %v8381_v54, 5 }
 0x189   : > { %7648 = vmatprep.mubr.msk.bf16.mxu0 %vm741_vm4, %v10287_v0  ;;  %v2467_v0 = vrot.slane %v2466_v57, 4  ;;  %v5501_v57 = vrot.slane %v5500_v17, 4  ;;  %v5539_v17 = vrot.slane %v5537_v61, 5  ;;  %v5549_v61 = vrot.slane %v5548_v58, 4  ;;  %v10783_v58 = vld [vmem:[%s10993_s2] ss:$0 sm:$0xff] }
 0x18a   : > { %v2462_v44 = vsel %vm8523_vm3, %v2457_v56, %v10375_v15  ;;  %v2481_v15 = vrot.slane %v2480_v1, 4  ;;  %v2491_v38 = vrot.slane %v2490_v34, 4  ;;  %v2495_v56 = vrot.slane %v2493_v25, 5  ;;  %v6796_v34 = vld [vmem:[%s8511_s27 + $0x18] sm:$0xe] }
 0x18b   : > { %7849 = vmatmul.mubr.msk.bf16.gmra.mrb[16].mxu1 %vm741_vm4, %v10188_v46  ;;  %v6776_v46 = vcombine.low %v2438_v62, %v2448_v6  ;;  %v2472_v29 = vsel %vm8523_vm3, %v2467_v0, %v2471_v27  ;;  %v5525_v62 = vrot.slane %v5524_v55, 4  ;;  %v5535_v6 = vrot.slane %v5534_v13, 4  ;;  %v8382_v27 = vld [vmem:[%s8511_s27 + $0x14] sm:$0x1] }
 0x18c   : > { %7852 = vmatprep.mubr.msk.bf16.mxu1 %vm741_vm4, %v10338_v20  ;;  %v5558_v20 = vor.u32 %v5557_v39, %v10423_v11  ;;  %v5506_v59 = vsel %vm8523_vm3, %v5501_v57, %v10367_v36  ;;  %v6812_v39 = vrot.slane %v6795_v48, 9  ;;  %v2859_v0 = vrot.slane %v2857_v23, 4  ;;  %v8383_v57 = vld [vmem:[%s8511_s27 + $0x20] sm:$0x1] }
 0x18d   : > { %v2860_v55 = vrot.slane %v8382_v27, 5  ;;  %v5563_v1 = vrot.slane %v5561_v35, 5  ;;  %v7203_v25 = vrot.slane %v7186_v47, 9  ;;  %v5927_v36 = vrot.slane %v5925_v51, 4  ;;  %v8384_v35 = vld [vmem:[%s8511_s27 + $0x1c] sm:$0xf] }
 0x18e   : > { %v5559_v13 = vrot.slane %v5558_v20, 4  ;;  %v5928_v37 = vrot.slane %v8383_v57, 5  ;;  %v10476_v20 = vsel %vm9117_vm7, %v6812_v39, %v2857_v23  ;;  %v2864_v48 = vrot.slane %v8384_v35, 5  ;;  %v8386_v39 = vld [vmem:[%s8511_s27 + $0x28] sm:$0xf] }
 0x18f   : > { %v6026_v57 = vrot.slane %v10408_v40, 5 }
 0x190   : > { %7649 = vmatmul.mubr.msk.bf16.gmra.mrb[20].mxu0 %vm741_vm4, %v10347_v21  ;;  %v5516_v21 = vsel %vm8523_vm3, %v5511_v33, %v10418_v22  ;;  %v5530_v22 = vsel %vm8523_vm3, %v5525_v62, %v10403_v60  ;;  %v5540_v33 = vsel %vm8523_vm3, %v5535_v6, %v5539_v17  ;;  %v6813_v60 = vrot.slane %v6796_v34, 9 }
 0x191   : > { %7652 = vmatprep.mubr.msk.bf16.mxu0 %vm741_vm4, %v10351_v10  ;;  %v6777_v10 = vcombine.low %v2462_v44, %v2472_v29  ;;  %v2496_v44 = vsel %vm8523_vm3, %v2491_v38, %v2495_v56  ;;  %v10484_v29 = vld [vmem:[%s8511_s27 + $0x24] sm:$0xe]  ;;  %v5554_v62 = vsel %vm8523_vm3, %v5549_v61, %v10423_v11  ;;  %v5564_v23 = vsel %vm8523_vm3, %v5559_v13, %v5563_v1  ;;  %v7200_v56 = vld [vmem:[%s8511_s27 + $0xc0] sm:$0xe]  ;;  %v8385_v11 = vld [vmem:[%s8511_s27 + $0x20] sm:$0x1] }
 0x192   : > { %v7168_v17 = vcombine.low %v5530_v22, %v5540_v33  ;;  %v10493_v6 = vsel %vm9117_vm7, %v7203_v25, %v5925_v51  ;;  %v6797_v38 = vld [vmem:[%s8511_s27 + $0x24] sm:$0xe]  ;;  %v2867_v47 = vrot.slane %v8385_v11, 5  ;;  %v2871_v51 = vrot.slane %v8386_v39, 5  ;;  %v8388_v1 = vld [vmem:[%s8511_s27 + $0x2c] sm:$0x1] }
 0x193   : > { %7853 = vmatmul.mubr.msk.bf16.gmra.mrb[20].mxu1 %vm741_vm4, %v10349_v50  ;;  %v2486_v50 = vsel %vm8523_vm3, %v2481_v15, %v10410_v3  ;;  %v7167_v3 = vcombine.low %v5506_v59, %v5516_v21  ;;  %v10497_v15 = vsel %vm9117_vm7, %v5927_v36, %v5928_v37  ;;  %v7204_v59 = vrot.slane %v10484_v29, 9  ;;  %v7201_v33 = vld [vmem:[%s8511_s27 + $0xcc] sm:$0xe]  ;;  %v7188_v29 = vld [vmem:[%s8511_s27 + $0x30] sm:$0xe] }
 0x194   : > { %7856 = vmatprep.mubr.msk.bf16.mxu1 %vm741_vm4, %v10361_v16  ;;  %v10480_v16 = vsel %vm9117_vm7, %v2859_v0, %v2860_v55  ;;  %v6778_v54 = vcombine.low %v2486_v50, %v2496_v44  ;;  %v6810_v0 = vld [vmem:[%s8511_s27 + $0xc0] sm:$0xe]  ;;  %v7169_v27 = vcombine.low %v5554_v62, %v5564_v23  ;;  %v10511_v55 = vsel %vm9117_vm7, %v6813_v60, %v2864_v48  ;;  %v8389_v44 = vld [vmem:[%s8511_s27 + $0x2c] sm:$0x1]  ;;  %v8390_v60 = vld [vmem:[%s8511_s27 + $0x34] sm:$0xf] }
 0x195   : > { %v6828_v31 = vcombine.low %v10476_v20, %v10480_v16  ;;  %v2866_v21 = vrot.slane %v2864_v48, 4  ;;  %v7219_v13 = vcombine.low %v10493_v6, %v10497_v15  ;;  %v5935_v34 = vrot.slane %v8388_v1, 5  ;;  %v8391_v11 = vld [vmem:[%s8511_s27 + $0x34] sm:$0xf] }
 0x196   : > { %v7217_v25 = vrot.slane %v7200_v56, 9  ;;  %v6023_v36 = vrot.slane %v10357_v41, 5  ;;  %v6827_v37 = vrot.slane %v6810_v0, 9  ;;  %v2962_v22 = vrot.slane %v10378_v18, 5  ;;  %v6798_v56 = vld [vmem:[%s8511_s27 + $0x30] sm:$0xe] }
 0x197   : > { %v2873_v50 = vrot.slane %v2871_v51, 4  ;;  %v2874_v20 = vrot.slane %v8389_v44, 5  ;;  %v5939_v35 = vrot.slane %v8390_v60, 5  ;;  %v2965_v48 = vrot.slane %v10421_v5, 5 }
 0x198   : > { %7653 = vmatmul.mubr.msk.bf16.gmra.mrb[24].mxu0 %vm741_vm4, %v6776_v46  ;;  %v8387_v46 = vld [vmem:[%s8511_s27 + $0x28] sm:$0xf]  ;;  %v10526_v16 = vsel %vm9117_vm7, %v7217_v25, %v6023_v36  ;;  %v6025_v41 = vrot.slane %v6023_v36, 4  ;;  %v10531_v40 = vsel %vm9117_vm7, %v6827_v37, %v2962_v22  ;;  %v2964_v18 = vrot.slane %v2962_v22, 4  ;;  %v8393_v36 = vld [vmem:[%s8511_s27 + $0x40] sm:$0xf] }
 0x199   : > { %7656 = vmatprep.mubr.msk.bf16.mxu0 %vm741_vm4, %v6777_v10  ;;  %v5932_v61 = vrot.slane %v8387_v46, 5  ;;  %v6814_v10 = vrot.slane %v6797_v38, 9  ;;  %v7218_v62 = vrot.slane %v7201_v33, 9  ;;  %v6030_v23 = vrot.slane %v10391_v49, 5  ;;  %v8392_v46 = vld [vmem:[%s8511_s27 + $0x38] sm:$0x1] }
 0x19a   : > { %v2868_v6 = vsel %vm9117_vm7, %v2866_v21, %v2867_v47  ;;  %v10547_v5 = vsel %vm9117_vm7, %v2964_v18, %v2965_v48  ;;  %v2878_v49 = vrot.slane %v8391_v11, 5  ;;  %v7205_v0 = vrot.slane %v7188_v29, 9  ;;  %v8396_v48 = vld [vmem:[%s8511_s27 + $0x4c] sm:$0xf]  ;;  %v8398_v11 = vld [vmem:[%s8511_s27 + $0x44] sm:$0x1] }
 0x19b   : > { %7857 = vmatmul.mubr.msk.bf16.gmra.mrb[24].mxu1 %vm741_vm4, %v7167_v3  ;;  %v10537_v3 = vsel %vm9117_vm7, %v6025_v41, %v6026_v57  ;;  %v5934_v15 = vrot.slane %v5932_v61, 4  ;;  %v10556_v47 = vsel %vm9117_vm7, %v7218_v62, %v6030_v23  ;;  %v6032_v39 = vrot.slane %v6030_v23, 4  ;;  %v8395_v41 = vld [vmem:[%s8511_s27 + $0x40] sm:$0xf]  ;;  %v8397_v62 = vld [vmem:[%s8511_s27 + $0x44] sm:$0x1] }
 0x19c   : > { %7860 = vmatprep.mubr.msk.bf16.mxu1 %vm741_vm4, %v7168_v17  ;;  %v6033_v17 = vrot.slane %v10429_v63, 5  ;;  %v7233_v38 = vcombine.low %v10526_v16, %v10537_v3  ;;  %v6843_v63 = vcombine.low %v10531_v40, %v10547_v5  ;;  %v5941_v21 = vrot.slane %v5939_v35, 4 }
 0x19d   : > { %v5942_v1 = vrot.slane %v8392_v46, 5  ;;  %v2875_v25 = vsel %vm9117_vm7, %v2873_v50, %v2874_v20  ;;  %v2885_v57 = vrot.slane %v8393_v36, 5  ;;  %v5933_v22 = vsel %vm9117_vm7, %v7204_v59, %v5932_v61  ;;  %v6800_v46 = vld [vmem:[%s8511_s27 + $0x48] sm:$0xe]  ;;  %v8400_v36 = vld [vmem:[%s8511_s27 + $0x50] sm:$0x1] }
 0x19e   : > { %v10567_v37 = vsel %vm9117_vm7, %v6032_v39, %v6033_v17  ;;  %v5936_v50 = vsel %vm9117_vm7, %v5934_v15, %v5935_v34  ;;  %v2880_v44 = vrot.slane %v2878_v49, 4  ;;  %v5946_v60 = vrot.slane %v8395_v41, 5  ;;  %v7190_v17 = vld [vmem:[%s8511_s27 + $0x48] sm:$0xe] }
 0x19f   : > { %v7234_v33 = vcombine.low %v10556_v47, %v10567_v37  ;;  %v5940_v61 = vsel %vm9117_vm7, %v7205_v0, %v5939_v35  ;;  %v5943_v18 = vsel %vm9117_vm7, %v5941_v21, %v5942_v1  ;;  %v2887_v29 = vrot.slane %v2885_v57, 4  ;;  %v8399_v1 = vld [vmem:[%s8511_s27 + $0x4c] sm:$0xf] }
 0x1a0   : > { %7657 = vmatmul.mubr.msk.bf16.gmra.mrb[28].mxu0 %vm741_vm4, %v6778_v54  ;;  %v2872_v54 = vsel %vm9117_vm7, %v6814_v10, %v2871_v51  ;;  %v6815_v51 = vrot.slane %v6798_v56, 9  ;;  %v6799_v10 = vld [vmem:[%s8511_s27 + $0x3c] sm:$0xe]  ;;  %v2888_v23 = vrot.slane %v8397_v62, 5  ;;  %v5949_v35 = vrot.slane %v8398_v11, 5 }
 0x1a1   : > { %7662 = vmatprep.mubr.msk.bf16.mxu0 %vm741_vm4, %v6828_v31  ;;  %v6829_v31 = vcombine.low %v10511_v55, %v2868_v6  ;;  %v7189_v55 = vld [vmem:[%s8511_s27 + $0x3c] sm:$0xe]  ;;  %v6830_v59 = vcombine.low %v2872_v54, %v2875_v25  ;;  %v6816_v34 = vrot.slane %v6799_v10, 9  ;;  %v7220_v6 = vcombine.low %v5933_v22, %v5936_v50  ;;  %v8401_v10 = vld [vmem:[%s8511_s27 + $0x58] sm:$0xf] }
 0x1a2   : > { %v2879_v15 = vsel %vm9117_vm7, %v6815_v51, %v2878_v49  ;;  %v7206_v56 = vrot.slane %v7189_v55, 9  ;;  %v7221_v39 = vcombine.low %v5940_v61, %v5943_v18  ;;  %v5948_v21 = vrot.slane %v5946_v60, 4  ;;  %v6801_v55 = vld [vmem:[%s8511_s27 + $0x54] sm:$0xe] }
 0x1a3   : > { %7861 = vmatmul.mubr.msk.bf16.gmra.mrb[28].mxu1 %vm741_vm4, %v7169_v27  ;;  %v8394_v27 = vld [vmem:[%s8511_s27 + $0x38] sm:$0x1]  ;;  %v2892_v54 = vrot.slane %v8399_v1, 5  ;;  %v7207_v25 = vrot.slane %v7190_v17, 9  ;;  %v5956_v22 = vrot.slane %v8400_v36, 5  ;;  %v2889_v51 = vsel %vm9117_vm7, %v2887_v29, %v2888_v23 }
 0x1a4   : > { %7866 = vmatprep.mubr.msk.bf16.mxu1 %vm741_vm4, %v7219_v13  ;;  %v2881_v20 = vrot.slane %v8394_v27, 5  ;;  %v5953_v13 = vrot.slane %v8396_v48, 5  ;;  %v2899_v50 = vrot.slane %v8401_v10, 5  ;;  %v5947_v27 = vsel %vm9117_vm7, %v7206_v56, %v5946_v60  ;;  %v7191_v18 = vld [vmem:[%s8511_s27 + $0x54] sm:$0xe] }
 0x1a5   : > { %v2894_v41 = vrot.slane %v2892_v54, 4  ;;  %v8403_v48 = vld [vmem:[%s8511_s27 + $0x58] sm:$0xf]  ;;  %v8404_v23 = vld [vmem:[%s8511_s27 + $0x64] sm:$0xf] }
 0x1a6   : > { %v2882_v0 = vsel %vm9117_vm7, %v2880_v44, %v2881_v20  ;;  %v5955_v49 = vrot.slane %v5953_v13, 4  ;;  %v6817_v20 = vrot.slane %v6800_v46, 9  ;;  %v5954_v60 = vsel %vm9117_vm7, %v7207_v25, %v5953_v13  ;;  %v8405_v56 = vld [vmem:[%s8511_s27 + $0x5c] sm:$0x1]  ;;  %v6802_v36 = vld [vmem:[%s8511_s27 + $0x60] sm:$0xe] }
 0x1a7   : > { %v6831_v44 = vcombine.low %v2879_v15, %v2882_v0  ;;  %v5967_v17 = vrot.slane %v8404_v23, 5  ;;  %v2901_v15 = vrot.slane %v2899_v50, 4  ;;  %v2902_v11 = vrot.slane %v8405_v56, 5  ;;  %v8406_v46 = vld [vmem:[%s8511_s27 + $0x5c] sm:$0x1] }
 0x1a8   : > { %7663 = vmatmul.mubr.msk.bf16.vlgmr.msra.gmra.mrb[0].mxu0 %vm741_vm4, %v6829_v31  ;;  %v2886_v31 = vsel %vm9117_vm7, %v6816_v34, %v2885_v57  ;;  %v5950_v57 = vsel %vm9117_vm7, %v5948_v21, %v5949_v35  ;;  %v5960_v34 = vrot.slane %v8403_v48, 5  ;;  %v5957_v62 = vsel %vm9117_vm7, %v5955_v49, %v5956_v22  ;;  %v7192_v35 = vld [vmem:[%s8511_s27 + $0x60] sm:$0xe]  ;;  %v8407_v22 = vld [vmem:[%s8511_s27 + $0x64] sm:$0xf] }
 0x1a9   : > { %7666 = vmatprep.mubr.msk.bf16.mxu0 %vm741_vm4, %v6830_v59  ;;  %v8402_v59 = vld [vmem:[%s8511_s27 + $0x50] sm:$0x1]  ;;  %v6832_v29 = vcombine.low %v2886_v31, %v2889_v51  ;;  %v2893_v0 = vsel %vm9117_vm7, %v6817_v20, %v2892_v54  ;;  %v7208_v21 = vrot.slane %v7191_v18, 9  ;;  %v5963_v13 = vrot.slane %v8406_v46, 5  ;;  %v8408_v10 = vld [vmem:[%s8511_s27 + $0x68] sm:$0x1] }
 0x1aa   : > { %v2895_v61 = vrot.slane %v8402_v59, 5  ;;  %v7223_v1 = vcombine.low %v5954_v60, %v5957_v62  ;;  %v5962_v49 = vrot.slane %v5960_v34, 4  ;;  %v2906_v31 = vrot.slane %v8407_v22, 5  ;;  %v6803_v18 = vld [vmem:[%s8511_s27 + $0x6c] sm:$0xe] }
 0x1ab   : > { %7867 = vmatmul.mubr.msk.bf16.vlgmr.msra.gmra.mrb[0].mxu1 %vm741_vm4, %v7220_v6  ;;  %v6818_v6 = vrot.slane %v6801_v55, 9  ;;  %v7209_v51 = vrot.slane %v7192_v35, 9  ;;  %v5969_v54 = vrot.slane %v5967_v17, 4  ;;  %v2903_v20 = vsel %vm9117_vm7, %v2901_v15, %v2902_v11  ;;  %v8409_v55 = vld [vmem:[%s8511_s27 + $0x70] sm:$0xf] }
 0x1ac   : > { %7870 = vmatprep.mubr.msk.bf16.mxu1 %vm741_vm4, %v7221_v39  ;;  %v7222_v39 = vcombine.low %v5947_v27, %v5950_v57  ;;  %v2896_v25 = vsel %vm9117_vm7, %v2894_v41, %v2895_v61  ;;  %v5970_v27 = vrot.slane %v8408_v10, 5  ;;  %v2913_v57 = vrot.slane %v8409_v55, 5  ;;  %v7193_v62 = vld [vmem:[%s8511_s27 + $0x6c] sm:$0xe]  ;;  %v8411_v23 = vld [vmem:[%s8511_s27 + $0x70] sm:$0xf] }
 0x1ad   : > { %v6833_v41 = vcombine.low %v2893_v0, %v2896_v25  ;;  %v5961_v59 = vsel %vm9117_vm7, %v7208_v21, %v5960_v34  ;;  %v6819_v61 = vrot.slane %v6802_v36, 9  ;;  %v2908_v48 = vrot.slane %v2906_v31, 4  ;;  %v8412_v11 = vld [vmem:[%s8511_s27 + $0x7c] sm:$0xf]  ;;  %v11034_v21 = vld [vmem:[#allocation4_spill] sm:$0xff] }
 0x1ae   : > { %v5968_v56 = vsel %vm9117_vm7, %v7209_v51, %v5967_v17  ;;  %v5971_v34 = vsel %vm9117_vm7, %v5969_v54, %v5970_v27  ;;  %v5981_v35 = vrot.slane %v8412_v11, 5  ;;  %v2915_v0 = vrot.slane %v2913_v57, 4  ;;  %v8413_v36 = vld [vmem:[%s8511_s27 + $0x74] sm:$0x1]  ;;  %v6804_v10 = vld [vmem:[%s8511_s27 + $0x78] sm:$0xe] }
 0x1af   : > { %v2916_v46 = vrot.slane %v11034_v21, 5  ;;  %v2907_v25 = vsel %vm9117_vm7, %v6819_v61, %v2906_v31  ;;  %v5977_v17 = vrot.slane %v8413_v36, 5  ;;  %v7225_v22 = vcombine.low %v5968_v56, %v5971_v34  ;;  %v8414_v27 = vld [vmem:[%s8511_s27 + $0x7c] sm:$0xf]  ;;  %v8415_v31 = vld [vmem:[%s8511_s27 + $0x80] sm:$0x1] }
 0x1b0   : > { %7667 = vmatmul.mubr.msk.bf16.gmra.mrb[4].mxu0 %vm741_vm4, %v6831_v44  ;;  %v2900_v44 = vsel %vm9117_vm7, %v6818_v6, %v2899_v50  ;;  %v5964_v50 = vsel %vm9117_vm7, %v5962_v49, %v5963_v13  ;;  %v5974_v6 = vrot.slane %v8411_v23, 5  ;;  %v7194_v13 = vld [vmem:[%s8511_s27 + $0x78] sm:$0xe]  ;;  %v7210_v49 = vrot.slane %v7193_v62, 9  ;;  %v8416_v23 = vld [vmem:[%s8511_s27 + $0x80] sm:$0x1] }
 0x1b1   : > { %7670 = vmatprep.mubr.msk.bf16.mxu0 %vm741_vm4, %v6832_v29  ;;  %v8410_v29 = vld [vmem:[%s8511_s27 + $0x68] sm:$0x1]  ;;  %v6834_v15 = vcombine.low %v2900_v44, %v2903_v20  ;;  %v2920_v44 = vrot.slane %v8414_v27, 5  ;;  %v7211_v20 = vrot.slane %v7194_v13, 9  ;;  %v5983_v55 = vrot.slane %v5981_v35, 4 }
 0x1b2   : > { %v2909_v60 = vrot.slane %v8410_v29, 5  ;;  %v5976_v54 = vrot.slane %v5974_v6, 4  ;;  %v2917_v61 = vsel %vm9117_vm7, %v2915_v0, %v2916_v46  ;;  %v6821_v29 = vrot.slane %v6804_v10, 9  ;;  %v7195_v56 = vld [vmem:[%s8511_s27 + $0x84] sm:$0xe] }
 0x1b3   : > { %7871 = vmatmul.mubr.msk.bf16.gmra.mrb[4].mxu1 %vm741_vm4, %v7222_v39  ;;  %v6820_v39 = vrot.slane %v6803_v18, 9  ;;  %v2927_v18 = vrot.slane %v10079_v7, 5  ;;  %v8417_v7 = vld [vmem:[%s8511_s27 + $0x88] sm:$0xf]  ;;  %v5995_v0 = vrot.slane %v10101_v42, 5  ;;  %v2930_v13 = vrot.slane %v10095_v30, 5 }
 0x1b4   : > { %7874 = vmatprep.mubr.msk.bf16.mxu1 %vm741_vm4, %v7223_v1  ;;  %v7224_v1 = vcombine.low %v5961_v59, %v5964_v50  ;;  %v2910_v51 = vsel %vm9117_vm7, %v2908_v48, %v2909_v60  ;;  %v5984_v59 = vrot.slane %v8415_v31, 5  ;;  %v5975_v48 = vsel %vm9117_vm7, %v7210_v49, %v5974_v6  ;;  %v6805_v60 = vld [vmem:[%s8511_s27 + $0x84] sm:$0xe] }
 0x1b5   : > { %v6835_v50 = vcombine.low %v2907_v25, %v2910_v51  ;;  %v5978_v62 = vsel %vm9117_vm7, %v5976_v54, %v5977_v17  ;;  %v5988_v34 = vrot.slane %v8417_v7, 5  ;;  %v6822_v21 = vrot.slane %v6805_v60, 9  ;;  %v8418_v17 = vld [vmem:[%s8511_s27 + $0x8c] sm:$0x1]  ;;  %v6806_v54 = vld [vmem:[%s8511_s27 + $0x90] sm:$0xe] }
 0x1b6   : > { %v5985_v6 = vsel %vm9117_vm7, %v5983_v55, %v5984_v59  ;;  %v2929_v46 = vrot.slane %v2927_v18, 4  ;;  %v7226_v25 = vcombine.low %v5975_v48, %v5978_v62  ;;  %v2921_v49 = vsel %vm9117_vm7, %v6821_v29, %v2920_v44  ;;  %v7197_v48 = vld [vmem:[%s8511_s27 + $0x9c] sm:$0xe] }
 0x1b7   : > { %v7212_v36 = vrot.slane %v7195_v56, 9  ;;  %v5990_v42 = vrot.slane %v5988_v34, 4  ;;  %v2934_v10 = vrot.slane %v10185_v24, 5  ;;  %v5997_v27 = vrot.slane %v5995_v0, 4 }
 0x1b8   : > { %7671 = vmatmul.mubr.msk.bf16.gmra.mrb[8].mxu0 %vm741_vm4, %v6833_v41  ;;  %v2914_v41 = vsel %vm9117_vm7, %v6820_v39, %v2913_v57  ;;  %v2922_v57 = vrot.slane %v2920_v44, 4  ;;  %v5982_v39 = vsel %vm9117_vm7, %v7211_v20, %v5981_v35  ;;  %v5998_v44 = vrot.slane %v10130_v53, 5 }
 0x1b9   : > { %7674 = vmatprep.mubr.msk.bf16.mxu0 %vm741_vm4, %v6834_v15  ;;  %v2923_v15 = vrot.slane %v8416_v23, 5  ;;  %v6836_v11 = vcombine.low %v2914_v41, %v2917_v61  ;;  %v7227_v35 = vcombine.low %v5982_v39, %v5985_v6  ;;  %v2928_v20 = vsel %vm9117_vm7, %v6822_v21, %v2927_v18  ;;  %v6807_v61 = vld [vmem:[%s8511_s27 + $0x9c] sm:$0xe] }
 0x1ba   : > { %v2931_v55 = vsel %vm9117_vm7, %v2929_v46, %v2930_v13  ;;  %v2941_v31 = vrot.slane %v10207_v14, 5  ;;  %v5989_v24 = vsel %vm9117_vm7, %v7212_v36, %v5988_v34  ;;  %v6823_v41 = vrot.slane %v6806_v54, 9  ;;  %v6808_v46 = vld [vmem:[%s8511_s27 + $0xa8] sm:$0xe] }
 0x1bb   : > { %7875 = vmatmul.mubr.msk.bf16.gmra.mrb[8].mxu1 %vm741_vm4, %v7224_v1  ;;  %v7196_v1 = vld [vmem:[%s8511_s27 + $0x90] sm:$0xe]  ;;  %v2924_v51 = vsel %vm9117_vm7, %v2922_v57, %v2923_v15  ;;  %v2936_v18 = vrot.slane %v2934_v10, 4  ;;  %v6002_v29 = vrot.slane %v10193_v45, 5  ;;  %v6838_v14 = vcombine.low %v2928_v20, %v2931_v55  ;;  %v7198_v57 = vld [vmem:[%s8511_s27 + $0xa8] sm:$0xe] }
 0x1bc   : > { %7878 = vmatprep.mubr.msk.bf16.mxu1 %vm741_vm4, %v7225_v22  ;;  %v5991_v22 = vrot.slane %v8418_v17, 5  ;;  %v7213_v30 = vrot.slane %v7196_v1, 9  ;;  %v6837_v59 = vcombine.low %v2921_v49, %v2924_v51  ;;  %v5999_v62 = vsel %vm9117_vm7, %v5997_v27, %v5998_v44  ;;  %v6809_v17 = vld [vmem:[%s8511_s27 + $0xb4] sm:$0xe] }
 0x1bd   : > { %v6009_v23 = vrot.slane %v10222_v2, 5  ;;  %v6824_v15 = vrot.slane %v6807_v61, 9  ;;  %v2943_v56 = vrot.slane %v2941_v31, 4  ;;  %v2944_v7 = vrot.slane %v10255_v52, 5 }
 0x1be   : > { %v5992_v53 = vsel %vm9117_vm7, %v5990_v42, %v5991_v22  ;;  %v5996_v60 = vsel %vm9117_vm7, %v7213_v30, %v5995_v0  ;;  %v7214_v45 = vrot.slane %v7197_v48, 9  ;;  %v6004_v2 = vrot.slane %v6002_v29, 4 }
 0x1bf   : > { %v7228_v34 = vcombine.low %v5989_v24, %v5992_v53  ;;  %v7229_v39 = vcombine.low %v5996_v60, %v5999_v62  ;;  %v7215_v0 = vrot.slane %v7198_v57, 9  ;;  %v6011_v21 = vrot.slane %v6009_v23, 4 }
 0x1c0   : > { %7675 = vmatmul.mubr.msk.bf16.gmra.mrb[12].mxu0 %vm741_vm4, %v6835_v50  ;;  %v2937_v50 = vrot.slane %v10236_v32, 5  ;;  %v2935_v32 = vsel %vm9117_vm7, %v6823_v41, %v2934_v10  ;;  %v6012_v52 = vrot.slane %v10265_v8, 5  ;;  %v2948_v13 = vrot.slane %v10272_v43, 5  ;;  %v7199_v10 = vld [vmem:[%s8511_s27 + $0xb4] sm:$0xe] }
 0x1c1   : > { %7678 = vmatprep.mubr.msk.bf16.mxu0 %vm741_vm4, %v6836_v11  ;;  %v6005_v11 = vrot.slane %v10246_v28, 5  ;;  %v2942_v28 = vsel %vm9117_vm7, %v6824_v15, %v2941_v31  ;;  %v2945_v1 = vsel %vm9117_vm7, %v2943_v56, %v2944_v7  ;;  %v6003_v36 = vsel %vm9117_vm7, %v7214_v45, %v6002_v29 }
 0x1c2   : > { %v2938_v6 = vsel %vm9117_vm7, %v2936_v18, %v2937_v50  ;;  %v6010_v43 = vsel %vm9117_vm7, %v7215_v0, %v6009_v23  ;;  %v6825_v22 = vrot.slane %v6808_v46, 9  ;;  %v6840_v51 = vcombine.low %v2942_v28, %v2945_v1 }
 0x1c3   : > { %7879 = vmatmul.mubr.msk.bf16.gmra.mrb[12].mxu1 %vm741_vm4, %v7226_v25  ;;  %v2955_v25 = vrot.slane %v10318_v9, 5  ;;  %v6839_v49 = vcombine.low %v2935_v32, %v2938_v6  ;;  %v6006_v8 = vsel %vm9117_vm7, %v6004_v2, %v6005_v11  ;;  %v6013_v9 = vsel %vm9117_vm7, %v6011_v21, %v6012_v52 }
 0x1c4   : > { %7882 = vmatprep.mubr.msk.bf16.mxu1 %vm741_vm4, %v7227_v35  ;;  %v6016_v35 = vrot.slane %v10310_v19, 5  ;;  %v2950_v42 = vrot.slane %v2948_v13, 4  ;;  %v2951_v54 = vrot.slane %v10293_v4, 5  ;;  %v6826_v30 = vrot.slane %v6809_v17, 9 }
 0x1c5   : > { %v2957_v27 = vrot.slane %v2955_v25, 4  ;;  %v2958_v44 = vrot.slane %v10370_v26, 5  ;;  %v7230_v20 = vcombine.low %v6003_v36, %v6006_v8  ;;  %v7231_v55 = vcombine.low %v6010_v43, %v6013_v9 }
 0x1c6   : > { %v7216_v31 = vrot.slane %v7199_v10, 9  ;;  %v6019_v19 = vrot.slane %v10344_v12, 5  ;;  %v2949_v24 = vsel %vm9117_vm7, %v6825_v22, %v2948_v13  ;;  %v2952_v4 = vsel %vm9117_vm7, %v2950_v42, %v2951_v54 }
 0x1c7   : > { %v2956_v26 = vsel %vm9117_vm7, %v6826_v30, %v2955_v25  ;;  %v2959_v41 = vsel %vm9117_vm7, %v2957_v27, %v2958_v44  ;;  %v6841_v12 = vcombine.low %v2949_v24, %v2952_v4 }
 0x1c8   : > { %7679 = vmatmul.mubr.msk.bf16.gmra.mrb[16].mxu0 %vm741_vm4, %v6837_v59  ;;  %v6018_v59 = vrot.slane %v6016_v35, 4  ;;  %v6017_v61 = vsel %vm9117_vm7, %v7216_v31, %v6016_v35  ;;  %v6842_v18 = vcombine.low %v2956_v26, %v2959_v41 }
 0x1c9   : > { %7682 = vmatprep.mubr.msk.bf16.mxu0 %vm741_vm4, %v6838_v14 }
 0x1ca   : > { %v6020_v53 = vsel %vm9117_vm7, %v6018_v59, %v6019_v19 }
 0x1cb   : > { %7883 = vmatmul.mubr.msk.bf16.gmra.mrb[16].mxu1 %vm741_vm4, %v7228_v34  ;;  %v7232_v50 = vcombine.low %v6017_v61, %v6020_v53 }
 0x1cc   : > { %7886 = vmatprep.mubr.msk.bf16.mxu1 %vm741_vm4, %v7229_v39 }
 0x1d0   : > { %7683 = vmatmul.mubr.msk.bf16.gmra.mrb[20].mxu0 %vm741_vm4, %v6839_v49 }
 0x1d1   : > { %7686 = vmatprep.mubr.msk.bf16.mxu0 %vm741_vm4, %v6840_v51 }
 0x1d3   : > { %7887 = vmatmul.mubr.msk.bf16.gmra.mrb[20].mxu1 %vm741_vm4, %v7230_v20 }
 0x1d4   : > { %7890 = vmatprep.mubr.msk.bf16.mxu1 %vm741_vm4, %v7231_v55 }
 0x1d8   : > { %7687 = vmatmul.mubr.msk.bf16.gmra.mrb[24].mxu0 %vm741_vm4, %v6841_v12 }
 0x1d9   : > { %7690 = vmatprep.mubr.msk.bf16.mxu0 %vm741_vm4, %v6842_v18 }
 0x1db   : > { %7891 = vmatmul.mubr.msk.bf16.gmra.mrb[24].mxu1 %vm741_vm4, %v7232_v50 }
 0x1dc   : > { %7894 = vmatprep.mubr.msk.bf16.mxu1 %vm741_vm4, %v7233_v38 }
 0x1e0   : > { %7691 = vmatmul.mubr.msk.bf16.gmra.mrb[28].mxu0 %vm741_vm4, %v6843_v63 }
 0x1e3   : > { %7895 = vmatmul.mubr.msk.bf16.gmra.mrb[28].mxu1 %vm741_vm4, %v7234_v33 }
 0x27b   : > { %v7664_v16 = vpop.f32.mrb[0].mxu0 }
 0x27c   : > { %v3267_v40 = vadd.f32 %v7664_v16, %v10783_v58  ;;  %v3100_v3 = vpop.f32.mrb[1].mxu0 }
 0x27d   : > { %v3265_v38 = vadd.f32 %v10783_v58, %v3100_v3  ;;  %v7665_v5 = vpop.f32.mrb[2].mxu0 }
 0x27e   : > { %3300 = vst.msk [vmem:[%s10788_s26 + $0x20] sm:$0xff] %vm3297_vm8, %v3267_v40  ;;  %v7868_v63 = vpop.f32.mrb[0].mxu1  ;;  %v3268_v47 = vadd.f32 %v7665_v5, %v10783_v58  ;;  %v3103_v37 = vpop.f32.mrb[3].mxu0 }
 0x27f   : > { %v6329_v33 = vadd.f32 %v7868_v63, %v10783_v58  ;;  %3298 = vst.msk [vmem:[%s10788_s26] sm:$0xff] %vm3297_vm8, %v3265_v38  ;;  %v6168_v48 = vpop.f32.mrb[1].mxu1  ;;  %v3266_v29 = vadd.f32 %v10783_v58, %v3103_v37 }
 0x280   : > { %v6327_v14 = vadd.f32 %v10783_v58, %v6168_v48  ;;  %3301 = vst.msk [vmem:[%s10788_s26 + $0x28] sm:$0xff] %vm3297_vm8, %v3268_v47  ;;  %v7869_v60 = vpop.f32.mrb[2].mxu1 }
 0x281   : > { %7253 = vst.msk [vmem:[%s10788_s26 + $0x30] sm:$0xff] %vm3297_vm8, %v6329_v33  ;;  %v6330_v62 = vadd.f32 %v7869_v60, %v10783_v58  ;;  %3299 = vst.msk [vmem:[%s10788_s26 + $0x8] sm:$0xff] %vm3297_vm8, %v3266_v29  ;;  %v6171_v57 = vpop.f32.mrb[3].mxu1 }
 0x282   : > { %7251 = vst.msk [vmem:[%s10788_s26 + $0x10] sm:$0xff] %vm3297_vm8, %v6327_v14  ;;  %v6328_v23 = vadd.f32 %v10783_v58, %v6171_v57 }
 0x283   : > { %7254 = vst.msk [vmem:[%s10788_s26 + $0x38] sm:$0xff] %vm3297_vm8, %v6330_v62  ;;  %v7668_v15 = vpop.f32.mrb[4].mxu0 }
 0x284   : > { %7252 = vst.msk [vmem:[%s10788_s26 + $0x18] sm:$0xff] %vm3297_vm8, %v6328_v23  ;;  %v3271_v56 = vadd.f32 %v7668_v15, %v10783_v58  ;;  %v3116_v7 = vpop.f32.mrb[5].mxu0 }
 0x285   : > { %v3269_v34 = vadd.f32 %v10783_v58, %v3116_v7  ;;  %v7669_v32 = vpop.f32.mrb[6].mxu0 }
 0x286   : > { %3304 = vst.msk [vmem:[%s10788_s26 + $0x60] sm:$0xff] %vm3297_vm8, %v3271_v56  ;;  %v7872_v45 = vpop.f32.mrb[4].mxu1  ;;  %v3272_v11 = vadd.f32 %v7669_v32, %v10783_v58  ;;  %v3119_v39 = vpop.f32.mrb[7].mxu0 }
 0x287   : > { %v6333_v6 = vadd.f32 %v7872_v45, %v10783_v58  ;;  %3302 = vst.msk [vmem:[%s10788_s26 + $0x40] sm:$0xff] %vm3297_vm8, %v3269_v34  ;;  %v6184_v2 = vpop.f32.mrb[5].mxu1  ;;  %v3270_v0 = vadd.f32 %v10783_v58, %v3119_v39 }
 0x288   : > { %v6331_v21 = vadd.f32 %v10783_v58, %v6184_v2  ;;  %3305 = vst.msk [vmem:[%s10788_s26 + $0x68] sm:$0xff] %vm3297_vm8, %v3272_v11  ;;  %v7873_v52 = vpop.f32.mrb[6].mxu1 }
 0x289   : > { %7257 = vst.msk [vmem:[%s10788_s26 + $0x70] sm:$0xff] %vm3297_vm8, %v6333_v6  ;;  %v6334_v46 = vadd.f32 %v7873_v52, %v10783_v58  ;;  %3303 = vst.msk [vmem:[%s10788_s26 + $0x48] sm:$0xff] %vm3297_vm8, %v3270_v0  ;;  %v6187_v13 = vpop.f32.mrb[7].mxu1 }
 0x28a   : > { %7255 = vst.msk [vmem:[%s10788_s26 + $0x50] sm:$0xff] %vm3297_vm8, %v6331_v21  ;;  %v6332_v28 = vadd.f32 %v10783_v58, %v6187_v13 }
 0x28b   : > { %7258 = vst.msk [vmem:[%s10788_s26 + $0x78] sm:$0xff] %vm3297_vm8, %v6334_v46  ;;  %v7672_v1 = vpop.f32.mrb[8].mxu0 }
 0x28c   : > { %7256 = vst.msk [vmem:[%s10788_s26 + $0x58] sm:$0xff] %vm3297_vm8, %v6332_v28  ;;  %v3275_v25 = vadd.f32 %v7672_v1, %v10783_v58  ;;  %v3132_v49 = vpop.f32.mrb[9].mxu0 }
 0x28d   : > { %v3273_v36 = vadd.f32 %v10783_v58, %v3132_v49  ;;  %v7673_v17 = vpop.f32.mrb[10].mxu0 }
 0x28e   : > { %3308 = vst.msk [vmem:[%s10788_s26 + $0xa0] sm:$0xff] %vm3297_vm8, %v3275_v25  ;;  %v7876_v8 = vpop.f32.mrb[8].mxu1  ;;  %v3276_v43 = vadd.f32 %v7673_v17, %v10783_v58  ;;  %v3135_v22 = vpop.f32.mrb[11].mxu0 }
 0x28f   : > { %v6337_v35 = vadd.f32 %v7876_v8, %v10783_v58  ;;  %3306 = vst.msk [vmem:[%s10788_s26 + $0x80] sm:$0xff] %vm3297_vm8, %v3273_v36  ;;  %v6200_v51 = vpop.f32.mrb[9].mxu1  ;;  %v3274_v9 = vadd.f32 %v10783_v58, %v3135_v22 }
 0x290   : > { %v6335_v42 = vadd.f32 %v10783_v58, %v6200_v51  ;;  %3309 = vst.msk [vmem:[%s10788_s26 + $0xa8] sm:$0xff] %vm3297_vm8, %v3276_v43  ;;  %v7877_v54 = vpop.f32.mrb[10].mxu1 }
 0x291   : > { %7261 = vst.msk [vmem:[%s10788_s26 + $0xb0] sm:$0xff] %vm3297_vm8, %v6337_v35  ;;  %v6338_v10 = vadd.f32 %v7877_v54, %v10783_v58  ;;  %3307 = vst.msk [vmem:[%s10788_s26 + $0x88] sm:$0xff] %vm3297_vm8, %v3274_v9  ;;  %v6203_v30 = vpop.f32.mrb[11].mxu1 }
 0x292   : > { %7259 = vst.msk [vmem:[%s10788_s26 + $0x90] sm:$0xff] %vm3297_vm8, %v6335_v42  ;;  %v6336_v27 = vadd.f32 %v10783_v58, %v6203_v30 }
 0x293   : > { %7262 = vst.msk [vmem:[%s10788_s26 + $0xb8] sm:$0xff] %vm3297_vm8, %v6338_v10  ;;  %v7676_v44 = vpop.f32.mrb[12].mxu0 }
 0x294   : > { %7260 = vst.msk [vmem:[%s10788_s26 + $0x98] sm:$0xff] %vm3297_vm8, %v6336_v27  ;;  %v3279_v20 = vadd.f32 %v7676_v44, %v10783_v58  ;;  %v3148_v55 = vpop.f32.mrb[13].mxu0 }
 0x295   : > { %v3277_v31 = vadd.f32 %v10783_v58, %v3148_v55  ;;  %v7677_v59 = vpop.f32.mrb[14].mxu0 }
 0x296   : > { %3312 = vst.msk [vmem:[%s10788_s26 + $0xe0] sm:$0xff] %vm3297_vm8, %v3279_v20  ;;  %v7880_v19 = vpop.f32.mrb[12].mxu1  ;;  %v3280_v24 = vadd.f32 %v7677_v59, %v10783_v58  ;;  %v3151_v4 = vpop.f32.mrb[15].mxu0 }
 0x297   : > { %v6341_v26 = vadd.f32 %v7880_v19, %v10783_v58  ;;  %3310 = vst.msk [vmem:[%s10788_s26 + $0xc0] sm:$0xff] %vm3297_vm8, %v3277_v31  ;;  %v6216_v41 = vpop.f32.mrb[13].mxu1  ;;  %v3278_v12 = vadd.f32 %v10783_v58, %v3151_v4 }
 0x298   : > { %v6339_v61 = vadd.f32 %v10783_v58, %v6216_v41  ;;  %3313 = vst.msk [vmem:[%s10788_s26 + $0xe8] sm:$0xff] %vm3297_vm8, %v3280_v24  ;;  %v7881_v53 = vpop.f32.mrb[14].mxu1 }
 0x299   : > { %7265 = vst.msk [vmem:[%s10788_s26 + $0xf0] sm:$0xff] %vm3297_vm8, %v6341_v26  ;;  %v6342_v18 = vadd.f32 %v7881_v53, %v10783_v58  ;;  %3311 = vst.msk [vmem:[%s10788_s26 + $0xc8] sm:$0xff] %vm3297_vm8, %v3278_v12  ;;  %v6219_v50 = vpop.f32.mrb[15].mxu1 }
 0x29a   : > { %7263 = vst.msk [vmem:[%s10788_s26 + $0xd0] sm:$0xff] %vm3297_vm8, %v6339_v61  ;;  %v6340_v16 = vadd.f32 %v10783_v58, %v6219_v50 }
 0x29b   : > { %7266 = vst.msk [vmem:[%s10788_s26 + $0xf8] sm:$0xff] %vm3297_vm8, %v6342_v18  ;;  %v7680_v40 = vpop.f32.mrb[16].mxu0 }
 0x29c   : > { %7264 = vst.msk [vmem:[%s10788_s26 + $0xd8] sm:$0xff] %vm3297_vm8, %v6340_v16  ;;  %v3283_v3 = vadd.f32 %v7680_v40, %v10783_v58  ;;  %v3164_v38 = vpop.f32.mrb[17].mxu0 }
 0x29d   : > { %v3281_v5 = vadd.f32 %v10783_v58, %v3164_v38  ;;  %v7681_v63 = vpop.f32.mrb[18].mxu0 }
 0x29e   : > { %3316 = vst.msk [vmem:[%s10788_s26 + $0x120] sm:$0xff] %vm3297_vm8, %v3283_v3  ;;  %v7884_v47 = vpop.f32.mrb[16].mxu1  ;;  %v3284_v37 = vadd.f32 %v7681_v63, %v10783_v58  ;;  %v3167_v33 = vpop.f32.mrb[19].mxu0 }
 0x29f   : > { %v6345_v48 = vadd.f32 %v7884_v47, %v10783_v58  ;;  %3314 = vst.msk [vmem:[%s10788_s26 + $0x100] sm:$0xff] %vm3297_vm8, %v3281_v5  ;;  %v6232_v29 = vpop.f32.mrb[17].mxu1  ;;  %v3282_v14 = vadd.f32 %v10783_v58, %v3167_v33 }
 0x2a0   : > { %v6343_v60 = vadd.f32 %v10783_v58, %v6232_v29  ;;  %3317 = vst.msk [vmem:[%s10788_s26 + $0x128] sm:$0xff] %vm3297_vm8, %v3284_v37  ;;  %v7885_v62 = vpop.f32.mrb[18].mxu1 }
 0x2a1   : > { %7269 = vst.msk [vmem:[%s10788_s26 + $0x130] sm:$0xff] %vm3297_vm8, %v6345_v48  ;;  %v6346_v57 = vadd.f32 %v7885_v62, %v10783_v58  ;;  %3315 = vst.msk [vmem:[%s10788_s26 + $0x108] sm:$0xff] %vm3297_vm8, %v3282_v14  ;;  %v6235_v23 = vpop.f32.mrb[19].mxu1 }
 0x2a2   : > { %7267 = vst.msk [vmem:[%s10788_s26 + $0x110] sm:$0xff] %vm3297_vm8, %v6343_v60  ;;  %v6344_v15 = vadd.f32 %v10783_v58, %v6235_v23 }
 0x2a3   : > { %7270 = vst.msk [vmem:[%s10788_s26 + $0x138] sm:$0xff] %vm3297_vm8, %v6346_v57  ;;  %v7684_v56 = vpop.f32.mrb[20].mxu0 }
 0x2a4   : > { %7268 = vst.msk [vmem:[%s10788_s26 + $0x118] sm:$0xff] %vm3297_vm8, %v6344_v15  ;;  %v3287_v7 = vadd.f32 %v7684_v56, %v10783_v58  ;;  %v3180_v34 = vpop.f32.mrb[21].mxu0 }
 0x2a5   : > { %v3285_v32 = vadd.f32 %v10783_v58, %v3180_v34  ;;  %v7685_v45 = vpop.f32.mrb[22].mxu0 }
 0x2a6   : > { %3320 = vst.msk [vmem:[%s10788_s26 + $0x160] sm:$0xff] %vm3297_vm8, %v3287_v7  ;;  %v7888_v11 = vpop.f32.mrb[20].mxu1  ;;  %v3288_v39 = vadd.f32 %v7685_v45, %v10783_v58  ;;  %v3183_v6 = vpop.f32.mrb[23].mxu0 }
 0x2a7   : > { %v6349_v2 = vadd.f32 %v7888_v11, %v10783_v58  ;;  %3318 = vst.msk [vmem:[%s10788_s26 + $0x140] sm:$0xff] %vm3297_vm8, %v3285_v32  ;;  %v6248_v0 = vpop.f32.mrb[21].mxu1  ;;  %v3286_v21 = vadd.f32 %v10783_v58, %v3183_v6 }
 0x2a8   : > { %v6347_v52 = vadd.f32 %v10783_v58, %v6248_v0  ;;  %3321 = vst.msk [vmem:[%s10788_s26 + $0x168] sm:$0xff] %vm3297_vm8, %v3288_v39  ;;  %v7889_v46 = vpop.f32.mrb[22].mxu1 }
 0x2a9   : > { %7273 = vst.msk [vmem:[%s10788_s26 + $0x170] sm:$0xff] %vm3297_vm8, %v6349_v2  ;;  %v6350_v13 = vadd.f32 %v7889_v46, %v10783_v58  ;;  %3319 = vst.msk [vmem:[%s10788_s26 + $0x148] sm:$0xff] %vm3297_vm8, %v3286_v21  ;;  %v6251_v28 = vpop.f32.mrb[23].mxu1 }
 0x2aa   : > { %7271 = vst.msk [vmem:[%s10788_s26 + $0x150] sm:$0xff] %vm3297_vm8, %v6347_v52  ;;  %v6348_v1 = vadd.f32 %v10783_v58, %v6251_v28 }
 0x2ab   : > { %7274 = vst.msk [vmem:[%s10788_s26 + $0x178] sm:$0xff] %vm3297_vm8, %v6350_v13  ;;  %v7688_v25 = vpop.f32.mrb[24].mxu0 }
 0x2ac   : > { %7272 = vst.msk [vmem:[%s10788_s26 + $0x158] sm:$0xff] %vm3297_vm8, %v6348_v1  ;;  %v3291_v49 = vadd.f32 %v7688_v25, %v10783_v58  ;;  %v3196_v36 = vpop.f32.mrb[25].mxu0 }
 0x2ad   : > { %v3289_v17 = vadd.f32 %v10783_v58, %v3196_v36  ;;  %v7689_v8 = vpop.f32.mrb[26].mxu0 }
 0x2ae   : > { %3324 = vst.msk [vmem:[%s10788_s26 + $0x1a0] sm:$0xff] %vm3297_vm8, %v3291_v49  ;;  %v7892_v43 = vpop.f32.mrb[24].mxu1  ;;  %v3292_v22 = vadd.f32 %v7689_v8, %v10783_v58  ;;  %v3199_v35 = vpop.f32.mrb[27].mxu0 }
 0x2af   : > { %v6353_v51 = vadd.f32 %v7892_v43, %v10783_v58  ;;  %3322 = vst.msk [vmem:[%s10788_s26 + $0x180] sm:$0xff] %vm3297_vm8, %v3289_v17  ;;  %v6264_v9 = vpop.f32.mrb[25].mxu1  ;;  %v3290_v42 = vadd.f32 %v10783_v58, %v3199_v35 }
 0x2b0   : > { %v6351_v54 = vadd.f32 %v10783_v58, %v6264_v9  ;;  %3325 = vst.msk [vmem:[%s10788_s26 + $0x1a8] sm:$0xff] %vm3297_vm8, %v3292_v22  ;;  %v7893_v10 = vpop.f32.mrb[26].mxu1 }
 0x2b1   : > { %7277 = vst.msk [vmem:[%s10788_s26 + $0x1b0] sm:$0xff] %vm3297_vm8, %v6353_v51  ;;  %v6354_v30 = vadd.f32 %v7893_v10, %v10783_v58  ;;  %3323 = vst.msk [vmem:[%s10788_s26 + $0x188] sm:$0xff] %vm3297_vm8, %v3290_v42  ;;  %v6267_v27 = vpop.f32.mrb[27].mxu1 }
 0x2b2   : > { %7275 = vst.msk [vmem:[%s10788_s26 + $0x190] sm:$0xff] %vm3297_vm8, %v6351_v54  ;;  %v6352_v44 = vadd.f32 %v10783_v58, %v6267_v27 }
 0x2b3   : > { %7278 = vst.msk [vmem:[%s10788_s26 + $0x1b8] sm:$0xff] %vm3297_vm8, %v6354_v30  ;;  %v7692_v20 = vpop.f32.mrb[28].mxu0 }
 0x2b4   : > { %7276 = vst.msk [vmem:[%s10788_s26 + $0x198] sm:$0xff] %vm3297_vm8, %v6352_v44  ;;  %v3295_v55 = vadd.f32 %v7692_v20, %v10783_v58  ;;  %v3212_v31 = vpop.f32.mrb[29].mxu0 }
 0x2b5   : > { %v3293_v59 = vadd.f32 %v10783_v58, %v3212_v31  ;;  %v7693_v19 = vpop.f32.mrb[30].mxu0 }
 0x2b6   : > { %3328 = vst.msk [vmem:[%s10788_s26 + $0x1e0] sm:$0xff] %vm3297_vm8, %v3295_v55  ;;  %v7896_v24 = vpop.f32.mrb[28].mxu1  ;;  %v3296_v4 = vadd.f32 %v7693_v19, %v10783_v58  ;;  %v3215_v26 = vpop.f32.mrb[31].mxu0 }
 0x2b7   : > { %v6357_v41 = vadd.f32 %v7896_v24, %v10783_v58  ;;  %3326 = vst.msk [vmem:[%s10788_s26 + $0x1c0] sm:$0xff] %vm3297_vm8, %v3293_v59  ;;  %v6280_v12 = vpop.f32.mrb[29].mxu1  ;;  %v3294_v61 = vadd.f32 %v10783_v58, %v3215_v26 }
 0x2b8   : > { %v6355_v53 = vadd.f32 %v10783_v58, %v6280_v12  ;;  %3329 = vst.msk [vmem:[%s10788_s26 + $0x1e8] sm:$0xff] %vm3297_vm8, %v3296_v4  ;;  %v7897_v18 = vpop.f32.mrb[30].mxu1 }
 0x2b9   : > { %7281 = vst.msk [vmem:[%s10788_s26 + $0x1f0] sm:$0xff] %vm3297_vm8, %v6357_v41  ;;  %v6358_v50 = vadd.f32 %v7897_v18, %v10783_v58  ;;  %3327 = vst.msk [vmem:[%s10788_s26 + $0x1c8] sm:$0xff] %vm3297_vm8, %v3294_v61  ;;  %v6283_v16 = vpop.f32.mrb[31].mxu1 }
 0x2ba   : > { %7279 = vst.msk [vmem:[%s10788_s26 + $0x1d0] sm:$0xff] %vm3297_vm8, %v6355_v53  ;;  %v6356_v40 = vadd.f32 %v10783_v58, %v6283_v16 }
 0x2bb   : > { %7282 = vst.msk [vmem:[%s10788_s26 + $0x1f8] sm:$0xff] %vm3297_vm8, %v6358_v50 }
 0x2bc   : > { %7280 = vst.msk [vmem:[%s10788_s26 + $0x1d8] sm:$0xff] %vm3297_vm8, %v6356_v40 }
 0x2bd PF: > { %s13_s14 = sadd.s32 1, %s8441_s14   ;;  %s11035_s12 = smov %s8437_s13 }
 0x2be   : > { %p10_p5 = scmp.ge.s32.totalorder %s13_s14, 4   ;;  %s11036_s13 = smov %s11038_s15 }
 0x2c0   :  { %12 = sbr.rel (!%p10_p5) target bundleno = 2 (0x2), region = 82 }

</bundles_post_ra>
